<compile_context>
chip_gen: v5e
topology: v5e:2x2
jax: 0.10.0
libtpu: 0.0.40
codegen_flags: <defaults>
</compile_context>

<pallas_src>
import functools

import jax
import jax.numpy as jnp
from jax import lax
from jax.experimental import pallas as pl
from jax.experimental.pallas import tpu as pltpu

_LANE = 128
_SUBLANE = 8


@functools.lru_cache(maxsize=1)
def _block_bytes():
    """Per-generation pipelined block size (bytes) for the backward kernel."""
    try:
        kind = jax.devices()[0].device_kind.lower()
    except Exception:
        kind = ""
    if "v5 lite" in kind or "v5e" in kind or "v5lite" in kind:
        # v5e: ~0.82 TB/s HBM and a 16 MiB scoped-VMEM default -> keep 2 MiB.
        return 2 << 20
    if "v6" in kind or "v7" in kind or "7x" in kind:
        # v6e / v7x: high HBM BW makes the ~0.35us per-step overhead visible;
        # 6 MiB blocks (24 MiB across 2x in + 2x out buffers) still fit.
        return 6 << 20
    return 4 << 20


def _lane_dense_cols(total):
    """Pick a lane-dense column count (multiple of 128) that divides total."""
    for cols in (1024, 512, 256, _LANE):
        if total % cols == 0:
            return cols
    return None


def _neg_scale_kernel(g_ref, neg_lam_ref, o_ref):
    # Backward: dx = -lambda * grads. -lambda is a runtime SMEM scalar (scalar
    # slot read, fully hidden under DMA). Multiply in f32, cast back, so
    # bf16/fp16 grads don't see a rounded lambda. VPU work is free here.
    neg_lam = neg_lam_ref[0, 0]
    g = g_ref[...]
    o_ref[...] = (g.astype(jnp.float32) * neg_lam).astype(o_ref.dtype)


def _neg_scale_pallas(g, neg_lam, cols):
    """Tiled lane-dense -lambda*g. Returns None if a >=2-block grid is impossible."""
    total = g.size
    rows = total // cols
    g2 = g.reshape(rows, cols)
    itemsize = jnp.dtype(g2.dtype).itemsize
    # Sublane packing: 8 rows for 32-bit, 16 for bf16/fp16, 32 for int8/fp8.
    sub = max(_SUBLANE, 32 // max(1, itemsize))

    block_bytes = _block_bytes()
    row_bytes = cols * itemsize
    tr = max(sub, (block_bytes // row_bytes) // sub * sub)
    if pl.cdiv(rows, tr) < 2:
        # Never emit grid=(1,): keep >=2 blocks so both v7x TensorCores stream
        # and DMA/compute pipelining stays alive.
        tr = max(sub, (rows // 2) // sub * sub)
    n_blocks = pl.cdiv(rows, tr)
    if n_blocks < 2:
        return None  # caller falls back to the fused jnp path

    block_actual_bytes = tr * row_bytes
    # 2x in + 2x out double-buffering plus slack; explicit so v5e's 16 MiB
    # scoped default (and v7x's 32-of-64 MiB default) never bite.
    vmem_limit = int(4 * block_actual_bytes + (2 << 20))

    neg_lam_arr = jnp.reshape(neg_lam.astype(jnp.float32), (1, 1))

    out2 = pl.pallas_call(
        _neg_scale_kernel,
        out_shape=jax.ShapeDtypeStruct(g2.shape, g2.dtype),
        grid=(n_blocks,),
        in_specs=[
            pl.BlockSpec((tr, cols), lambda i: (i, 0)),
            pl.BlockSpec(memory_space=pltpu.MemorySpace.SMEM),
        ],
        out_specs=pl.BlockSpec((tr, cols), lambda i: (i, 0)),
        input_output_aliases={0: 0},
        cost_estimate=pl.CostEstimate(
            flops=total,
            transcendentals=0,
            bytes_accessed=2 * total * itemsize,
        ),
        compiler_params=pltpu.CompilerParams(
            dimension_semantics=("parallel",),
            vmem_limit_bytes=vmem_limit,
        ),
    )(g2, neg_lam_arr)
    return out2.reshape(g.shape)


def _neg_scale(g, lambda_):
    neg_lam = -jnp.asarray(lambda_, jnp.float32)
    nbytes = g.size * jnp.dtype(g.dtype).itemsize
    cols = _lane_dense_cols(g.size)

    out = None
    if cols is not None and nbytes >= 2 * _block_bytes():
        out = _neg_scale_pallas(g, neg_lam, cols)
    if out is None:
        # Small or lane-sparse cotangents: let XLA fuse the -lambda scale into
        # the producer (no extra HBM round trip, no pallas_call overhead).
        out = (g.astype(jnp.float32) * neg_lam).astype(g.dtype)
    return out


@jax.custom_vjp
def _gradient_reversal(x, lambda_):
    return x


def _grl_fwd(x, lambda_):
    return x, lambda_


def _grl_bwd(res, g):
    lambda_ = res
    # PyTorch returns None for lambda's grad; here an exact zero cotangent.
    return _neg_scale(g, lambda_), jnp.zeros_like(lambda_)


_gradient_reversal.defvjp(_grl_fwd, _grl_bwd)


def gradient_reversal(x, lambda_=1.0):
    """Forward: identity. Backward: cotangents are multiplied by -lambda.

    lambda_ may be a Python float or a traced JAX scalar (annealing schedules
    do NOT force a kernel recompile — lambda is read at runtime from SMEM).
    """
    return _gradient_reversal(x, jnp.asarray(lambda_, jnp.float32))


class GradientReversal:
    """JAX/Pallas mirror of the PyTorch GradientReversal module."""

    def __init__(self, lambda_=1.0):
        self.lambda_ = float(lambda_)

    def __call__(self, x):
        return gradient_reversal(x, self.lambda_)


if __name__ == "__main__":
    key = jax.random.PRNGKey(0)
    k1, k2, k3 = jax.random.split(key, 3)

    # --- Small NCHW input matching the PyTorch convention (fused jnp path).
    x = jax.random.normal(k1, (2, 4, 16, 16), dtype=jnp.float32)
    grl = GradientReversal(lambda_=1.0)

    y = jax.block_until_ready(grl(x))
    assert y.shape == x.shape and y.dtype == x.dtype
    assert bool(jnp.allclose(y, x)), "forward must be identity"

    dx = jax.block_until_ready(jax.grad(lambda inp: jnp.sum(grl(inp)))(x))
    assert bool(jnp.allclose(dx, -grl.lambda_ * jnp.ones_like(x))), \
        "backward must be -lambda * grads"

    # --- Large cotangent (16 MiB f32): exercises the tiled, lane-dense Pallas
    #     backward kernel on every TPU generation (>= 2 grid blocks).
    grl2 = GradientReversal(lambda_=0.5)
    big_shape = (4, 8, 512, 256)
    xb = jax.random.normal(k2, big_shape, dtype=jnp.float32)
    w = jax.random.normal(k3, big_shape, dtype=jnp.float32)

    yb = jax.block_until_ready(grl2(xb))
    assert bool(jnp.allclose(yb, xb)), "forward must be identity"

    loss = lambda inp: jnp.sum(grl2(inp) * lax.stop_gradient(w))
    dxb = jax.block_until_ready(jax.grad(loss)(xb))
    assert bool(jnp.allclose(dxb, -grl2.lambda_ * w, rtol=1e-6, atol=1e-6)), \
        "Pallas backward must be -lambda * grads"

    print("KERNEL_OK")
</pallas_src>

<mosaic_0001>
module attributes {stable_mosaic.version = 11 : i64} {
  func.func @_neg_scale_kernel(%arg0: i32, %arg1: memref<1024x1024xf32, #tpu.memory_space<vmem>>, %arg2: memref<1x1xf32, #tpu.memory_space<smem>>, %arg3: memref<1024x1024xf32, #tpu.memory_space<vmem>>) attributes {dimension_semantics = [#tpu.dimension_semantics<parallel>], iteration_bounds = array<i64: 4>, scalar_prefetch = 0 : i64, scratch_operands = 0 : i64, tpu.core_type = #tpu.core_type<tc>, window_params = [{transform_indices = @transform_0, window_bounds = array<i64: 1024, 1024>}, {transform_indices = @transform_1, window_bounds = array<i64: 1, 1>}, {transform_indices = @transform_2, window_bounds = array<i64: 1024, 1024>}]} {
    %c0 = arith.constant 0 : index
    %c0_0 = arith.constant 0 : index
    %0 = memref.load %arg2[%c0, %c0_0] : memref<1x1xf32, #tpu.memory_space<smem>>
    %c0_1 = arith.constant 0 : index
    %c0_2 = arith.constant 0 : index
    %1 = vector.load %arg1[%c0_1, %c0_2] : memref<1024x1024xf32, #tpu.memory_space<vmem>>, vector<1024x1024xf32>
    %2 = vector.broadcast %0 : f32 to vector<1024x1024xf32>
    %3 = arith.mulf %1, %2 : vector<1024x1024xf32>
    %c0_3 = arith.constant 0 : index
    %c0_4 = arith.constant 0 : index
    %4 = vector.load %arg3[%c0_3, %c0_4] : memref<1024x1024xf32, #tpu.memory_space<vmem>>, vector<1024x1024xf32>
    tpu.vector_store %arg3[%c0_3, %c0_4], %3 {strides = array<i32>} : memref<1024x1024xf32, #tpu.memory_space<vmem>>, vector<1024x1024xf32>,
    return
  }
  func.func @transform_0(%arg0: i32) -> (i32, i32) {
    %c0_i32 = arith.constant 0 : i32
    %c0_i32_0 = arith.constant 0 : i32
    return %arg0, %c0_i32 : i32, i32
  }
  func.func @transform_1(%arg0: i32) -> (i32, i32) {
    %c0_i32 = arith.constant 0 : i32
    %c0_i32_0 = arith.constant 0 : i32
    %c0_i32_1 = arith.constant 0 : i32
    return %c0_i32, %c0_i32_0 : i32, i32
  }
  func.func @transform_2(%arg0: i32) -> (i32, i32) {
    %c0_i32 = arith.constant 0 : i32
    %c0_i32_0 = arith.constant 0 : i32
    return %arg0, %c0_i32 : i32, i32
  }
}

</mosaic_0001>

<bundles_post_ra>
// kernel: tpu_custom_call.1
= control target key start
LH: loop header
LB: loop body
LE: loop exit
PB: predicated region body
PF: predicated region fallthrough
CT: control target
= control target key end

     0   :  { %s6726_s0 = inlined_call_operand.hbm [shape: f32[4096,1024], index: 0, kind: input, shape index: {}, may-alias: {0,2}]   ;;  %s6727_s1 = inlined_call_operand.<no memory space> [shape: f32[1,1], index: 1, kind: input, shape index: {}]   ;;  %s6728_s2 = inlined_call_operand.hbm [shape: f32[4096,1024], index: 2, kind: output, shape index: {}, may-alias: {0,2}]  }
   0x1   :  { %7 = sst [smem:[#allocation2]] %s6727_s1 }
   0x2   :  { %8 = vsyncpa [#allocation4], 0 }
   0x3   :  { %10 = vsyncpa [#allocation4 + $0x1], 0 }
   0x4   :  { %11 = vsyncpa [#allocation5], 0 }
   0x5   :  { %13 = vsyncpa [#allocation5 + $0x1], 0  ;;  %s3522_s11 = smov 0   ;;  %s3524_s12 = smov 0  }
   0x6   :  { %s3526_s13 = smov 0   ;;  %s3528_s14 = smov 0  }
   0x7 LB: > { %s3543_s1 = sadd.s32 4294967295, %s3498_s14   ;;  %s3332_s15 = sadd.s32 4294967294, %s3498_s14   ;;  %s3498_s14 = sphi %s3528_s14, %s6737_s14   ;;  %s3494_s13 = sphi %s3526_s13, %s6736_s13   ;;  %s3490_s12 = sphi %s3524_s12, %s6735_s12   ;;  %s3486_s11 = sphi %s3522_s11, %s6734_s11  }
   0x8   : > { %s3547_s16 = sadd.s32 1, %s3498_s14   ;;  %s26_s17 = sadd.s32 1, %s3494_s13 }
   0x9   : > { %s23_s18 = ssub.s32 %s3498_s14, %s3547_s16  ;;  %p33_p0 = scmp.ne.s32.totalorder %s3494_s13, %s3490_s12 }
   0xa   : > { %p24_p1 = scmp.eq.s32.totalorder %s23_s18, 0  ;;  %p34_p2 = scmp.eq.s32.totalorder %s3498_s14, 0 }
   0xb   : > { %p39_p3 = scmp.ne.s32.totalorder %s3490_s12, %s3486_s11  ;;  %p40_p4 = scmp.eq.s32.totalorder %s3543_s1, 0 }
   0xc   : > { %s3559_s19 = scalar_select %p24_p1, %s3494_s13, %s26_s17  }
   0xd   : > { %p3561_p5 = por %p34_p2, %p33_p0  ;;  %p3565_p6 = por %p40_p4, %p39_p3 }
   0xe   : > { %p84_p7 = scmp.eq.s32.totalorder %s3543_s1, 3  ;;  %p90_p8 = scmp.eq.s32.totalorder %s3332_s15, 3 }
   0xf   : > { %p3364_p9 = scmp.lt.s32.totalorder %s3498_s14, 4  ;;  %s113_s24 = sand.u32 1, %s3494_s13  }
  0x10   : > { %p3571_p10 = por %p84_p7, %p33_p0  ;;  %p3575_p11 = por %p90_p8, %p39_p3 }
  0x11   : > { %s3349_s25 = sshll.u32 %s3498_s14, 13  ;;  %s3335_s26 = sshll.u32 %s113_s24, 13 }
  0x12   : > { %s123_s29 = scalar_lea.hbm %s6726_s0, %s3349_s25  ;;  %s117_s3 = scalar_lea.vmem [#allocation3], %s3335_s26 }
  0x13   : > { %s124_s30 = sshll.u32 %s123_s29, 4  ;;  %s126_s4 = sshll.u32 %s117_s3, 4  ;;  %s125_s30 = int_to_ptr.hbm [resolvable:$true] %s124_s30  ;;  %s127_s4 = int_to_ptr.vmem [resolvable:$true] %s126_s4 }
  0x14   : > { %p3586_p12 = pnand %p3364_p9, %p3561_p5  ;;  %p3339_p13 = scmp.ge.s32.totalorder %s3498_s14, 1 }
  0x15   : > { %p134_p0 = scmp.lt.s32.totalorder %s3498_s14, 5  ;;  %s114_s6 = scalar_lea.sflag [#allocation4], %s113_s24 }
  0x16   : > { %s3402_s7 = sshra.s32 %s125_s30, 4  ;;  %p3406_p2 = pneg %p3586_p12  ;;  %s3403_s7 = int_to_ptr.hbm [resolvable:$true] %s3402_s7 }
  0x17   : > { %s3404_s8 = scalar_lea.hbm %s3403_s7, 8192  ;;  %s3409_s15 = scalar_lea.hbm %s6726_s0, 32768 }
  0x18   : > { %p3405_p1 = scmp.ne.s32.totalorder %s3403_s7, %s3404_s8  ;;  %p3410_p5 = scmp.lt.s32.totalorder %s3403_s7, %s6726_s0 }
  0x19   : > { %p3411_p7 = scmp.lt.s32.totalorder %s3409_s15, %s3404_s8 }
  0x1a   : > { %p3407_p3 = pnand %p3406_p2, %p3405_p1 }
  0x1b   : > { %p3412_p8 = por %p3411_p7, %p3410_p5 }
  0x1c   : > { %p3408_p4 = pneg %p3407_p3 }
  0x1e   : > { %p3413_p9 = pnand %p3412_p8, %p3408_p4 }
  0x20   : > { %3416 = shalt.err (!%p3413_p9)
}
  0x21   : > { %s3500_s20 = smov 1024   ;;  %s3501_s24 = smov 64  }
  0x22   : > { %3359 = dma.hbm_to_vmem [thread:$0]  (!%p3586_p12), %s125_s30, 131072, %s127_s4, %s114_s6, %s3500_s20, %s3500_s20, %s3501_s24  }
  0x23   : > { %p135_p1 = pnand %p3339_p13, %p134_p0 }
  0x24   : > { %s3607_s25 = sand.u32 (!%p135_p1), 1, %s3490_s12  }
  0x25   : > { %138 = sbr.rel (%p135_p1) target bundleno = 1079 (0x437), region = 28  ;;  %s3340_s26 = sshll.u32 (!%p135_p1), %s3607_s25, 13 }
  0x26   : > { %s141_s27 = scalar_lea.sflag (!%p135_p1), [#allocation4], %s3607_s25  ;;  %s3611_s28 = scalar_lea.vmem (!%p135_p1), [#allocation3], %s3340_s26 }
  0x2a   : > { %3477 = dma.done.wait (%p3565_p6), %s141_s27, 131072  }
  0x2b   : > { %3479 = vsyncadd (%p3565_p6), %s141_s27, 4294836224  ;;  %s168_s29 = sld [smem:[#allocation2]]  ;;  %v169_v0 = vld [vmem:[%s3611_s28] sm:$0xff]  ;;  %v170_v2 = vld [vmem:[%s3611_s28 + $0x8] sm:$0xff]  ;;  %s3630_s21 = scalar_lea.vmem [#allocation6], %s3340_s26 }
  0x2c   : > { %v171_v3 = vld [vmem:[%s3611_s28 + $0x10] sm:$0xff]  ;;  %v172_v7 = vld [vmem:[%s3611_s28 + $0x18] sm:$0xff]  ;;  %v173_v8 = vld [vmem:[%s3611_s28 + $0x20] sm:$0xff]  ;;  %s3351_s30 = sshll.u32 %s3543_s1, 13  ;;  %s3256_s5 = sshll.u32 %s3630_s21, 4  ;;  %s3257_s5 = int_to_ptr.vmem [resolvable:$true] %s3256_s5 }
  0x2d   : > { %v174_v9 = vld [vmem:[%s3611_s28 + $0x28] sm:$0xff]  ;;  %v175_v11 = vld [vmem:[%s3611_s28 + $0x30] sm:$0xff]  ;;  %v176_v13 = vld [vmem:[%s3611_s28 + $0x38] sm:$0xff]  ;;  %s3255_s1 = scalar_lea.hbm %s6728_s2, %s3351_s30  ;;  %s3243_s7 = scalar_lea.sflag [#allocation5], %s3607_s25 }
  0x2e   : > { %v177_v15 = vld [vmem:[%s3611_s28 + $0x40] sm:$0xff]  ;;  %v178_v17 = vld [vmem:[%s3611_s28 + $0x48] sm:$0xff]  ;;  %v179_v19 = vld [vmem:[%s3611_s28 + $0x50] sm:$0xff]  ;;  %s3258_s6 = sshll.u32 %s3255_s1, 4  ;;  %s3452_s17 = scalar_lea.hbm %s6728_s2, 32768  ;;  %s3259_s6 = int_to_ptr.hbm [resolvable:$true] %s3258_s6 }
  0x2f   : > { %v180_v21 = vld [vmem:[%s3611_s28 + $0x58] sm:$0xff]  ;;  %v181_v23 = vld [vmem:[%s3611_s28 + $0x60] sm:$0xff]  ;;  %v182_v25 = vld [vmem:[%s3611_s28 + $0x68] sm:$0xff]  ;;  %s3446_s8 = sshra.s32 %s3259_s6, 4  ;;  %s3447_s8 = int_to_ptr.hbm [resolvable:$true] %s3446_s8 }
  0x30   : > { %v183_v27 = vld [vmem:[%s3611_s28 + $0x70] sm:$0xff]  ;;  %v184_v29 = vld [vmem:[%s3611_s28 + $0x78] sm:$0xff]  ;;  %v185_v31 = vld [vmem:[%s3611_s28 + $0x80] sm:$0xff]  ;;  %s3448_s9 = scalar_lea.hbm %s3447_s8, 8192  ;;  %p3453_p0 = scmp.lt.s32.totalorder %s3447_s8, %s6728_s2 }
  0x31   : > { %v3618_v1 = vstv %s168_s29  ;;  %v186_v33 = vld [vmem:[%s3611_s28 + $0x88] sm:$0xff]  ;;  %v187_v35 = vld [vmem:[%s3611_s28 + $0x90] sm:$0xff]  ;;  %v188_v37 = vld [vmem:[%s3611_s28 + $0x98] sm:$0xff]  ;;  %p3449_p6 = scmp.ne.s32.totalorder %s3447_s8, %s3448_s9  ;;  %p3454_p2 = scmp.lt.s32.totalorder %s3452_s17, %s3448_s9 }
  0x32   : > { %v1194_v4 = vmul.f32 %v3618_v1, %v169_v0  ;;  %v1195_v5 = vmul.f32 %v3618_v1, %v170_v2  ;;  %v1196_v6 = vmul.f32 %v3618_v1, %v171_v3  ;;  %v1197_v10 = vmul.f32 %v3618_v1, %v172_v7  ;;  %v189_v39 = vld [vmem:[%s3611_s28 + $0xa0] sm:$0xff]  ;;  %v190_v41 = vld [vmem:[%s3611_s28 + $0xa8] sm:$0xff]  ;;  %v191_v43 = vld [vmem:[%s3611_s28 + $0xb0] sm:$0xff] }
  0x33   : > { %v1198_v12 = vmul.f32 %v3618_v1, %v173_v8  ;;  %v1199_v14 = vmul.f32 %v3618_v1, %v174_v9  ;;  %v1200_v16 = vmul.f32 %v3618_v1, %v175_v11  ;;  %v1201_v18 = vmul.f32 %v3618_v1, %v176_v13  ;;  %v192_v45 = vld [vmem:[%s3611_s28 + $0xb8] sm:$0xff]  ;;  %v193_v47 = vld [vmem:[%s3611_s28 + $0xc0] sm:$0xff]  ;;  %v194_v49 = vld [vmem:[%s3611_s28 + $0xc8] sm:$0xff]  ;;  %p3450_p12 = pnand %p3449_p6, %p3571_p10  ;;  %p3455_p3 = por %p3454_p2, %p3453_p0 }
  0x34   : > { %2218 = vst [vmem:[%s3630_s21] sm:$0xff] %v1194_v4  ;;  %v1202_v20 = vmul.f32 %v3618_v1, %v177_v15  ;;  %v1203_v22 = vmul.f32 %v3618_v1, %v178_v17  ;;  %v1204_v24 = vmul.f32 %v3618_v1, %v179_v19  ;;  %v1205_v26 = vmul.f32 %v3618_v1, %v180_v21  ;;  %v195_v51 = vld [vmem:[%s3611_s28 + $0xd0] sm:$0xff]  ;;  %v196_v53 = vld [vmem:[%s3611_s28 + $0xd8] sm:$0xff]  ;;  %v197_v55 = vld [vmem:[%s3611_s28 + $0xe0] sm:$0xff] }
  0x35   : > { %2219 = vst [vmem:[%s3630_s21 + $0x8] sm:$0xff] %v1195_v5  ;;  %v1206_v28 = vmul.f32 %v3618_v1, %v181_v23  ;;  %v1207_v30 = vmul.f32 %v3618_v1, %v182_v25  ;;  %v1208_v32 = vmul.f32 %v3618_v1, %v183_v27  ;;  %v1209_v34 = vmul.f32 %v3618_v1, %v184_v29  ;;  %v198_v57 = vld [vmem:[%s3611_s28 + $0xe8] sm:$0xff]  ;;  %v199_v59 = vld [vmem:[%s3611_s28 + $0xf0] sm:$0xff]  ;;  %v200_v61 = vld [vmem:[%s3611_s28 + $0xf8] sm:$0xff]  ;;  %p3451_p13 = pneg %p3450_p12 }
  0x36   : > { %2220 = vst [vmem:[%s3630_s21 + $0x10] sm:$0xff] %v1196_v6  ;;  %v1210_v36 = vmul.f32 %v3618_v1, %v185_v31  ;;  %v1211_v38 = vmul.f32 %v3618_v1, %v186_v33  ;;  %v1212_v40 = vmul.f32 %v3618_v1, %v187_v35  ;;  %v1213_v42 = vmul.f32 %v3618_v1, %v188_v37  ;;  %v201_v63 = vld [vmem:[%s3611_s28 + $0x100] sm:$0xff]  ;;  %v202_v2 = vld [vmem:[%s3611_s28 + $0x108] sm:$0xff]  ;;  %v203_v4 = vld [vmem:[%s3611_s28 + $0x110] sm:$0xff] }
  0x37   : > { %2221 = vst [vmem:[%s3630_s21 + $0x18] sm:$0xff] %v1197_v10  ;;  %v1214_v44 = vmul.f32 %v3618_v1, %v189_v39  ;;  %v1215_v46 = vmul.f32 %v3618_v1, %v190_v41  ;;  %v1216_v48 = vmul.f32 %v3618_v1, %v191_v43  ;;  %v1217_v50 = vmul.f32 %v3618_v1, %v192_v45  ;;  %v204_v6 = vld [vmem:[%s3611_s28 + $0x118] sm:$0xff]  ;;  %v205_v8 = vld [vmem:[%s3611_s28 + $0x120] sm:$0xff]  ;;  %v206_v10 = vld [vmem:[%s3611_s28 + $0x128] sm:$0xff]  ;;  %p3456_p4 = pnand %p3455_p3, %p3451_p13 }
  0x38   : > { %2222 = vst [vmem:[%s3630_s21 + $0x20] sm:$0xff] %v1198_v12  ;;  %v1218_v52 = vmul.f32 %v3618_v1, %v193_v47  ;;  %v1219_v54 = vmul.f32 %v3618_v1, %v194_v49  ;;  %v1220_v56 = vmul.f32 %v3618_v1, %v195_v51  ;;  %v1221_v58 = vmul.f32 %v3618_v1, %v196_v53  ;;  %v207_v12 = vld [vmem:[%s3611_s28 + $0x130] sm:$0xff] }
  0x39   : > { %2223 = vst [vmem:[%s3630_s21 + $0x28] sm:$0xff] %v1199_v14  ;;  %v1222_v60 = vmul.f32 %v3618_v1, %v197_v55  ;;  %v1223_v62 = vmul.f32 %v3618_v1, %v198_v57  ;;  %v1224_v0 = vmul.f32 %v3618_v1, %v199_v59  ;;  %v1225_v3 = vmul.f32 %v3618_v1, %v200_v61  ;;  %v208_v14 = vld [vmem:[%s3611_s28 + $0x138] sm:$0xff] }
  0x3a   : > { %2224 = vst [vmem:[%s3630_s21 + $0x30] sm:$0xff] %v1200_v16  ;;  %v1226_v5 = vmul.f32 %v3618_v1, %v201_v63  ;;  %v1227_v7 = vmul.f32 %v3618_v1, %v202_v2  ;;  %v1228_v9 = vmul.f32 %v3618_v1, %v203_v4  ;;  %v1229_v11 = vmul.f32 %v3618_v1, %v204_v6  ;;  %v209_v16 = vld [vmem:[%s3611_s28 + $0x140] sm:$0xff] }
  0x3b   : > { %2225 = vst [vmem:[%s3630_s21 + $0x38] sm:$0xff] %v1201_v18  ;;  %v1230_v13 = vmul.f32 %v3618_v1, %v205_v8  ;;  %v1231_v15 = vmul.f32 %v3618_v1, %v206_v10  ;;  %v1232_v17 = vmul.f32 %v3618_v1, %v207_v12  ;;  %v210_v18 = vld [vmem:[%s3611_s28 + $0x148] sm:$0xff]  ;;  %v1233_v19 = vmul.f32 %v3618_v1, %v208_v14 }
  0x3c   : > { %2226 = vst [vmem:[%s3630_s21 + $0x40] sm:$0xff] %v1202_v20  ;;  %v211_v20 = vld [vmem:[%s3611_s28 + $0x150] sm:$0xff]  ;;  %v1234_v21 = vmul.f32 %v3618_v1, %v209_v16  ;;  %v1235_v23 = vmul.f32 %v3618_v1, %v210_v18 }
  0x3d   : > { %2227 = vst [vmem:[%s3630_s21 + $0x48] sm:$0xff] %v1203_v22  ;;  %v212_v22 = vld [vmem:[%s3611_s28 + $0x158] sm:$0xff]  ;;  %v1236_v25 = vmul.f32 %v3618_v1, %v211_v20 }
  0x3e   : > { %2228 = vst [vmem:[%s3630_s21 + $0x50] sm:$0xff] %v1204_v24  ;;  %v213_v24 = vld [vmem:[%s3611_s28 + $0x160] sm:$0xff]  ;;  %v1237_v27 = vmul.f32 %v3618_v1, %v212_v22 }
  0x3f   : > { %2229 = vst [vmem:[%s3630_s21 + $0x58] sm:$0xff] %v1205_v26  ;;  %v214_v26 = vld [vmem:[%s3611_s28 + $0x168] sm:$0xff]  ;;  %v1238_v29 = vmul.f32 %v3618_v1, %v213_v24 }
  0x40   : > { %2230 = vst [vmem:[%s3630_s21 + $0x60] sm:$0xff] %v1206_v28  ;;  %v215_v28 = vld [vmem:[%s3611_s28 + $0x170] sm:$0xff]  ;;  %v1239_v31 = vmul.f32 %v3618_v1, %v214_v26 }
  0x41   : > { %2231 = vst [vmem:[%s3630_s21 + $0x68] sm:$0xff] %v1207_v30  ;;  %v216_v30 = vld [vmem:[%s3611_s28 + $0x178] sm:$0xff]  ;;  %v1240_v33 = vmul.f32 %v3618_v1, %v215_v28 }
  0x42   : > { %2232 = vst [vmem:[%s3630_s21 + $0x70] sm:$0xff] %v1208_v32  ;;  %v217_v32 = vld [vmem:[%s3611_s28 + $0x180] sm:$0xff]  ;;  %v1241_v35 = vmul.f32 %v3618_v1, %v216_v30 }
  0x43   : > { %2233 = vst [vmem:[%s3630_s21 + $0x78] sm:$0xff] %v1209_v34  ;;  %v218_v34 = vld [vmem:[%s3611_s28 + $0x188] sm:$0xff]  ;;  %v1242_v37 = vmul.f32 %v3618_v1, %v217_v32 }
  0x44   : > { %2234 = vst [vmem:[%s3630_s21 + $0x80] sm:$0xff] %v1210_v36  ;;  %v219_v36 = vld [vmem:[%s3611_s28 + $0x190] sm:$0xff]  ;;  %v1243_v39 = vmul.f32 %v3618_v1, %v218_v34 }
  0x45   : > { %2235 = vst [vmem:[%s3630_s21 + $0x88] sm:$0xff] %v1211_v38  ;;  %v220_v38 = vld [vmem:[%s3611_s28 + $0x198] sm:$0xff]  ;;  %v1244_v41 = vmul.f32 %v3618_v1, %v219_v36 }
  0x46   : > { %2236 = vst [vmem:[%s3630_s21 + $0x90] sm:$0xff] %v1212_v40  ;;  %v221_v40 = vld [vmem:[%s3611_s28 + $0x1a0] sm:$0xff]  ;;  %v1245_v43 = vmul.f32 %v3618_v1, %v220_v38 }
  0x47   : > { %2237 = vst [vmem:[%s3630_s21 + $0x98] sm:$0xff] %v1213_v42  ;;  %v222_v42 = vld [vmem:[%s3611_s28 + $0x1a8] sm:$0xff]  ;;  %v1246_v45 = vmul.f32 %v3618_v1, %v221_v40 }
  0x48   : > { %2238 = vst [vmem:[%s3630_s21 + $0xa0] sm:$0xff] %v1214_v44  ;;  %v223_v44 = vld [vmem:[%s3611_s28 + $0x1b0] sm:$0xff]  ;;  %v1247_v47 = vmul.f32 %v3618_v1, %v222_v42 }
  0x49   : > { %2239 = vst [vmem:[%s3630_s21 + $0xa8] sm:$0xff] %v1215_v46  ;;  %v224_v46 = vld [vmem:[%s3611_s28 + $0x1b8] sm:$0xff]  ;;  %v1248_v49 = vmul.f32 %v3618_v1, %v223_v44 }
  0x4a   : > { %2240 = vst [vmem:[%s3630_s21 + $0xb0] sm:$0xff] %v1216_v48  ;;  %v225_v48 = vld [vmem:[%s3611_s28 + $0x1c0] sm:$0xff]  ;;  %v1249_v51 = vmul.f32 %v3618_v1, %v224_v46 }
  0x4b   : > { %2241 = vst [vmem:[%s3630_s21 + $0xb8] sm:$0xff] %v1217_v50  ;;  %v226_v50 = vld [vmem:[%s3611_s28 + $0x1c8] sm:$0xff]  ;;  %v1250_v53 = vmul.f32 %v3618_v1, %v225_v48 }
  0x4c   : > { %2242 = vst [vmem:[%s3630_s21 + $0xc0] sm:$0xff] %v1218_v52  ;;  %v227_v52 = vld [vmem:[%s3611_s28 + $0x1d0] sm:$0xff]  ;;  %v1251_v55 = vmul.f32 %v3618_v1, %v226_v50 }
  0x4d   : > { %2243 = vst [vmem:[%s3630_s21 + $0xc8] sm:$0xff] %v1219_v54  ;;  %v228_v54 = vld [vmem:[%s3611_s28 + $0x1d8] sm:$0xff]  ;;  %v1252_v57 = vmul.f32 %v3618_v1, %v227_v52 }
  0x4e   : > { %2244 = vst [vmem:[%s3630_s21 + $0xd0] sm:$0xff] %v1220_v56  ;;  %v229_v56 = vld [vmem:[%s3611_s28 + $0x1e0] sm:$0xff]  ;;  %v1253_v59 = vmul.f32 %v3618_v1, %v228_v54 }
  0x4f   : > { %2245 = vst [vmem:[%s3630_s21 + $0xd8] sm:$0xff] %v1221_v58  ;;  %v230_v58 = vld [vmem:[%s3611_s28 + $0x1e8] sm:$0xff]  ;;  %v1254_v61 = vmul.f32 %v3618_v1, %v229_v56 }
  0x50   : > { %2246 = vst [vmem:[%s3630_s21 + $0xe0] sm:$0xff] %v1222_v60  ;;  %v231_v60 = vld [vmem:[%s3611_s28 + $0x1f0] sm:$0xff]  ;;  %v1255_v63 = vmul.f32 %v3618_v1, %v230_v58 }
  0x51   : > { %2247 = vst [vmem:[%s3630_s21 + $0xe8] sm:$0xff] %v1223_v62  ;;  %v232_v62 = vld [vmem:[%s3611_s28 + $0x1f8] sm:$0xff]  ;;  %v1256_v2 = vmul.f32 %v3618_v1, %v231_v60 }
  0x52   : > { %2248 = vst [vmem:[%s3630_s21 + $0xf0] sm:$0xff] %v1224_v0  ;;  %v233_v0 = vld [vmem:[%s3611_s28 + $0x200] sm:$0xff]  ;;  %v1257_v4 = vmul.f32 %v3618_v1, %v232_v62 }
  0x53   : > { %2249 = vst [vmem:[%s3630_s21 + $0xf8] sm:$0xff] %v1225_v3  ;;  %v234_v3 = vld [vmem:[%s3611_s28 + $0x208] sm:$0xff]  ;;  %v1258_v6 = vmul.f32 %v3618_v1, %v233_v0 }
  0x54   : > { %2250 = vst [vmem:[%s3630_s21 + $0x100] sm:$0xff] %v1226_v5  ;;  %v235_v5 = vld [vmem:[%s3611_s28 + $0x210] sm:$0xff]  ;;  %v1259_v8 = vmul.f32 %v3618_v1, %v234_v3 }
  0x55   : > { %2251 = vst [vmem:[%s3630_s21 + $0x108] sm:$0xff] %v1227_v7  ;;  %v236_v7 = vld [vmem:[%s3611_s28 + $0x218] sm:$0xff]  ;;  %v1260_v10 = vmul.f32 %v3618_v1, %v235_v5 }
  0x56   : > { %2252 = vst [vmem:[%s3630_s21 + $0x110] sm:$0xff] %v1228_v9  ;;  %v237_v9 = vld [vmem:[%s3611_s28 + $0x220] sm:$0xff]  ;;  %v1261_v12 = vmul.f32 %v3618_v1, %v236_v7 }
  0x57   : > { %2253 = vst [vmem:[%s3630_s21 + $0x118] sm:$0xff] %v1229_v11  ;;  %v238_v11 = vld [vmem:[%s3611_s28 + $0x228] sm:$0xff]  ;;  %v1262_v14 = vmul.f32 %v3618_v1, %v237_v9 }
  0x58   : > { %2254 = vst [vmem:[%s3630_s21 + $0x120] sm:$0xff] %v1230_v13  ;;  %v239_v13 = vld [vmem:[%s3611_s28 + $0x230] sm:$0xff]  ;;  %v1263_v16 = vmul.f32 %v3618_v1, %v238_v11 }
  0x59   : > { %2255 = vst [vmem:[%s3630_s21 + $0x128] sm:$0xff] %v1231_v15  ;;  %v240_v15 = vld [vmem:[%s3611_s28 + $0x238] sm:$0xff]  ;;  %v1264_v18 = vmul.f32 %v3618_v1, %v239_v13 }
  0x5a   : > { %2256 = vst [vmem:[%s3630_s21 + $0x130] sm:$0xff] %v1232_v17  ;;  %v241_v17 = vld [vmem:[%s3611_s28 + $0x240] sm:$0xff]  ;;  %v1265_v20 = vmul.f32 %v3618_v1, %v240_v15 }
  0x5b   : > { %2257 = vst [vmem:[%s3630_s21 + $0x138] sm:$0xff] %v1233_v19  ;;  %v242_v19 = vld [vmem:[%s3611_s28 + $0x248] sm:$0xff]  ;;  %v1266_v22 = vmul.f32 %v3618_v1, %v241_v17 }
  0x5c   : > { %2258 = vst [vmem:[%s3630_s21 + $0x140] sm:$0xff] %v1234_v21  ;;  %v243_v21 = vld [vmem:[%s3611_s28 + $0x250] sm:$0xff]  ;;  %v1267_v24 = vmul.f32 %v3618_v1, %v242_v19 }
  0x5d   : > { %2259 = vst [vmem:[%s3630_s21 + $0x148] sm:$0xff] %v1235_v23  ;;  %v244_v23 = vld [vmem:[%s3611_s28 + $0x258] sm:$0xff]  ;;  %v1268_v26 = vmul.f32 %v3618_v1, %v243_v21 }
  0x5e   : > { %2260 = vst [vmem:[%s3630_s21 + $0x150] sm:$0xff] %v1236_v25  ;;  %v245_v25 = vld [vmem:[%s3611_s28 + $0x260] sm:$0xff]  ;;  %v1269_v28 = vmul.f32 %v3618_v1, %v244_v23 }
  0x5f   : > { %2261 = vst [vmem:[%s3630_s21 + $0x158] sm:$0xff] %v1237_v27  ;;  %v246_v27 = vld [vmem:[%s3611_s28 + $0x268] sm:$0xff]  ;;  %v1270_v30 = vmul.f32 %v3618_v1, %v245_v25 }
  0x60   : > { %2262 = vst [vmem:[%s3630_s21 + $0x160] sm:$0xff] %v1238_v29  ;;  %v247_v29 = vld [vmem:[%s3611_s28 + $0x270] sm:$0xff]  ;;  %v1271_v32 = vmul.f32 %v3618_v1, %v246_v27 }
  0x61   : > { %2263 = vst [vmem:[%s3630_s21 + $0x168] sm:$0xff] %v1239_v31  ;;  %v248_v31 = vld [vmem:[%s3611_s28 + $0x278] sm:$0xff]  ;;  %v1272_v34 = vmul.f32 %v3618_v1, %v247_v29 }
  0x62   : > { %2264 = vst [vmem:[%s3630_s21 + $0x170] sm:$0xff] %v1240_v33  ;;  %v249_v33 = vld [vmem:[%s3611_s28 + $0x280] sm:$0xff]  ;;  %v1273_v36 = vmul.f32 %v3618_v1, %v248_v31 }
  0x63   : > { %2265 = vst [vmem:[%s3630_s21 + $0x178] sm:$0xff] %v1241_v35  ;;  %v250_v35 = vld [vmem:[%s3611_s28 + $0x288] sm:$0xff]  ;;  %v1274_v38 = vmul.f32 %v3618_v1, %v249_v33 }
  0x64   : > { %2266 = vst [vmem:[%s3630_s21 + $0x180] sm:$0xff] %v1242_v37  ;;  %v251_v37 = vld [vmem:[%s3611_s28 + $0x290] sm:$0xff]  ;;  %v1275_v40 = vmul.f32 %v3618_v1, %v250_v35 }
  0x65   : > { %2267 = vst [vmem:[%s3630_s21 + $0x188] sm:$0xff] %v1243_v39  ;;  %v252_v39 = vld [vmem:[%s3611_s28 + $0x298] sm:$0xff]  ;;  %v1276_v42 = vmul.f32 %v3618_v1, %v251_v37 }
  0x66   : > { %2268 = vst [vmem:[%s3630_s21 + $0x190] sm:$0xff] %v1244_v41  ;;  %v253_v41 = vld [vmem:[%s3611_s28 + $0x2a0] sm:$0xff]  ;;  %v1277_v44 = vmul.f32 %v3618_v1, %v252_v39 }
  0x67   : > { %2269 = vst [vmem:[%s3630_s21 + $0x198] sm:$0xff] %v1245_v43  ;;  %v254_v43 = vld [vmem:[%s3611_s28 + $0x2a8] sm:$0xff]  ;;  %v1278_v46 = vmul.f32 %v3618_v1, %v253_v41 }
  0x68   : > { %2270 = vst [vmem:[%s3630_s21 + $0x1a0] sm:$0xff] %v1246_v45  ;;  %v255_v45 = vld [vmem:[%s3611_s28 + $0x2b0] sm:$0xff]  ;;  %v1279_v48 = vmul.f32 %v3618_v1, %v254_v43 }
  0x69   : > { %2271 = vst [vmem:[%s3630_s21 + $0x1a8] sm:$0xff] %v1247_v47  ;;  %v256_v47 = vld [vmem:[%s3611_s28 + $0x2b8] sm:$0xff]  ;;  %v1280_v50 = vmul.f32 %v3618_v1, %v255_v45 }
  0x6a   : > { %2272 = vst [vmem:[%s3630_s21 + $0x1b0] sm:$0xff] %v1248_v49  ;;  %v257_v49 = vld [vmem:[%s3611_s28 + $0x2c0] sm:$0xff]  ;;  %v1281_v52 = vmul.f32 %v3618_v1, %v256_v47 }
  0x6b   : > { %2273 = vst [vmem:[%s3630_s21 + $0x1b8] sm:$0xff] %v1249_v51  ;;  %v258_v51 = vld [vmem:[%s3611_s28 + $0x2c8] sm:$0xff]  ;;  %v1282_v54 = vmul.f32 %v3618_v1, %v257_v49 }
  0x6c   : > { %2274 = vst [vmem:[%s3630_s21 + $0x1c0] sm:$0xff] %v1250_v53  ;;  %v259_v53 = vld [vmem:[%s3611_s28 + $0x2d0] sm:$0xff]  ;;  %v1283_v56 = vmul.f32 %v3618_v1, %v258_v51 }
  0x6d   : > { %2275 = vst [vmem:[%s3630_s21 + $0x1c8] sm:$0xff] %v1251_v55  ;;  %v260_v55 = vld [vmem:[%s3611_s28 + $0x2d8] sm:$0xff]  ;;  %v1284_v58 = vmul.f32 %v3618_v1, %v259_v53 }
  0x6e   : > { %2276 = vst [vmem:[%s3630_s21 + $0x1d0] sm:$0xff] %v1252_v57  ;;  %v261_v57 = vld [vmem:[%s3611_s28 + $0x2e0] sm:$0xff]  ;;  %v1285_v60 = vmul.f32 %v3618_v1, %v260_v55 }
  0x6f   : > { %2277 = vst [vmem:[%s3630_s21 + $0x1d8] sm:$0xff] %v1253_v59  ;;  %v262_v59 = vld [vmem:[%s3611_s28 + $0x2e8] sm:$0xff]  ;;  %v1286_v62 = vmul.f32 %v3618_v1, %v261_v57 }
  0x70   : > { %2278 = vst [vmem:[%s3630_s21 + $0x1e0] sm:$0xff] %v1254_v61  ;;  %v263_v61 = vld [vmem:[%s3611_s28 + $0x2f0] sm:$0xff]  ;;  %v1287_v0 = vmul.f32 %v3618_v1, %v262_v59 }
  0x71   : > { %2279 = vst [vmem:[%s3630_s21 + $0x1e8] sm:$0xff] %v1255_v63  ;;  %v264_v63 = vld [vmem:[%s3611_s28 + $0x2f8] sm:$0xff]  ;;  %v1288_v3 = vmul.f32 %v3618_v1, %v263_v61 }
  0x72   : > { %2280 = vst [vmem:[%s3630_s21 + $0x1f0] sm:$0xff] %v1256_v2  ;;  %v265_v2 = vld [vmem:[%s3611_s28 + $0x300] sm:$0xff]  ;;  %v1289_v5 = vmul.f32 %v3618_v1, %v264_v63 }
  0x73   : > { %2281 = vst [vmem:[%s3630_s21 + $0x1f8] sm:$0xff] %v1257_v4  ;;  %v266_v4 = vld [vmem:[%s3611_s28 + $0x308] sm:$0xff]  ;;  %v1290_v7 = vmul.f32 %v3618_v1, %v265_v2 }
  0x74   : > { %2282 = vst [vmem:[%s3630_s21 + $0x200] sm:$0xff] %v1258_v6  ;;  %v267_v6 = vld [vmem:[%s3611_s28 + $0x310] sm:$0xff]  ;;  %v1291_v9 = vmul.f32 %v3618_v1, %v266_v4 }
  0x75   : > { %2283 = vst [vmem:[%s3630_s21 + $0x208] sm:$0xff] %v1259_v8  ;;  %v268_v8 = vld [vmem:[%s3611_s28 + $0x318] sm:$0xff]  ;;  %v1292_v11 = vmul.f32 %v3618_v1, %v267_v6 }
  0x76   : > { %2284 = vst [vmem:[%s3630_s21 + $0x210] sm:$0xff] %v1260_v10  ;;  %v269_v10 = vld [vmem:[%s3611_s28 + $0x320] sm:$0xff]  ;;  %v1293_v13 = vmul.f32 %v3618_v1, %v268_v8 }
  0x77   : > { %2285 = vst [vmem:[%s3630_s21 + $0x218] sm:$0xff] %v1261_v12  ;;  %v270_v12 = vld [vmem:[%s3611_s28 + $0x328] sm:$0xff]  ;;  %v1294_v15 = vmul.f32 %v3618_v1, %v269_v10 }
  0x78   : > { %2286 = vst [vmem:[%s3630_s21 + $0x220] sm:$0xff] %v1262_v14  ;;  %v271_v14 = vld [vmem:[%s3611_s28 + $0x330] sm:$0xff]  ;;  %v1295_v17 = vmul.f32 %v3618_v1, %v270_v12 }
  0x79   : > { %2287 = vst [vmem:[%s3630_s21 + $0x228] sm:$0xff] %v1263_v16  ;;  %v272_v16 = vld [vmem:[%s3611_s28 + $0x338] sm:$0xff]  ;;  %v1296_v19 = vmul.f32 %v3618_v1, %v271_v14 }
  0x7a   : > { %2288 = vst [vmem:[%s3630_s21 + $0x230] sm:$0xff] %v1264_v18  ;;  %v273_v18 = vld [vmem:[%s3611_s28 + $0x340] sm:$0xff]  ;;  %v1297_v21 = vmul.f32 %v3618_v1, %v272_v16 }
  0x7b   : > { %2289 = vst [vmem:[%s3630_s21 + $0x238] sm:$0xff] %v1265_v20  ;;  %v274_v20 = vld [vmem:[%s3611_s28 + $0x348] sm:$0xff]  ;;  %v1298_v23 = vmul.f32 %v3618_v1, %v273_v18 }
  0x7c   : > { %2290 = vst [vmem:[%s3630_s21 + $0x240] sm:$0xff] %v1266_v22  ;;  %v275_v22 = vld [vmem:[%s3611_s28 + $0x350] sm:$0xff]  ;;  %v1299_v25 = vmul.f32 %v3618_v1, %v274_v20 }
  0x7d   : > { %2291 = vst [vmem:[%s3630_s21 + $0x248] sm:$0xff] %v1267_v24  ;;  %v276_v24 = vld [vmem:[%s3611_s28 + $0x358] sm:$0xff]  ;;  %v1300_v27 = vmul.f32 %v3618_v1, %v275_v22 }
  0x7e   : > { %2292 = vst [vmem:[%s3630_s21 + $0x250] sm:$0xff] %v1268_v26  ;;  %v277_v26 = vld [vmem:[%s3611_s28 + $0x360] sm:$0xff]  ;;  %v1301_v29 = vmul.f32 %v3618_v1, %v276_v24 }
  0x7f   : > { %2293 = vst [vmem:[%s3630_s21 + $0x258] sm:$0xff] %v1269_v28  ;;  %v278_v28 = vld [vmem:[%s3611_s28 + $0x368] sm:$0xff]  ;;  %v1302_v31 = vmul.f32 %v3618_v1, %v277_v26 }
  0x80   : > { %2294 = vst [vmem:[%s3630_s21 + $0x260] sm:$0xff] %v1270_v30  ;;  %v279_v30 = vld [vmem:[%s3611_s28 + $0x370] sm:$0xff]  ;;  %v1303_v33 = vmul.f32 %v3618_v1, %v278_v28 }
  0x81   : > { %2295 = vst [vmem:[%s3630_s21 + $0x268] sm:$0xff] %v1271_v32  ;;  %v280_v32 = vld [vmem:[%s3611_s28 + $0x378] sm:$0xff]  ;;  %v1304_v35 = vmul.f32 %v3618_v1, %v279_v30 }
  0x82   : > { %2296 = vst [vmem:[%s3630_s21 + $0x270] sm:$0xff] %v1272_v34  ;;  %v281_v34 = vld [vmem:[%s3611_s28 + $0x380] sm:$0xff]  ;;  %v1305_v37 = vmul.f32 %v3618_v1, %v280_v32 }
  0x83   : > { %2297 = vst [vmem:[%s3630_s21 + $0x278] sm:$0xff] %v1273_v36  ;;  %v282_v36 = vld [vmem:[%s3611_s28 + $0x388] sm:$0xff]  ;;  %v1306_v39 = vmul.f32 %v3618_v1, %v281_v34 }
  0x84   : > { %2298 = vst [vmem:[%s3630_s21 + $0x280] sm:$0xff] %v1274_v38  ;;  %v283_v38 = vld [vmem:[%s3611_s28 + $0x390] sm:$0xff]  ;;  %v1307_v41 = vmul.f32 %v3618_v1, %v282_v36 }
  0x85   : > { %2299 = vst [vmem:[%s3630_s21 + $0x288] sm:$0xff] %v1275_v40  ;;  %v284_v40 = vld [vmem:[%s3611_s28 + $0x398] sm:$0xff]  ;;  %v1308_v43 = vmul.f32 %v3618_v1, %v283_v38 }
  0x86   : > { %2300 = vst [vmem:[%s3630_s21 + $0x290] sm:$0xff] %v1276_v42  ;;  %v285_v42 = vld [vmem:[%s3611_s28 + $0x3a0] sm:$0xff]  ;;  %v1309_v45 = vmul.f32 %v3618_v1, %v284_v40 }
  0x87   : > { %2301 = vst [vmem:[%s3630_s21 + $0x298] sm:$0xff] %v1277_v44  ;;  %v286_v44 = vld [vmem:[%s3611_s28 + $0x3a8] sm:$0xff]  ;;  %v1310_v47 = vmul.f32 %v3618_v1, %v285_v42 }
  0x88   : > { %2302 = vst [vmem:[%s3630_s21 + $0x2a0] sm:$0xff] %v1278_v46  ;;  %v287_v46 = vld [vmem:[%s3611_s28 + $0x3b0] sm:$0xff]  ;;  %v1311_v49 = vmul.f32 %v3618_v1, %v286_v44 }
  0x89   : > { %2303 = vst [vmem:[%s3630_s21 + $0x2a8] sm:$0xff] %v1279_v48  ;;  %v288_v48 = vld [vmem:[%s3611_s28 + $0x3b8] sm:$0xff]  ;;  %v1312_v51 = vmul.f32 %v3618_v1, %v287_v46 }
  0x8a   : > { %2304 = vst [vmem:[%s3630_s21 + $0x2b0] sm:$0xff] %v1280_v50  ;;  %v289_v50 = vld [vmem:[%s3611_s28 + $0x3c0] sm:$0xff]  ;;  %v1313_v53 = vmul.f32 %v3618_v1, %v288_v48 }
  0x8b   : > { %2305 = vst [vmem:[%s3630_s21 + $0x2b8] sm:$0xff] %v1281_v52  ;;  %v290_v52 = vld [vmem:[%s3611_s28 + $0x3c8] sm:$0xff]  ;;  %v1314_v55 = vmul.f32 %v3618_v1, %v289_v50 }
  0x8c   : > { %2306 = vst [vmem:[%s3630_s21 + $0x2c0] sm:$0xff] %v1282_v54  ;;  %v291_v54 = vld [vmem:[%s3611_s28 + $0x3d0] sm:$0xff]  ;;  %v1315_v57 = vmul.f32 %v3618_v1, %v290_v52 }
  0x8d   : > { %2307 = vst [vmem:[%s3630_s21 + $0x2c8] sm:$0xff] %v1283_v56  ;;  %v292_v56 = vld [vmem:[%s3611_s28 + $0x3d8] sm:$0xff]  ;;  %v1316_v59 = vmul.f32 %v3618_v1, %v291_v54 }
  0x8e   : > { %2308 = vst [vmem:[%s3630_s21 + $0x2d0] sm:$0xff] %v1284_v58  ;;  %v293_v58 = vld [vmem:[%s3611_s28 + $0x3e0] sm:$0xff]  ;;  %v1317_v61 = vmul.f32 %v3618_v1, %v292_v56 }
  0x8f   : > { %2309 = vst [vmem:[%s3630_s21 + $0x2d8] sm:$0xff] %v1285_v60  ;;  %v294_v60 = vld [vmem:[%s3611_s28 + $0x3e8] sm:$0xff]  ;;  %v1318_v63 = vmul.f32 %v3618_v1, %v293_v58 }
  0x90   : > { %2310 = vst [vmem:[%s3630_s21 + $0x2e0] sm:$0xff] %v1286_v62  ;;  %v295_v62 = vld [vmem:[%s3611_s28 + $0x3f0] sm:$0xff]  ;;  %v1319_v2 = vmul.f32 %v3618_v1, %v294_v60 }
  0x91   : > { %2311 = vst [vmem:[%s3630_s21 + $0x2e8] sm:$0xff] %v1287_v0  ;;  %v296_v0 = vld [vmem:[%s3611_s28 + $0x3f8] sm:$0xff]  ;;  %v1320_v4 = vmul.f32 %v3618_v1, %v295_v62 }
  0x92   : > { %2312 = vst [vmem:[%s3630_s21 + $0x2f0] sm:$0xff] %v1288_v3  ;;  %v297_v3 = vld [vmem:[%s3611_s28 + $0x400] sm:$0xff]  ;;  %v1321_v6 = vmul.f32 %v3618_v1, %v296_v0 }
  0x93   : > { %2313 = vst [vmem:[%s3630_s21 + $0x2f8] sm:$0xff] %v1289_v5  ;;  %v298_v5 = vld [vmem:[%s3611_s28 + $0x408] sm:$0xff]  ;;  %v1322_v8 = vmul.f32 %v3618_v1, %v297_v3 }
  0x94   : > { %2314 = vst [vmem:[%s3630_s21 + $0x300] sm:$0xff] %v1290_v7  ;;  %v299_v7 = vld [vmem:[%s3611_s28 + $0x410] sm:$0xff]  ;;  %v1323_v10 = vmul.f32 %v3618_v1, %v298_v5 }
  0x95   : > { %2315 = vst [vmem:[%s3630_s21 + $0x308] sm:$0xff] %v1291_v9  ;;  %v300_v9 = vld [vmem:[%s3611_s28 + $0x418] sm:$0xff]  ;;  %v1324_v12 = vmul.f32 %v3618_v1, %v299_v7 }
  0x96   : > { %2316 = vst [vmem:[%s3630_s21 + $0x310] sm:$0xff] %v1292_v11  ;;  %v301_v11 = vld [vmem:[%s3611_s28 + $0x420] sm:$0xff]  ;;  %v1325_v14 = vmul.f32 %v3618_v1, %v300_v9 }
  0x97   : > { %2317 = vst [vmem:[%s3630_s21 + $0x318] sm:$0xff] %v1293_v13  ;;  %v302_v13 = vld [vmem:[%s3611_s28 + $0x428] sm:$0xff]  ;;  %v1326_v16 = vmul.f32 %v3618_v1, %v301_v11 }
  0x98   : > { %2318 = vst [vmem:[%s3630_s21 + $0x320] sm:$0xff] %v1294_v15  ;;  %v303_v15 = vld [vmem:[%s3611_s28 + $0x430] sm:$0xff]  ;;  %v1327_v18 = vmul.f32 %v3618_v1, %v302_v13 }
  0x99   : > { %2319 = vst [vmem:[%s3630_s21 + $0x328] sm:$0xff] %v1295_v17  ;;  %v304_v17 = vld [vmem:[%s3611_s28 + $0x438] sm:$0xff]  ;;  %v1328_v20 = vmul.f32 %v3618_v1, %v303_v15 }
  0x9a   : > { %2320 = vst [vmem:[%s3630_s21 + $0x330] sm:$0xff] %v1296_v19  ;;  %v305_v19 = vld [vmem:[%s3611_s28 + $0x440] sm:$0xff]  ;;  %v1329_v22 = vmul.f32 %v3618_v1, %v304_v17 }
  0x9b   : > { %2321 = vst [vmem:[%s3630_s21 + $0x338] sm:$0xff] %v1297_v21  ;;  %v306_v21 = vld [vmem:[%s3611_s28 + $0x448] sm:$0xff]  ;;  %v1330_v24 = vmul.f32 %v3618_v1, %v305_v19 }
  0x9c   : > { %2322 = vst [vmem:[%s3630_s21 + $0x340] sm:$0xff] %v1298_v23  ;;  %v307_v23 = vld [vmem:[%s3611_s28 + $0x450] sm:$0xff]  ;;  %v1331_v26 = vmul.f32 %v3618_v1, %v306_v21 }
  0x9d   : > { %2323 = vst [vmem:[%s3630_s21 + $0x348] sm:$0xff] %v1299_v25  ;;  %v308_v25 = vld [vmem:[%s3611_s28 + $0x458] sm:$0xff]  ;;  %v1332_v28 = vmul.f32 %v3618_v1, %v307_v23 }
  0x9e   : > { %2324 = vst [vmem:[%s3630_s21 + $0x350] sm:$0xff] %v1300_v27  ;;  %v309_v27 = vld [vmem:[%s3611_s28 + $0x460] sm:$0xff]  ;;  %v1333_v30 = vmul.f32 %v3618_v1, %v308_v25 }
  0x9f   : > { %2325 = vst [vmem:[%s3630_s21 + $0x358] sm:$0xff] %v1301_v29  ;;  %v310_v29 = vld [vmem:[%s3611_s28 + $0x468] sm:$0xff]  ;;  %v1334_v32 = vmul.f32 %v3618_v1, %v309_v27 }
  0xa0   : > { %2326 = vst [vmem:[%s3630_s21 + $0x360] sm:$0xff] %v1302_v31  ;;  %v311_v31 = vld [vmem:[%s3611_s28 + $0x470] sm:$0xff]  ;;  %v1335_v34 = vmul.f32 %v3618_v1, %v310_v29 }
  0xa1   : > { %2327 = vst [vmem:[%s3630_s21 + $0x368] sm:$0xff] %v1303_v33  ;;  %v312_v33 = vld [vmem:[%s3611_s28 + $0x478] sm:$0xff]  ;;  %v1336_v36 = vmul.f32 %v3618_v1, %v311_v31 }
  0xa2   : > { %2328 = vst [vmem:[%s3630_s21 + $0x370] sm:$0xff] %v1304_v35  ;;  %v313_v35 = vld [vmem:[%s3611_s28 + $0x480] sm:$0xff]  ;;  %v1337_v38 = vmul.f32 %v3618_v1, %v312_v33 }
  0xa3   : > { %2329 = vst [vmem:[%s3630_s21 + $0x378] sm:$0xff] %v1305_v37  ;;  %v314_v37 = vld [vmem:[%s3611_s28 + $0x488] sm:$0xff]  ;;  %v1338_v40 = vmul.f32 %v3618_v1, %v313_v35 }
  0xa4   : > { %2330 = vst [vmem:[%s3630_s21 + $0x380] sm:$0xff] %v1306_v39  ;;  %v315_v39 = vld [vmem:[%s3611_s28 + $0x490] sm:$0xff]  ;;  %v1339_v42 = vmul.f32 %v3618_v1, %v314_v37 }
  0xa5   : > { %2331 = vst [vmem:[%s3630_s21 + $0x388] sm:$0xff] %v1307_v41  ;;  %v316_v41 = vld [vmem:[%s3611_s28 + $0x498] sm:$0xff]  ;;  %v1340_v44 = vmul.f32 %v3618_v1, %v315_v39 }
  0xa6   : > { %2332 = vst [vmem:[%s3630_s21 + $0x390] sm:$0xff] %v1308_v43  ;;  %v317_v43 = vld [vmem:[%s3611_s28 + $0x4a0] sm:$0xff]  ;;  %v1341_v46 = vmul.f32 %v3618_v1, %v316_v41 }
  0xa7   : > { %2333 = vst [vmem:[%s3630_s21 + $0x398] sm:$0xff] %v1309_v45  ;;  %v318_v45 = vld [vmem:[%s3611_s28 + $0x4a8] sm:$0xff]  ;;  %v1342_v48 = vmul.f32 %v3618_v1, %v317_v43 }
  0xa8   : > { %2334 = vst [vmem:[%s3630_s21 + $0x3a0] sm:$0xff] %v1310_v47  ;;  %v319_v47 = vld [vmem:[%s3611_s28 + $0x4b0] sm:$0xff]  ;;  %v1343_v50 = vmul.f32 %v3618_v1, %v318_v45 }
  0xa9   : > { %2335 = vst [vmem:[%s3630_s21 + $0x3a8] sm:$0xff] %v1311_v49  ;;  %v320_v49 = vld [vmem:[%s3611_s28 + $0x4b8] sm:$0xff]  ;;  %v1344_v52 = vmul.f32 %v3618_v1, %v319_v47 }
  0xaa   : > { %2336 = vst [vmem:[%s3630_s21 + $0x3b0] sm:$0xff] %v1312_v51  ;;  %v321_v51 = vld [vmem:[%s3611_s28 + $0x4c0] sm:$0xff]  ;;  %v1345_v54 = vmul.f32 %v3618_v1, %v320_v49 }
  0xab   : > { %2337 = vst [vmem:[%s3630_s21 + $0x3b8] sm:$0xff] %v1313_v53  ;;  %v322_v53 = vld [vmem:[%s3611_s28 + $0x4c8] sm:$0xff]  ;;  %v1346_v56 = vmul.f32 %v3618_v1, %v321_v51 }
  0xac   : > { %2338 = vst [vmem:[%s3630_s21 + $0x3c0] sm:$0xff] %v1314_v55  ;;  %v323_v55 = vld [vmem:[%s3611_s28 + $0x4d0] sm:$0xff]  ;;  %v1347_v58 = vmul.f32 %v3618_v1, %v322_v53 }
  0xad   : > { %2339 = vst [vmem:[%s3630_s21 + $0x3c8] sm:$0xff] %v1315_v57  ;;  %v324_v57 = vld [vmem:[%s3611_s28 + $0x4d8] sm:$0xff]  ;;  %v1348_v60 = vmul.f32 %v3618_v1, %v323_v55 }
  0xae   : > { %2340 = vst [vmem:[%s3630_s21 + $0x3d0] sm:$0xff] %v1316_v59  ;;  %v325_v59 = vld [vmem:[%s3611_s28 + $0x4e0] sm:$0xff]  ;;  %v1349_v62 = vmul.f32 %v3618_v1, %v324_v57 }
  0xaf   : > { %2341 = vst [vmem:[%s3630_s21 + $0x3d8] sm:$0xff] %v1317_v61  ;;  %v326_v61 = vld [vmem:[%s3611_s28 + $0x4e8] sm:$0xff]  ;;  %v1350_v0 = vmul.f32 %v3618_v1, %v325_v59 }
  0xb0   : > { %2342 = vst [vmem:[%s3630_s21 + $0x3e0] sm:$0xff] %v1318_v63  ;;  %v327_v63 = vld [vmem:[%s3611_s28 + $0x4f0] sm:$0xff]  ;;  %v1351_v3 = vmul.f32 %v3618_v1, %v326_v61 }
  0xb1   : > { %2343 = vst [vmem:[%s3630_s21 + $0x3e8] sm:$0xff] %v1319_v2  ;;  %v328_v2 = vld [vmem:[%s3611_s28 + $0x4f8] sm:$0xff]  ;;  %v1352_v5 = vmul.f32 %v3618_v1, %v327_v63 }
  0xb2   : > { %2344 = vst [vmem:[%s3630_s21 + $0x3f0] sm:$0xff] %v1320_v4  ;;  %v329_v4 = vld [vmem:[%s3611_s28 + $0x500] sm:$0xff]  ;;  %v1353_v7 = vmul.f32 %v3618_v1, %v328_v2 }
  0xb3   : > { %2345 = vst [vmem:[%s3630_s21 + $0x3f8] sm:$0xff] %v1321_v6  ;;  %v330_v6 = vld [vmem:[%s3611_s28 + $0x508] sm:$0xff]  ;;  %v1354_v9 = vmul.f32 %v3618_v1, %v329_v4 }
  0xb4   : > { %2346 = vst [vmem:[%s3630_s21 + $0x400] sm:$0xff] %v1322_v8  ;;  %v331_v8 = vld [vmem:[%s3611_s28 + $0x510] sm:$0xff]  ;;  %v1355_v11 = vmul.f32 %v3618_v1, %v330_v6 }
  0xb5   : > { %2347 = vst [vmem:[%s3630_s21 + $0x408] sm:$0xff] %v1323_v10  ;;  %v332_v10 = vld [vmem:[%s3611_s28 + $0x518] sm:$0xff]  ;;  %v1356_v13 = vmul.f32 %v3618_v1, %v331_v8 }
  0xb6   : > { %2348 = vst [vmem:[%s3630_s21 + $0x410] sm:$0xff] %v1324_v12  ;;  %v333_v12 = vld [vmem:[%s3611_s28 + $0x520] sm:$0xff]  ;;  %v1357_v15 = vmul.f32 %v3618_v1, %v332_v10 }
  0xb7   : > { %2349 = vst [vmem:[%s3630_s21 + $0x418] sm:$0xff] %v1325_v14  ;;  %v334_v14 = vld [vmem:[%s3611_s28 + $0x528] sm:$0xff]  ;;  %v1358_v17 = vmul.f32 %v3618_v1, %v333_v12 }
  0xb8   : > { %2350 = vst [vmem:[%s3630_s21 + $0x420] sm:$0xff] %v1326_v16  ;;  %v335_v16 = vld [vmem:[%s3611_s28 + $0x530] sm:$0xff]  ;;  %v1359_v19 = vmul.f32 %v3618_v1, %v334_v14 }
  0xb9   : > { %2351 = vst [vmem:[%s3630_s21 + $0x428] sm:$0xff] %v1327_v18  ;;  %v336_v18 = vld [vmem:[%s3611_s28 + $0x538] sm:$0xff]  ;;  %v1360_v21 = vmul.f32 %v3618_v1, %v335_v16 }
  0xba   : > { %2352 = vst [vmem:[%s3630_s21 + $0x430] sm:$0xff] %v1328_v20  ;;  %v337_v20 = vld [vmem:[%s3611_s28 + $0x540] sm:$0xff]  ;;  %v1361_v23 = vmul.f32 %v3618_v1, %v336_v18 }
  0xbb   : > { %2353 = vst [vmem:[%s3630_s21 + $0x438] sm:$0xff] %v1329_v22  ;;  %v338_v22 = vld [vmem:[%s3611_s28 + $0x548] sm:$0xff]  ;;  %v1362_v25 = vmul.f32 %v3618_v1, %v337_v20 }
  0xbc   : > { %2354 = vst [vmem:[%s3630_s21 + $0x440] sm:$0xff] %v1330_v24  ;;  %v339_v24 = vld [vmem:[%s3611_s28 + $0x550] sm:$0xff]  ;;  %v1363_v27 = vmul.f32 %v3618_v1, %v338_v22 }
  0xbd   : > { %2355 = vst [vmem:[%s3630_s21 + $0x448] sm:$0xff] %v1331_v26  ;;  %v340_v26 = vld [vmem:[%s3611_s28 + $0x558] sm:$0xff]  ;;  %v1364_v29 = vmul.f32 %v3618_v1, %v339_v24 }
  0xbe   : > { %2356 = vst [vmem:[%s3630_s21 + $0x450] sm:$0xff] %v1332_v28  ;;  %v341_v28 = vld [vmem:[%s3611_s28 + $0x560] sm:$0xff]  ;;  %v1365_v31 = vmul.f32 %v3618_v1, %v340_v26 }
  0xbf   : > { %2357 = vst [vmem:[%s3630_s21 + $0x458] sm:$0xff] %v1333_v30  ;;  %v342_v30 = vld [vmem:[%s3611_s28 + $0x568] sm:$0xff]  ;;  %v1366_v33 = vmul.f32 %v3618_v1, %v341_v28 }
  0xc0   : > { %2358 = vst [vmem:[%s3630_s21 + $0x460] sm:$0xff] %v1334_v32  ;;  %v343_v32 = vld [vmem:[%s3611_s28 + $0x570] sm:$0xff]  ;;  %v1367_v35 = vmul.f32 %v3618_v1, %v342_v30 }
  0xc1   : > { %2359 = vst [vmem:[%s3630_s21 + $0x468] sm:$0xff] %v1335_v34  ;;  %v344_v34 = vld [vmem:[%s3611_s28 + $0x578] sm:$0xff]  ;;  %v1368_v37 = vmul.f32 %v3618_v1, %v343_v32 }
  0xc2   : > { %2360 = vst [vmem:[%s3630_s21 + $0x470] sm:$0xff] %v1336_v36  ;;  %v345_v36 = vld [vmem:[%s3611_s28 + $0x580] sm:$0xff]  ;;  %v1369_v39 = vmul.f32 %v3618_v1, %v344_v34 }
  0xc3   : > { %2361 = vst [vmem:[%s3630_s21 + $0x478] sm:$0xff] %v1337_v38  ;;  %v346_v38 = vld [vmem:[%s3611_s28 + $0x588] sm:$0xff]  ;;  %v1370_v41 = vmul.f32 %v3618_v1, %v345_v36 }
  0xc4   : > { %2362 = vst [vmem:[%s3630_s21 + $0x480] sm:$0xff] %v1338_v40  ;;  %v347_v40 = vld [vmem:[%s3611_s28 + $0x590] sm:$0xff]  ;;  %v1371_v43 = vmul.f32 %v3618_v1, %v346_v38 }
  0xc5   : > { %2363 = vst [vmem:[%s3630_s21 + $0x488] sm:$0xff] %v1339_v42  ;;  %v348_v42 = vld [vmem:[%s3611_s28 + $0x598] sm:$0xff]  ;;  %v1372_v45 = vmul.f32 %v3618_v1, %v347_v40 }
  0xc6   : > { %2364 = vst [vmem:[%s3630_s21 + $0x490] sm:$0xff] %v1340_v44  ;;  %v349_v44 = vld [vmem:[%s3611_s28 + $0x5a0] sm:$0xff]  ;;  %v1373_v47 = vmul.f32 %v3618_v1, %v348_v42 }
  0xc7   : > { %2365 = vst [vmem:[%s3630_s21 + $0x498] sm:$0xff] %v1341_v46  ;;  %v350_v46 = vld [vmem:[%s3611_s28 + $0x5a8] sm:$0xff]  ;;  %v1374_v49 = vmul.f32 %v3618_v1, %v349_v44 }
  0xc8   : > { %2366 = vst [vmem:[%s3630_s21 + $0x4a0] sm:$0xff] %v1342_v48  ;;  %v351_v48 = vld [vmem:[%s3611_s28 + $0x5b0] sm:$0xff]  ;;  %v1375_v51 = vmul.f32 %v3618_v1, %v350_v46 }
  0xc9   : > { %2367 = vst [vmem:[%s3630_s21 + $0x4a8] sm:$0xff] %v1343_v50  ;;  %v352_v50 = vld [vmem:[%s3611_s28 + $0x5b8] sm:$0xff]  ;;  %v1376_v53 = vmul.f32 %v3618_v1, %v351_v48 }
  0xca   : > { %2368 = vst [vmem:[%s3630_s21 + $0x4b0] sm:$0xff] %v1344_v52  ;;  %v353_v52 = vld [vmem:[%s3611_s28 + $0x5c0] sm:$0xff]  ;;  %v1377_v55 = vmul.f32 %v3618_v1, %v352_v50 }
  0xcb   : > { %2369 = vst [vmem:[%s3630_s21 + $0x4b8] sm:$0xff] %v1345_v54  ;;  %v354_v54 = vld [vmem:[%s3611_s28 + $0x5c8] sm:$0xff]  ;;  %v1378_v57 = vmul.f32 %v3618_v1, %v353_v52 }
  0xcc   : > { %2370 = vst [vmem:[%s3630_s21 + $0x4c0] sm:$0xff] %v1346_v56  ;;  %v355_v56 = vld [vmem:[%s3611_s28 + $0x5d0] sm:$0xff]  ;;  %v1379_v59 = vmul.f32 %v3618_v1, %v354_v54 }
  0xcd   : > { %2371 = vst [vmem:[%s3630_s21 + $0x4c8] sm:$0xff] %v1347_v58  ;;  %v356_v58 = vld [vmem:[%s3611_s28 + $0x5d8] sm:$0xff]  ;;  %v1380_v61 = vmul.f32 %v3618_v1, %v355_v56 }
  0xce   : > { %2372 = vst [vmem:[%s3630_s21 + $0x4d0] sm:$0xff] %v1348_v60  ;;  %v357_v60 = vld [vmem:[%s3611_s28 + $0x5e0] sm:$0xff]  ;;  %v1381_v63 = vmul.f32 %v3618_v1, %v356_v58 }
  0xcf   : > { %2373 = vst [vmem:[%s3630_s21 + $0x4d8] sm:$0xff] %v1349_v62  ;;  %v358_v62 = vld [vmem:[%s3611_s28 + $0x5e8] sm:$0xff]  ;;  %v1382_v2 = vmul.f32 %v3618_v1, %v357_v60 }
  0xd0   : > { %2374 = vst [vmem:[%s3630_s21 + $0x4e0] sm:$0xff] %v1350_v0  ;;  %v359_v0 = vld [vmem:[%s3611_s28 + $0x5f0] sm:$0xff]  ;;  %v1383_v4 = vmul.f32 %v3618_v1, %v358_v62 }
  0xd1   : > { %2375 = vst [vmem:[%s3630_s21 + $0x4e8] sm:$0xff] %v1351_v3  ;;  %v360_v3 = vld [vmem:[%s3611_s28 + $0x5f8] sm:$0xff]  ;;  %v1384_v6 = vmul.f32 %v3618_v1, %v359_v0 }
  0xd2   : > { %2376 = vst [vmem:[%s3630_s21 + $0x4f0] sm:$0xff] %v1352_v5  ;;  %v361_v5 = vld [vmem:[%s3611_s28 + $0x600] sm:$0xff]  ;;  %v1385_v8 = vmul.f32 %v3618_v1, %v360_v3 }
  0xd3   : > { %2377 = vst [vmem:[%s3630_s21 + $0x4f8] sm:$0xff] %v1353_v7  ;;  %v362_v7 = vld [vmem:[%s3611_s28 + $0x608] sm:$0xff]  ;;  %v1386_v10 = vmul.f32 %v3618_v1, %v361_v5 }
  0xd4   : > { %2378 = vst [vmem:[%s3630_s21 + $0x500] sm:$0xff] %v1354_v9  ;;  %v363_v9 = vld [vmem:[%s3611_s28 + $0x610] sm:$0xff]  ;;  %v1387_v12 = vmul.f32 %v3618_v1, %v362_v7 }
  0xd5   : > { %2379 = vst [vmem:[%s3630_s21 + $0x508] sm:$0xff] %v1355_v11  ;;  %v364_v11 = vld [vmem:[%s3611_s28 + $0x618] sm:$0xff]  ;;  %v1388_v14 = vmul.f32 %v3618_v1, %v363_v9 }
  0xd6   : > { %2380 = vst [vmem:[%s3630_s21 + $0x510] sm:$0xff] %v1356_v13  ;;  %v365_v13 = vld [vmem:[%s3611_s28 + $0x620] sm:$0xff]  ;;  %v1389_v16 = vmul.f32 %v3618_v1, %v364_v11 }
  0xd7   : > { %2381 = vst [vmem:[%s3630_s21 + $0x518] sm:$0xff] %v1357_v15  ;;  %v366_v15 = vld [vmem:[%s3611_s28 + $0x628] sm:$0xff]  ;;  %v1390_v18 = vmul.f32 %v3618_v1, %v365_v13 }
  0xd8   : > { %2382 = vst [vmem:[%s3630_s21 + $0x520] sm:$0xff] %v1358_v17  ;;  %v367_v17 = vld [vmem:[%s3611_s28 + $0x630] sm:$0xff]  ;;  %v1391_v20 = vmul.f32 %v3618_v1, %v366_v15 }
  0xd9   : > { %2383 = vst [vmem:[%s3630_s21 + $0x528] sm:$0xff] %v1359_v19  ;;  %v368_v19 = vld [vmem:[%s3611_s28 + $0x638] sm:$0xff]  ;;  %v1392_v22 = vmul.f32 %v3618_v1, %v367_v17 }
  0xda   : > { %2384 = vst [vmem:[%s3630_s21 + $0x530] sm:$0xff] %v1360_v21  ;;  %v369_v21 = vld [vmem:[%s3611_s28 + $0x640] sm:$0xff]  ;;  %v1393_v24 = vmul.f32 %v3618_v1, %v368_v19 }
  0xdb   : > { %2385 = vst [vmem:[%s3630_s21 + $0x538] sm:$0xff] %v1361_v23  ;;  %v370_v23 = vld [vmem:[%s3611_s28 + $0x648] sm:$0xff]  ;;  %v1394_v26 = vmul.f32 %v3618_v1, %v369_v21 }
  0xdc   : > { %2386 = vst [vmem:[%s3630_s21 + $0x540] sm:$0xff] %v1362_v25  ;;  %v371_v25 = vld [vmem:[%s3611_s28 + $0x650] sm:$0xff]  ;;  %v1395_v28 = vmul.f32 %v3618_v1, %v370_v23 }
  0xdd   : > { %2387 = vst [vmem:[%s3630_s21 + $0x548] sm:$0xff] %v1363_v27  ;;  %v372_v27 = vld [vmem:[%s3611_s28 + $0x658] sm:$0xff]  ;;  %v1396_v30 = vmul.f32 %v3618_v1, %v371_v25 }
  0xde   : > { %2388 = vst [vmem:[%s3630_s21 + $0x550] sm:$0xff] %v1364_v29  ;;  %v373_v29 = vld [vmem:[%s3611_s28 + $0x660] sm:$0xff]  ;;  %v1397_v32 = vmul.f32 %v3618_v1, %v372_v27 }
  0xdf   : > { %2389 = vst [vmem:[%s3630_s21 + $0x558] sm:$0xff] %v1365_v31  ;;  %v374_v31 = vld [vmem:[%s3611_s28 + $0x668] sm:$0xff]  ;;  %v1398_v34 = vmul.f32 %v3618_v1, %v373_v29 }
  0xe0   : > { %2390 = vst [vmem:[%s3630_s21 + $0x560] sm:$0xff] %v1366_v33  ;;  %v375_v33 = vld [vmem:[%s3611_s28 + $0x670] sm:$0xff]  ;;  %v1399_v36 = vmul.f32 %v3618_v1, %v374_v31 }
  0xe1   : > { %2391 = vst [vmem:[%s3630_s21 + $0x568] sm:$0xff] %v1367_v35  ;;  %v376_v35 = vld [vmem:[%s3611_s28 + $0x678] sm:$0xff]  ;;  %v1400_v38 = vmul.f32 %v3618_v1, %v375_v33 }
  0xe2   : > { %2392 = vst [vmem:[%s3630_s21 + $0x570] sm:$0xff] %v1368_v37  ;;  %v377_v37 = vld [vmem:[%s3611_s28 + $0x680] sm:$0xff]  ;;  %v1401_v40 = vmul.f32 %v3618_v1, %v376_v35 }
  0xe3   : > { %2393 = vst [vmem:[%s3630_s21 + $0x578] sm:$0xff] %v1369_v39  ;;  %v378_v39 = vld [vmem:[%s3611_s28 + $0x688] sm:$0xff]  ;;  %v1402_v42 = vmul.f32 %v3618_v1, %v377_v37 }
  0xe4   : > { %2394 = vst [vmem:[%s3630_s21 + $0x580] sm:$0xff] %v1370_v41  ;;  %v379_v41 = vld [vmem:[%s3611_s28 + $0x690] sm:$0xff]  ;;  %v1403_v44 = vmul.f32 %v3618_v1, %v378_v39 }
  0xe5   : > { %2395 = vst [vmem:[%s3630_s21 + $0x588] sm:$0xff] %v1371_v43  ;;  %v380_v43 = vld [vmem:[%s3611_s28 + $0x698] sm:$0xff]  ;;  %v1404_v46 = vmul.f32 %v3618_v1, %v379_v41 }
  0xe6   : > { %2396 = vst [vmem:[%s3630_s21 + $0x590] sm:$0xff] %v1372_v45  ;;  %v381_v45 = vld [vmem:[%s3611_s28 + $0x6a0] sm:$0xff]  ;;  %v1405_v48 = vmul.f32 %v3618_v1, %v380_v43 }
  0xe7   : > { %2397 = vst [vmem:[%s3630_s21 + $0x598] sm:$0xff] %v1373_v47  ;;  %v382_v47 = vld [vmem:[%s3611_s28 + $0x6a8] sm:$0xff]  ;;  %v1406_v50 = vmul.f32 %v3618_v1, %v381_v45 }
  0xe8   : > { %2398 = vst [vmem:[%s3630_s21 + $0x5a0] sm:$0xff] %v1374_v49  ;;  %v383_v49 = vld [vmem:[%s3611_s28 + $0x6b0] sm:$0xff]  ;;  %v1407_v52 = vmul.f32 %v3618_v1, %v382_v47 }
  0xe9   : > { %2399 = vst [vmem:[%s3630_s21 + $0x5a8] sm:$0xff] %v1375_v51  ;;  %v384_v51 = vld [vmem:[%s3611_s28 + $0x6b8] sm:$0xff]  ;;  %v1408_v54 = vmul.f32 %v3618_v1, %v383_v49 }
  0xea   : > { %2400 = vst [vmem:[%s3630_s21 + $0x5b0] sm:$0xff] %v1376_v53  ;;  %v385_v53 = vld [vmem:[%s3611_s28 + $0x6c0] sm:$0xff]  ;;  %v1409_v56 = vmul.f32 %v3618_v1, %v384_v51 }
  0xeb   : > { %2401 = vst [vmem:[%s3630_s21 + $0x5b8] sm:$0xff] %v1377_v55  ;;  %v386_v55 = vld [vmem:[%s3611_s28 + $0x6c8] sm:$0xff]  ;;  %v1410_v58 = vmul.f32 %v3618_v1, %v385_v53 }
  0xec   : > { %2402 = vst [vmem:[%s3630_s21 + $0x5c0] sm:$0xff] %v1378_v57  ;;  %v387_v57 = vld [vmem:[%s3611_s28 + $0x6d0] sm:$0xff]  ;;  %v1411_v60 = vmul.f32 %v3618_v1, %v386_v55 }
  0xed   : > { %2403 = vst [vmem:[%s3630_s21 + $0x5c8] sm:$0xff] %v1379_v59  ;;  %v388_v59 = vld [vmem:[%s3611_s28 + $0x6d8] sm:$0xff]  ;;  %v1412_v62 = vmul.f32 %v3618_v1, %v387_v57 }
  0xee   : > { %2404 = vst [vmem:[%s3630_s21 + $0x5d0] sm:$0xff] %v1380_v61  ;;  %v389_v61 = vld [vmem:[%s3611_s28 + $0x6e0] sm:$0xff]  ;;  %v1413_v0 = vmul.f32 %v3618_v1, %v388_v59 }
  0xef   : > { %2405 = vst [vmem:[%s3630_s21 + $0x5d8] sm:$0xff] %v1381_v63  ;;  %v390_v63 = vld [vmem:[%s3611_s28 + $0x6e8] sm:$0xff]  ;;  %v1414_v3 = vmul.f32 %v3618_v1, %v389_v61 }
  0xf0   : > { %2406 = vst [vmem:[%s3630_s21 + $0x5e0] sm:$0xff] %v1382_v2  ;;  %v391_v2 = vld [vmem:[%s3611_s28 + $0x6f0] sm:$0xff]  ;;  %v1415_v5 = vmul.f32 %v3618_v1, %v390_v63 }
  0xf1   : > { %2407 = vst [vmem:[%s3630_s21 + $0x5e8] sm:$0xff] %v1383_v4  ;;  %v392_v4 = vld [vmem:[%s3611_s28 + $0x6f8] sm:$0xff]  ;;  %v1416_v7 = vmul.f32 %v3618_v1, %v391_v2 }
  0xf2   : > { %2408 = vst [vmem:[%s3630_s21 + $0x5f0] sm:$0xff] %v1384_v6  ;;  %v393_v6 = vld [vmem:[%s3611_s28 + $0x700] sm:$0xff]  ;;  %v1417_v9 = vmul.f32 %v3618_v1, %v392_v4 }
  0xf3   : > { %2409 = vst [vmem:[%s3630_s21 + $0x5f8] sm:$0xff] %v1385_v8  ;;  %v394_v8 = vld [vmem:[%s3611_s28 + $0x708] sm:$0xff]  ;;  %v1418_v11 = vmul.f32 %v3618_v1, %v393_v6 }
  0xf4   : > { %2410 = vst [vmem:[%s3630_s21 + $0x600] sm:$0xff] %v1386_v10  ;;  %v395_v10 = vld [vmem:[%s3611_s28 + $0x710] sm:$0xff]  ;;  %v1419_v13 = vmul.f32 %v3618_v1, %v394_v8 }
  0xf5   : > { %2411 = vst [vmem:[%s3630_s21 + $0x608] sm:$0xff] %v1387_v12  ;;  %v396_v12 = vld [vmem:[%s3611_s28 + $0x718] sm:$0xff]  ;;  %v1420_v15 = vmul.f32 %v3618_v1, %v395_v10 }
  0xf6   : > { %2412 = vst [vmem:[%s3630_s21 + $0x610] sm:$0xff] %v1388_v14  ;;  %v397_v14 = vld [vmem:[%s3611_s28 + $0x720] sm:$0xff]  ;;  %v1421_v17 = vmul.f32 %v3618_v1, %v396_v12 }
  0xf7   : > { %2413 = vst [vmem:[%s3630_s21 + $0x618] sm:$0xff] %v1389_v16  ;;  %v398_v16 = vld [vmem:[%s3611_s28 + $0x728] sm:$0xff]  ;;  %v1422_v19 = vmul.f32 %v3618_v1, %v397_v14 }
  0xf8   : > { %2414 = vst [vmem:[%s3630_s21 + $0x620] sm:$0xff] %v1390_v18  ;;  %v399_v18 = vld [vmem:[%s3611_s28 + $0x730] sm:$0xff]  ;;  %v1423_v21 = vmul.f32 %v3618_v1, %v398_v16 }
  0xf9   : > { %2415 = vst [vmem:[%s3630_s21 + $0x628] sm:$0xff] %v1391_v20  ;;  %v400_v20 = vld [vmem:[%s3611_s28 + $0x738] sm:$0xff]  ;;  %v1424_v23 = vmul.f32 %v3618_v1, %v399_v18 }
  0xfa   : > { %2416 = vst [vmem:[%s3630_s21 + $0x630] sm:$0xff] %v1392_v22  ;;  %v401_v22 = vld [vmem:[%s3611_s28 + $0x740] sm:$0xff]  ;;  %v1425_v25 = vmul.f32 %v3618_v1, %v400_v20 }
  0xfb   : > { %2417 = vst [vmem:[%s3630_s21 + $0x638] sm:$0xff] %v1393_v24  ;;  %v402_v24 = vld [vmem:[%s3611_s28 + $0x748] sm:$0xff]  ;;  %v1426_v27 = vmul.f32 %v3618_v1, %v401_v22 }
  0xfc   : > { %2418 = vst [vmem:[%s3630_s21 + $0x640] sm:$0xff] %v1394_v26  ;;  %v403_v26 = vld [vmem:[%s3611_s28 + $0x750] sm:$0xff]  ;;  %v1427_v29 = vmul.f32 %v3618_v1, %v402_v24 }
  0xfd   : > { %2419 = vst [vmem:[%s3630_s21 + $0x648] sm:$0xff] %v1395_v28  ;;  %v404_v28 = vld [vmem:[%s3611_s28 + $0x758] sm:$0xff]  ;;  %v1428_v31 = vmul.f32 %v3618_v1, %v403_v26 }
  0xfe   : > { %2420 = vst [vmem:[%s3630_s21 + $0x650] sm:$0xff] %v1396_v30  ;;  %v405_v30 = vld [vmem:[%s3611_s28 + $0x760] sm:$0xff]  ;;  %v1429_v33 = vmul.f32 %v3618_v1, %v404_v28 }
  0xff   : > { %2421 = vst [vmem:[%s3630_s21 + $0x658] sm:$0xff] %v1397_v32  ;;  %v406_v32 = vld [vmem:[%s3611_s28 + $0x768] sm:$0xff]  ;;  %v1430_v35 = vmul.f32 %v3618_v1, %v405_v30 }
 0x100   : > { %2422 = vst [vmem:[%s3630_s21 + $0x660] sm:$0xff] %v1398_v34  ;;  %v407_v34 = vld [vmem:[%s3611_s28 + $0x770] sm:$0xff]  ;;  %v1431_v37 = vmul.f32 %v3618_v1, %v406_v32 }
 0x101   : > { %2423 = vst [vmem:[%s3630_s21 + $0x668] sm:$0xff] %v1399_v36  ;;  %v408_v36 = vld [vmem:[%s3611_s28 + $0x778] sm:$0xff]  ;;  %v1432_v39 = vmul.f32 %v3618_v1, %v407_v34 }
 0x102   : > { %2424 = vst [vmem:[%s3630_s21 + $0x670] sm:$0xff] %v1400_v38  ;;  %v409_v38 = vld [vmem:[%s3611_s28 + $0x780] sm:$0xff]  ;;  %v1433_v41 = vmul.f32 %v3618_v1, %v408_v36 }
 0x103   : > { %2425 = vst [vmem:[%s3630_s21 + $0x678] sm:$0xff] %v1401_v40  ;;  %v410_v40 = vld [vmem:[%s3611_s28 + $0x788] sm:$0xff]  ;;  %v1434_v43 = vmul.f32 %v3618_v1, %v409_v38 }
 0x104   : > { %2426 = vst [vmem:[%s3630_s21 + $0x680] sm:$0xff] %v1402_v42  ;;  %v411_v42 = vld [vmem:[%s3611_s28 + $0x790] sm:$0xff]  ;;  %v1435_v45 = vmul.f32 %v3618_v1, %v410_v40 }
 0x105   : > { %2427 = vst [vmem:[%s3630_s21 + $0x688] sm:$0xff] %v1403_v44  ;;  %v412_v44 = vld [vmem:[%s3611_s28 + $0x798] sm:$0xff]  ;;  %v1436_v47 = vmul.f32 %v3618_v1, %v411_v42 }
 0x106   : > { %2428 = vst [vmem:[%s3630_s21 + $0x690] sm:$0xff] %v1404_v46  ;;  %v413_v46 = vld [vmem:[%s3611_s28 + $0x7a0] sm:$0xff]  ;;  %v1437_v49 = vmul.f32 %v3618_v1, %v412_v44 }
 0x107   : > { %2429 = vst [vmem:[%s3630_s21 + $0x698] sm:$0xff] %v1405_v48  ;;  %v414_v48 = vld [vmem:[%s3611_s28 + $0x7a8] sm:$0xff]  ;;  %v1438_v51 = vmul.f32 %v3618_v1, %v413_v46 }
 0x108   : > { %2430 = vst [vmem:[%s3630_s21 + $0x6a0] sm:$0xff] %v1406_v50  ;;  %v415_v50 = vld [vmem:[%s3611_s28 + $0x7b0] sm:$0xff]  ;;  %v1439_v53 = vmul.f32 %v3618_v1, %v414_v48 }
 0x109   : > { %2431 = vst [vmem:[%s3630_s21 + $0x6a8] sm:$0xff] %v1407_v52  ;;  %v416_v52 = vld [vmem:[%s3611_s28 + $0x7b8] sm:$0xff]  ;;  %v1440_v55 = vmul.f32 %v3618_v1, %v415_v50 }
 0x10a   : > { %2432 = vst [vmem:[%s3630_s21 + $0x6b0] sm:$0xff] %v1408_v54  ;;  %v417_v54 = vld [vmem:[%s3611_s28 + $0x7c0] sm:$0xff]  ;;  %v1441_v57 = vmul.f32 %v3618_v1, %v416_v52 }
 0x10b   : > { %2433 = vst [vmem:[%s3630_s21 + $0x6b8] sm:$0xff] %v1409_v56  ;;  %v418_v56 = vld [vmem:[%s3611_s28 + $0x7c8] sm:$0xff]  ;;  %v1442_v59 = vmul.f32 %v3618_v1, %v417_v54 }
 0x10c   : > { %2434 = vst [vmem:[%s3630_s21 + $0x6c0] sm:$0xff] %v1410_v58  ;;  %v419_v58 = vld [vmem:[%s3611_s28 + $0x7d0] sm:$0xff]  ;;  %v1443_v61 = vmul.f32 %v3618_v1, %v418_v56 }
 0x10d   : > { %2435 = vst [vmem:[%s3630_s21 + $0x6c8] sm:$0xff] %v1411_v60  ;;  %v420_v60 = vld [vmem:[%s3611_s28 + $0x7d8] sm:$0xff]  ;;  %v1444_v63 = vmul.f32 %v3618_v1, %v419_v58 }
 0x10e   : > { %2436 = vst [vmem:[%s3630_s21 + $0x6d0] sm:$0xff] %v1412_v62  ;;  %v421_v62 = vld [vmem:[%s3611_s28 + $0x7e0] sm:$0xff]  ;;  %v1445_v2 = vmul.f32 %v3618_v1, %v420_v60 }
 0x10f   : > { %2437 = vst [vmem:[%s3630_s21 + $0x6d8] sm:$0xff] %v1413_v0  ;;  %v422_v0 = vld [vmem:[%s3611_s28 + $0x7e8] sm:$0xff]  ;;  %v1446_v4 = vmul.f32 %v3618_v1, %v421_v62 }
 0x110   : > { %2438 = vst [vmem:[%s3630_s21 + $0x6e0] sm:$0xff] %v1414_v3  ;;  %v423_v3 = vld [vmem:[%s3611_s28 + $0x7f0] sm:$0xff]  ;;  %v1447_v6 = vmul.f32 %v3618_v1, %v422_v0 }
 0x111   : > { %2439 = vst [vmem:[%s3630_s21 + $0x6e8] sm:$0xff] %v1415_v5  ;;  %v424_v5 = vld [vmem:[%s3611_s28 + $0x7f8] sm:$0xff]  ;;  %v1448_v8 = vmul.f32 %v3618_v1, %v423_v3 }
 0x112   : > { %2440 = vst [vmem:[%s3630_s21 + $0x6f0] sm:$0xff] %v1416_v7  ;;  %v425_v7 = vld [vmem:[%s3611_s28 + $0x800] sm:$0xff]  ;;  %v1449_v10 = vmul.f32 %v3618_v1, %v424_v5 }
 0x113   : > { %2441 = vst [vmem:[%s3630_s21 + $0x6f8] sm:$0xff] %v1417_v9  ;;  %v426_v9 = vld [vmem:[%s3611_s28 + $0x808] sm:$0xff]  ;;  %v1450_v12 = vmul.f32 %v3618_v1, %v425_v7 }
 0x114   : > { %2442 = vst [vmem:[%s3630_s21 + $0x700] sm:$0xff] %v1418_v11  ;;  %v427_v11 = vld [vmem:[%s3611_s28 + $0x810] sm:$0xff]  ;;  %v1451_v14 = vmul.f32 %v3618_v1, %v426_v9 }
 0x115   : > { %2443 = vst [vmem:[%s3630_s21 + $0x708] sm:$0xff] %v1419_v13  ;;  %v428_v13 = vld [vmem:[%s3611_s28 + $0x818] sm:$0xff]  ;;  %v1452_v16 = vmul.f32 %v3618_v1, %v427_v11 }
 0x116   : > { %2444 = vst [vmem:[%s3630_s21 + $0x710] sm:$0xff] %v1420_v15  ;;  %v429_v15 = vld [vmem:[%s3611_s28 + $0x820] sm:$0xff]  ;;  %v1453_v18 = vmul.f32 %v3618_v1, %v428_v13 }
 0x117   : > { %2445 = vst [vmem:[%s3630_s21 + $0x718] sm:$0xff] %v1421_v17  ;;  %v430_v17 = vld [vmem:[%s3611_s28 + $0x828] sm:$0xff]  ;;  %v1454_v20 = vmul.f32 %v3618_v1, %v429_v15 }
 0x118   : > { %2446 = vst [vmem:[%s3630_s21 + $0x720] sm:$0xff] %v1422_v19  ;;  %v431_v19 = vld [vmem:[%s3611_s28 + $0x830] sm:$0xff]  ;;  %v1455_v22 = vmul.f32 %v3618_v1, %v430_v17 }
 0x119   : > { %2447 = vst [vmem:[%s3630_s21 + $0x728] sm:$0xff] %v1423_v21  ;;  %v432_v21 = vld [vmem:[%s3611_s28 + $0x838] sm:$0xff]  ;;  %v1456_v24 = vmul.f32 %v3618_v1, %v431_v19 }
 0x11a   : > { %2448 = vst [vmem:[%s3630_s21 + $0x730] sm:$0xff] %v1424_v23  ;;  %v433_v23 = vld [vmem:[%s3611_s28 + $0x840] sm:$0xff]  ;;  %v1457_v26 = vmul.f32 %v3618_v1, %v432_v21 }
 0x11b   : > { %2449 = vst [vmem:[%s3630_s21 + $0x738] sm:$0xff] %v1425_v25  ;;  %v434_v25 = vld [vmem:[%s3611_s28 + $0x848] sm:$0xff]  ;;  %v1458_v28 = vmul.f32 %v3618_v1, %v433_v23 }
 0x11c   : > { %2450 = vst [vmem:[%s3630_s21 + $0x740] sm:$0xff] %v1426_v27  ;;  %v435_v27 = vld [vmem:[%s3611_s28 + $0x850] sm:$0xff]  ;;  %v1459_v30 = vmul.f32 %v3618_v1, %v434_v25 }
 0x11d   : > { %2451 = vst [vmem:[%s3630_s21 + $0x748] sm:$0xff] %v1427_v29  ;;  %v436_v29 = vld [vmem:[%s3611_s28 + $0x858] sm:$0xff]  ;;  %v1460_v32 = vmul.f32 %v3618_v1, %v435_v27 }
 0x11e   : > { %2452 = vst [vmem:[%s3630_s21 + $0x750] sm:$0xff] %v1428_v31  ;;  %v437_v31 = vld [vmem:[%s3611_s28 + $0x860] sm:$0xff]  ;;  %v1461_v34 = vmul.f32 %v3618_v1, %v436_v29 }
 0x11f   : > { %2453 = vst [vmem:[%s3630_s21 + $0x758] sm:$0xff] %v1429_v33  ;;  %v438_v33 = vld [vmem:[%s3611_s28 + $0x868] sm:$0xff]  ;;  %v1462_v36 = vmul.f32 %v3618_v1, %v437_v31 }
 0x120   : > { %2454 = vst [vmem:[%s3630_s21 + $0x760] sm:$0xff] %v1430_v35  ;;  %v439_v35 = vld [vmem:[%s3611_s28 + $0x870] sm:$0xff]  ;;  %v1463_v38 = vmul.f32 %v3618_v1, %v438_v33 }
 0x121   : > { %2455 = vst [vmem:[%s3630_s21 + $0x768] sm:$0xff] %v1431_v37  ;;  %v440_v37 = vld [vmem:[%s3611_s28 + $0x878] sm:$0xff]  ;;  %v1464_v40 = vmul.f32 %v3618_v1, %v439_v35 }
 0x122   : > { %2456 = vst [vmem:[%s3630_s21 + $0x770] sm:$0xff] %v1432_v39  ;;  %v441_v39 = vld [vmem:[%s3611_s28 + $0x880] sm:$0xff]  ;;  %v1465_v42 = vmul.f32 %v3618_v1, %v440_v37 }
 0x123   : > { %2457 = vst [vmem:[%s3630_s21 + $0x778] sm:$0xff] %v1433_v41  ;;  %v442_v41 = vld [vmem:[%s3611_s28 + $0x888] sm:$0xff]  ;;  %v1466_v44 = vmul.f32 %v3618_v1, %v441_v39 }
 0x124   : > { %2458 = vst [vmem:[%s3630_s21 + $0x780] sm:$0xff] %v1434_v43  ;;  %v443_v43 = vld [vmem:[%s3611_s28 + $0x890] sm:$0xff]  ;;  %v1467_v46 = vmul.f32 %v3618_v1, %v442_v41 }
 0x125   : > { %2459 = vst [vmem:[%s3630_s21 + $0x788] sm:$0xff] %v1435_v45  ;;  %v444_v45 = vld [vmem:[%s3611_s28 + $0x898] sm:$0xff]  ;;  %v1468_v48 = vmul.f32 %v3618_v1, %v443_v43 }
 0x126   : > { %2460 = vst [vmem:[%s3630_s21 + $0x790] sm:$0xff] %v1436_v47  ;;  %v445_v47 = vld [vmem:[%s3611_s28 + $0x8a0] sm:$0xff]  ;;  %v1469_v50 = vmul.f32 %v3618_v1, %v444_v45 }
 0x127   : > { %2461 = vst [vmem:[%s3630_s21 + $0x798] sm:$0xff] %v1437_v49  ;;  %v446_v49 = vld [vmem:[%s3611_s28 + $0x8a8] sm:$0xff]  ;;  %v1470_v52 = vmul.f32 %v3618_v1, %v445_v47 }
 0x128   : > { %2462 = vst [vmem:[%s3630_s21 + $0x7a0] sm:$0xff] %v1438_v51  ;;  %v447_v51 = vld [vmem:[%s3611_s28 + $0x8b0] sm:$0xff]  ;;  %v1471_v54 = vmul.f32 %v3618_v1, %v446_v49 }
 0x129   : > { %2463 = vst [vmem:[%s3630_s21 + $0x7a8] sm:$0xff] %v1439_v53  ;;  %v448_v53 = vld [vmem:[%s3611_s28 + $0x8b8] sm:$0xff]  ;;  %v1472_v56 = vmul.f32 %v3618_v1, %v447_v51 }
 0x12a   : > { %2464 = vst [vmem:[%s3630_s21 + $0x7b0] sm:$0xff] %v1440_v55  ;;  %v449_v55 = vld [vmem:[%s3611_s28 + $0x8c0] sm:$0xff]  ;;  %v1473_v58 = vmul.f32 %v3618_v1, %v448_v53 }
 0x12b   : > { %2465 = vst [vmem:[%s3630_s21 + $0x7b8] sm:$0xff] %v1441_v57  ;;  %v450_v57 = vld [vmem:[%s3611_s28 + $0x8c8] sm:$0xff]  ;;  %v1474_v60 = vmul.f32 %v3618_v1, %v449_v55 }
 0x12c   : > { %2466 = vst [vmem:[%s3630_s21 + $0x7c0] sm:$0xff] %v1442_v59  ;;  %v451_v59 = vld [vmem:[%s3611_s28 + $0x8d0] sm:$0xff]  ;;  %v1475_v62 = vmul.f32 %v3618_v1, %v450_v57 }
 0x12d   : > { %2467 = vst [vmem:[%s3630_s21 + $0x7c8] sm:$0xff] %v1443_v61  ;;  %v452_v61 = vld [vmem:[%s3611_s28 + $0x8d8] sm:$0xff]  ;;  %v1476_v0 = vmul.f32 %v3618_v1, %v451_v59 }
 0x12e   : > { %2468 = vst [vmem:[%s3630_s21 + $0x7d0] sm:$0xff] %v1444_v63  ;;  %v453_v63 = vld [vmem:[%s3611_s28 + $0x8e0] sm:$0xff]  ;;  %v1477_v3 = vmul.f32 %v3618_v1, %v452_v61 }
 0x12f   : > { %2469 = vst [vmem:[%s3630_s21 + $0x7d8] sm:$0xff] %v1445_v2  ;;  %v454_v2 = vld [vmem:[%s3611_s28 + $0x8e8] sm:$0xff]  ;;  %v1478_v5 = vmul.f32 %v3618_v1, %v453_v63 }
 0x130   : > { %2470 = vst [vmem:[%s3630_s21 + $0x7e0] sm:$0xff] %v1446_v4  ;;  %v455_v4 = vld [vmem:[%s3611_s28 + $0x8f0] sm:$0xff]  ;;  %v1479_v7 = vmul.f32 %v3618_v1, %v454_v2 }
 0x131   : > { %2471 = vst [vmem:[%s3630_s21 + $0x7e8] sm:$0xff] %v1447_v6  ;;  %v456_v6 = vld [vmem:[%s3611_s28 + $0x8f8] sm:$0xff]  ;;  %v1480_v9 = vmul.f32 %v3618_v1, %v455_v4 }
 0x132   : > { %2472 = vst [vmem:[%s3630_s21 + $0x7f0] sm:$0xff] %v1448_v8  ;;  %v457_v8 = vld [vmem:[%s3611_s28 + $0x900] sm:$0xff]  ;;  %v1481_v11 = vmul.f32 %v3618_v1, %v456_v6 }
 0x133   : > { %2473 = vst [vmem:[%s3630_s21 + $0x7f8] sm:$0xff] %v1449_v10  ;;  %v458_v10 = vld [vmem:[%s3611_s28 + $0x908] sm:$0xff]  ;;  %v1482_v13 = vmul.f32 %v3618_v1, %v457_v8 }
 0x134   : > { %2474 = vst [vmem:[%s3630_s21 + $0x800] sm:$0xff] %v1450_v12  ;;  %v459_v12 = vld [vmem:[%s3611_s28 + $0x910] sm:$0xff]  ;;  %v1483_v15 = vmul.f32 %v3618_v1, %v458_v10 }
 0x135   : > { %2475 = vst [vmem:[%s3630_s21 + $0x808] sm:$0xff] %v1451_v14  ;;  %v460_v14 = vld [vmem:[%s3611_s28 + $0x918] sm:$0xff]  ;;  %v1484_v17 = vmul.f32 %v3618_v1, %v459_v12 }
 0x136   : > { %2476 = vst [vmem:[%s3630_s21 + $0x810] sm:$0xff] %v1452_v16  ;;  %v461_v16 = vld [vmem:[%s3611_s28 + $0x920] sm:$0xff]  ;;  %v1485_v19 = vmul.f32 %v3618_v1, %v460_v14 }
 0x137   : > { %2477 = vst [vmem:[%s3630_s21 + $0x818] sm:$0xff] %v1453_v18  ;;  %v462_v18 = vld [vmem:[%s3611_s28 + $0x928] sm:$0xff]  ;;  %v1486_v21 = vmul.f32 %v3618_v1, %v461_v16 }
 0x138   : > { %2478 = vst [vmem:[%s3630_s21 + $0x820] sm:$0xff] %v1454_v20  ;;  %v463_v20 = vld [vmem:[%s3611_s28 + $0x930] sm:$0xff]  ;;  %v1487_v23 = vmul.f32 %v3618_v1, %v462_v18 }
 0x139   : > { %2479 = vst [vmem:[%s3630_s21 + $0x828] sm:$0xff] %v1455_v22  ;;  %v464_v22 = vld [vmem:[%s3611_s28 + $0x938] sm:$0xff]  ;;  %v1488_v25 = vmul.f32 %v3618_v1, %v463_v20 }
 0x13a   : > { %2480 = vst [vmem:[%s3630_s21 + $0x830] sm:$0xff] %v1456_v24  ;;  %v465_v24 = vld [vmem:[%s3611_s28 + $0x940] sm:$0xff]  ;;  %v1489_v27 = vmul.f32 %v3618_v1, %v464_v22 }
 0x13b   : > { %2481 = vst [vmem:[%s3630_s21 + $0x838] sm:$0xff] %v1457_v26  ;;  %v466_v26 = vld [vmem:[%s3611_s28 + $0x948] sm:$0xff]  ;;  %v1490_v29 = vmul.f32 %v3618_v1, %v465_v24 }
 0x13c   : > { %2482 = vst [vmem:[%s3630_s21 + $0x840] sm:$0xff] %v1458_v28  ;;  %v467_v28 = vld [vmem:[%s3611_s28 + $0x950] sm:$0xff]  ;;  %v1491_v31 = vmul.f32 %v3618_v1, %v466_v26 }
 0x13d   : > { %2483 = vst [vmem:[%s3630_s21 + $0x848] sm:$0xff] %v1459_v30  ;;  %v468_v30 = vld [vmem:[%s3611_s28 + $0x958] sm:$0xff]  ;;  %v1492_v33 = vmul.f32 %v3618_v1, %v467_v28 }
 0x13e   : > { %2484 = vst [vmem:[%s3630_s21 + $0x850] sm:$0xff] %v1460_v32  ;;  %v469_v32 = vld [vmem:[%s3611_s28 + $0x960] sm:$0xff]  ;;  %v1493_v35 = vmul.f32 %v3618_v1, %v468_v30 }
 0x13f   : > { %2485 = vst [vmem:[%s3630_s21 + $0x858] sm:$0xff] %v1461_v34  ;;  %v470_v34 = vld [vmem:[%s3611_s28 + $0x968] sm:$0xff]  ;;  %v1494_v37 = vmul.f32 %v3618_v1, %v469_v32 }
 0x140   : > { %2486 = vst [vmem:[%s3630_s21 + $0x860] sm:$0xff] %v1462_v36  ;;  %v471_v36 = vld [vmem:[%s3611_s28 + $0x970] sm:$0xff]  ;;  %v1495_v39 = vmul.f32 %v3618_v1, %v470_v34 }
 0x141   : > { %2487 = vst [vmem:[%s3630_s21 + $0x868] sm:$0xff] %v1463_v38  ;;  %v472_v38 = vld [vmem:[%s3611_s28 + $0x978] sm:$0xff]  ;;  %v1496_v41 = vmul.f32 %v3618_v1, %v471_v36 }
 0x142   : > { %2488 = vst [vmem:[%s3630_s21 + $0x870] sm:$0xff] %v1464_v40  ;;  %v473_v40 = vld [vmem:[%s3611_s28 + $0x980] sm:$0xff]  ;;  %v1497_v43 = vmul.f32 %v3618_v1, %v472_v38 }
 0x143   : > { %2489 = vst [vmem:[%s3630_s21 + $0x878] sm:$0xff] %v1465_v42  ;;  %v474_v42 = vld [vmem:[%s3611_s28 + $0x988] sm:$0xff]  ;;  %v1498_v45 = vmul.f32 %v3618_v1, %v473_v40 }
 0x144   : > { %2490 = vst [vmem:[%s3630_s21 + $0x880] sm:$0xff] %v1466_v44  ;;  %v475_v44 = vld [vmem:[%s3611_s28 + $0x990] sm:$0xff]  ;;  %v1499_v47 = vmul.f32 %v3618_v1, %v474_v42 }
 0x145   : > { %2491 = vst [vmem:[%s3630_s21 + $0x888] sm:$0xff] %v1467_v46  ;;  %v476_v46 = vld [vmem:[%s3611_s28 + $0x998] sm:$0xff]  ;;  %v1500_v49 = vmul.f32 %v3618_v1, %v475_v44 }
 0x146   : > { %2492 = vst [vmem:[%s3630_s21 + $0x890] sm:$0xff] %v1468_v48  ;;  %v477_v48 = vld [vmem:[%s3611_s28 + $0x9a0] sm:$0xff]  ;;  %v1501_v51 = vmul.f32 %v3618_v1, %v476_v46 }
 0x147   : > { %2493 = vst [vmem:[%s3630_s21 + $0x898] sm:$0xff] %v1469_v50  ;;  %v478_v50 = vld [vmem:[%s3611_s28 + $0x9a8] sm:$0xff]  ;;  %v1502_v53 = vmul.f32 %v3618_v1, %v477_v48 }
 0x148   : > { %2494 = vst [vmem:[%s3630_s21 + $0x8a0] sm:$0xff] %v1470_v52  ;;  %v479_v52 = vld [vmem:[%s3611_s28 + $0x9b0] sm:$0xff]  ;;  %v1503_v55 = vmul.f32 %v3618_v1, %v478_v50 }
 0x149   : > { %2495 = vst [vmem:[%s3630_s21 + $0x8a8] sm:$0xff] %v1471_v54  ;;  %v480_v54 = vld [vmem:[%s3611_s28 + $0x9b8] sm:$0xff]  ;;  %v1504_v57 = vmul.f32 %v3618_v1, %v479_v52 }
 0x14a   : > { %2496 = vst [vmem:[%s3630_s21 + $0x8b0] sm:$0xff] %v1472_v56  ;;  %v481_v56 = vld [vmem:[%s3611_s28 + $0x9c0] sm:$0xff]  ;;  %v1505_v59 = vmul.f32 %v3618_v1, %v480_v54 }
 0x14b   : > { %2497 = vst [vmem:[%s3630_s21 + $0x8b8] sm:$0xff] %v1473_v58  ;;  %v482_v58 = vld [vmem:[%s3611_s28 + $0x9c8] sm:$0xff]  ;;  %v1506_v61 = vmul.f32 %v3618_v1, %v481_v56 }
 0x14c   : > { %2498 = vst [vmem:[%s3630_s21 + $0x8c0] sm:$0xff] %v1474_v60  ;;  %v483_v60 = vld [vmem:[%s3611_s28 + $0x9d0] sm:$0xff]  ;;  %v1507_v63 = vmul.f32 %v3618_v1, %v482_v58 }
 0x14d   : > { %2499 = vst [vmem:[%s3630_s21 + $0x8c8] sm:$0xff] %v1475_v62  ;;  %v484_v62 = vld [vmem:[%s3611_s28 + $0x9d8] sm:$0xff]  ;;  %v1508_v2 = vmul.f32 %v3618_v1, %v483_v60 }
 0x14e   : > { %2500 = vst [vmem:[%s3630_s21 + $0x8d0] sm:$0xff] %v1476_v0  ;;  %v485_v0 = vld [vmem:[%s3611_s28 + $0x9e0] sm:$0xff]  ;;  %v1509_v4 = vmul.f32 %v3618_v1, %v484_v62 }
 0x14f   : > { %2501 = vst [vmem:[%s3630_s21 + $0x8d8] sm:$0xff] %v1477_v3  ;;  %v486_v3 = vld [vmem:[%s3611_s28 + $0x9e8] sm:$0xff]  ;;  %v1510_v6 = vmul.f32 %v3618_v1, %v485_v0 }
 0x150   : > { %2502 = vst [vmem:[%s3630_s21 + $0x8e0] sm:$0xff] %v1478_v5  ;;  %v487_v5 = vld [vmem:[%s3611_s28 + $0x9f0] sm:$0xff]  ;;  %v1511_v8 = vmul.f32 %v3618_v1, %v486_v3 }
 0x151   : > { %2503 = vst [vmem:[%s3630_s21 + $0x8e8] sm:$0xff] %v1479_v7  ;;  %v488_v7 = vld [vmem:[%s3611_s28 + $0x9f8] sm:$0xff]  ;;  %v1512_v10 = vmul.f32 %v3618_v1, %v487_v5 }
 0x152   : > { %2504 = vst [vmem:[%s3630_s21 + $0x8f0] sm:$0xff] %v1480_v9  ;;  %v489_v9 = vld [vmem:[%s3611_s28 + $0xa00] sm:$0xff]  ;;  %v1513_v12 = vmul.f32 %v3618_v1, %v488_v7 }
 0x153   : > { %2505 = vst [vmem:[%s3630_s21 + $0x8f8] sm:$0xff] %v1481_v11  ;;  %v490_v11 = vld [vmem:[%s3611_s28 + $0xa08] sm:$0xff]  ;;  %v1514_v14 = vmul.f32 %v3618_v1, %v489_v9 }
 0x154   : > { %2506 = vst [vmem:[%s3630_s21 + $0x900] sm:$0xff] %v1482_v13  ;;  %v491_v13 = vld [vmem:[%s3611_s28 + $0xa10] sm:$0xff]  ;;  %v1515_v16 = vmul.f32 %v3618_v1, %v490_v11 }
 0x155   : > { %2507 = vst [vmem:[%s3630_s21 + $0x908] sm:$0xff] %v1483_v15  ;;  %v492_v15 = vld [vmem:[%s3611_s28 + $0xa18] sm:$0xff]  ;;  %v1516_v18 = vmul.f32 %v3618_v1, %v491_v13 }
 0x156   : > { %2508 = vst [vmem:[%s3630_s21 + $0x910] sm:$0xff] %v1484_v17  ;;  %v493_v17 = vld [vmem:[%s3611_s28 + $0xa20] sm:$0xff]  ;;  %v1517_v20 = vmul.f32 %v3618_v1, %v492_v15 }
 0x157   : > { %2509 = vst [vmem:[%s3630_s21 + $0x918] sm:$0xff] %v1485_v19  ;;  %v494_v19 = vld [vmem:[%s3611_s28 + $0xa28] sm:$0xff]  ;;  %v1518_v22 = vmul.f32 %v3618_v1, %v493_v17 }
 0x158   : > { %2510 = vst [vmem:[%s3630_s21 + $0x920] sm:$0xff] %v1486_v21  ;;  %v495_v21 = vld [vmem:[%s3611_s28 + $0xa30] sm:$0xff]  ;;  %v1519_v24 = vmul.f32 %v3618_v1, %v494_v19 }
 0x159   : > { %2511 = vst [vmem:[%s3630_s21 + $0x928] sm:$0xff] %v1487_v23  ;;  %v496_v23 = vld [vmem:[%s3611_s28 + $0xa38] sm:$0xff]  ;;  %v1520_v26 = vmul.f32 %v3618_v1, %v495_v21 }
 0x15a   : > { %2512 = vst [vmem:[%s3630_s21 + $0x930] sm:$0xff] %v1488_v25  ;;  %v497_v25 = vld [vmem:[%s3611_s28 + $0xa40] sm:$0xff]  ;;  %v1521_v28 = vmul.f32 %v3618_v1, %v496_v23 }
 0x15b   : > { %2513 = vst [vmem:[%s3630_s21 + $0x938] sm:$0xff] %v1489_v27  ;;  %v498_v27 = vld [vmem:[%s3611_s28 + $0xa48] sm:$0xff]  ;;  %v1522_v30 = vmul.f32 %v3618_v1, %v497_v25 }
 0x15c   : > { %2514 = vst [vmem:[%s3630_s21 + $0x940] sm:$0xff] %v1490_v29  ;;  %v499_v29 = vld [vmem:[%s3611_s28 + $0xa50] sm:$0xff]  ;;  %v1523_v32 = vmul.f32 %v3618_v1, %v498_v27 }
 0x15d   : > { %2515 = vst [vmem:[%s3630_s21 + $0x948] sm:$0xff] %v1491_v31  ;;  %v500_v31 = vld [vmem:[%s3611_s28 + $0xa58] sm:$0xff]  ;;  %v1524_v34 = vmul.f32 %v3618_v1, %v499_v29 }
 0x15e   : > { %2516 = vst [vmem:[%s3630_s21 + $0x950] sm:$0xff] %v1492_v33  ;;  %v501_v33 = vld [vmem:[%s3611_s28 + $0xa60] sm:$0xff]  ;;  %v1525_v36 = vmul.f32 %v3618_v1, %v500_v31 }
 0x15f   : > { %2517 = vst [vmem:[%s3630_s21 + $0x958] sm:$0xff] %v1493_v35  ;;  %v502_v35 = vld [vmem:[%s3611_s28 + $0xa68] sm:$0xff]  ;;  %v1526_v38 = vmul.f32 %v3618_v1, %v501_v33 }
 0x160   : > { %2518 = vst [vmem:[%s3630_s21 + $0x960] sm:$0xff] %v1494_v37  ;;  %v503_v37 = vld [vmem:[%s3611_s28 + $0xa70] sm:$0xff]  ;;  %v1527_v40 = vmul.f32 %v3618_v1, %v502_v35 }
 0x161   : > { %2519 = vst [vmem:[%s3630_s21 + $0x968] sm:$0xff] %v1495_v39  ;;  %v504_v39 = vld [vmem:[%s3611_s28 + $0xa78] sm:$0xff]  ;;  %v1528_v42 = vmul.f32 %v3618_v1, %v503_v37 }
 0x162   : > { %2520 = vst [vmem:[%s3630_s21 + $0x970] sm:$0xff] %v1496_v41  ;;  %v505_v41 = vld [vmem:[%s3611_s28 + $0xa80] sm:$0xff]  ;;  %v1529_v44 = vmul.f32 %v3618_v1, %v504_v39 }
 0x163   : > { %2521 = vst [vmem:[%s3630_s21 + $0x978] sm:$0xff] %v1497_v43  ;;  %v506_v43 = vld [vmem:[%s3611_s28 + $0xa88] sm:$0xff]  ;;  %v1530_v46 = vmul.f32 %v3618_v1, %v505_v41 }
 0x164   : > { %2522 = vst [vmem:[%s3630_s21 + $0x980] sm:$0xff] %v1498_v45  ;;  %v507_v45 = vld [vmem:[%s3611_s28 + $0xa90] sm:$0xff]  ;;  %v1531_v48 = vmul.f32 %v3618_v1, %v506_v43 }
 0x165   : > { %2523 = vst [vmem:[%s3630_s21 + $0x988] sm:$0xff] %v1499_v47  ;;  %v508_v47 = vld [vmem:[%s3611_s28 + $0xa98] sm:$0xff]  ;;  %v1532_v50 = vmul.f32 %v3618_v1, %v507_v45 }
 0x166   : > { %2524 = vst [vmem:[%s3630_s21 + $0x990] sm:$0xff] %v1500_v49  ;;  %v509_v49 = vld [vmem:[%s3611_s28 + $0xaa0] sm:$0xff]  ;;  %v1533_v52 = vmul.f32 %v3618_v1, %v508_v47 }
 0x167   : > { %2525 = vst [vmem:[%s3630_s21 + $0x998] sm:$0xff] %v1501_v51  ;;  %v510_v51 = vld [vmem:[%s3611_s28 + $0xaa8] sm:$0xff]  ;;  %v1534_v54 = vmul.f32 %v3618_v1, %v509_v49 }
 0x168   : > { %2526 = vst [vmem:[%s3630_s21 + $0x9a0] sm:$0xff] %v1502_v53  ;;  %v511_v53 = vld [vmem:[%s3611_s28 + $0xab0] sm:$0xff]  ;;  %v1535_v56 = vmul.f32 %v3618_v1, %v510_v51 }
 0x169   : > { %2527 = vst [vmem:[%s3630_s21 + $0x9a8] sm:$0xff] %v1503_v55  ;;  %v512_v55 = vld [vmem:[%s3611_s28 + $0xab8] sm:$0xff]  ;;  %v1536_v58 = vmul.f32 %v3618_v1, %v511_v53 }
 0x16a   : > { %2528 = vst [vmem:[%s3630_s21 + $0x9b0] sm:$0xff] %v1504_v57  ;;  %v513_v57 = vld [vmem:[%s3611_s28 + $0xac0] sm:$0xff]  ;;  %v1537_v60 = vmul.f32 %v3618_v1, %v512_v55 }
 0x16b   : > { %2529 = vst [vmem:[%s3630_s21 + $0x9b8] sm:$0xff] %v1505_v59  ;;  %v514_v59 = vld [vmem:[%s3611_s28 + $0xac8] sm:$0xff]  ;;  %v1538_v62 = vmul.f32 %v3618_v1, %v513_v57 }
 0x16c   : > { %2530 = vst [vmem:[%s3630_s21 + $0x9c0] sm:$0xff] %v1506_v61  ;;  %v515_v61 = vld [vmem:[%s3611_s28 + $0xad0] sm:$0xff]  ;;  %v1539_v0 = vmul.f32 %v3618_v1, %v514_v59 }
 0x16d   : > { %2531 = vst [vmem:[%s3630_s21 + $0x9c8] sm:$0xff] %v1507_v63  ;;  %v516_v63 = vld [vmem:[%s3611_s28 + $0xad8] sm:$0xff]  ;;  %v1540_v3 = vmul.f32 %v3618_v1, %v515_v61 }
 0x16e   : > { %2532 = vst [vmem:[%s3630_s21 + $0x9d0] sm:$0xff] %v1508_v2  ;;  %v517_v2 = vld [vmem:[%s3611_s28 + $0xae0] sm:$0xff]  ;;  %v1541_v5 = vmul.f32 %v3618_v1, %v516_v63 }
 0x16f   : > { %2533 = vst [vmem:[%s3630_s21 + $0x9d8] sm:$0xff] %v1509_v4  ;;  %v518_v4 = vld [vmem:[%s3611_s28 + $0xae8] sm:$0xff]  ;;  %v1542_v7 = vmul.f32 %v3618_v1, %v517_v2 }
 0x170   : > { %2534 = vst [vmem:[%s3630_s21 + $0x9e0] sm:$0xff] %v1510_v6  ;;  %v519_v6 = vld [vmem:[%s3611_s28 + $0xaf0] sm:$0xff]  ;;  %v1543_v9 = vmul.f32 %v3618_v1, %v518_v4 }
 0x171   : > { %2535 = vst [vmem:[%s3630_s21 + $0x9e8] sm:$0xff] %v1511_v8  ;;  %v520_v8 = vld [vmem:[%s3611_s28 + $0xaf8] sm:$0xff]  ;;  %v1544_v11 = vmul.f32 %v3618_v1, %v519_v6 }
 0x172   : > { %2536 = vst [vmem:[%s3630_s21 + $0x9f0] sm:$0xff] %v1512_v10  ;;  %v521_v10 = vld [vmem:[%s3611_s28 + $0xb00] sm:$0xff]  ;;  %v1545_v13 = vmul.f32 %v3618_v1, %v520_v8 }
 0x173   : > { %2537 = vst [vmem:[%s3630_s21 + $0x9f8] sm:$0xff] %v1513_v12  ;;  %v522_v12 = vld [vmem:[%s3611_s28 + $0xb08] sm:$0xff]  ;;  %v1546_v15 = vmul.f32 %v3618_v1, %v521_v10 }
 0x174   : > { %2538 = vst [vmem:[%s3630_s21 + $0xa00] sm:$0xff] %v1514_v14  ;;  %v523_v14 = vld [vmem:[%s3611_s28 + $0xb10] sm:$0xff]  ;;  %v1547_v17 = vmul.f32 %v3618_v1, %v522_v12 }
 0x175   : > { %2539 = vst [vmem:[%s3630_s21 + $0xa08] sm:$0xff] %v1515_v16  ;;  %v524_v16 = vld [vmem:[%s3611_s28 + $0xb18] sm:$0xff]  ;;  %v1548_v19 = vmul.f32 %v3618_v1, %v523_v14 }
 0x176   : > { %2540 = vst [vmem:[%s3630_s21 + $0xa10] sm:$0xff] %v1516_v18  ;;  %v525_v18 = vld [vmem:[%s3611_s28 + $0xb20] sm:$0xff]  ;;  %v1549_v21 = vmul.f32 %v3618_v1, %v524_v16 }
 0x177   : > { %2541 = vst [vmem:[%s3630_s21 + $0xa18] sm:$0xff] %v1517_v20  ;;  %v526_v20 = vld [vmem:[%s3611_s28 + $0xb28] sm:$0xff]  ;;  %v1550_v23 = vmul.f32 %v3618_v1, %v525_v18 }
 0x178   : > { %2542 = vst [vmem:[%s3630_s21 + $0xa20] sm:$0xff] %v1518_v22  ;;  %v527_v22 = vld [vmem:[%s3611_s28 + $0xb30] sm:$0xff]  ;;  %v1551_v25 = vmul.f32 %v3618_v1, %v526_v20 }
 0x179   : > { %2543 = vst [vmem:[%s3630_s21 + $0xa28] sm:$0xff] %v1519_v24  ;;  %v528_v24 = vld [vmem:[%s3611_s28 + $0xb38] sm:$0xff]  ;;  %v1552_v27 = vmul.f32 %v3618_v1, %v527_v22 }
 0x17a   : > { %2544 = vst [vmem:[%s3630_s21 + $0xa30] sm:$0xff] %v1520_v26  ;;  %v529_v26 = vld [vmem:[%s3611_s28 + $0xb40] sm:$0xff]  ;;  %v1553_v29 = vmul.f32 %v3618_v1, %v528_v24 }
 0x17b   : > { %2545 = vst [vmem:[%s3630_s21 + $0xa38] sm:$0xff] %v1521_v28  ;;  %v530_v28 = vld [vmem:[%s3611_s28 + $0xb48] sm:$0xff]  ;;  %v1554_v31 = vmul.f32 %v3618_v1, %v529_v26 }
 0x17c   : > { %2546 = vst [vmem:[%s3630_s21 + $0xa40] sm:$0xff] %v1522_v30  ;;  %v531_v30 = vld [vmem:[%s3611_s28 + $0xb50] sm:$0xff]  ;;  %v1555_v33 = vmul.f32 %v3618_v1, %v530_v28 }
 0x17d   : > { %2547 = vst [vmem:[%s3630_s21 + $0xa48] sm:$0xff] %v1523_v32  ;;  %v532_v32 = vld [vmem:[%s3611_s28 + $0xb58] sm:$0xff]  ;;  %v1556_v35 = vmul.f32 %v3618_v1, %v531_v30 }
 0x17e   : > { %2548 = vst [vmem:[%s3630_s21 + $0xa50] sm:$0xff] %v1524_v34  ;;  %v533_v34 = vld [vmem:[%s3611_s28 + $0xb60] sm:$0xff]  ;;  %v1557_v37 = vmul.f32 %v3618_v1, %v532_v32 }
 0x17f   : > { %2549 = vst [vmem:[%s3630_s21 + $0xa58] sm:$0xff] %v1525_v36  ;;  %v534_v36 = vld [vmem:[%s3611_s28 + $0xb68] sm:$0xff]  ;;  %v1558_v39 = vmul.f32 %v3618_v1, %v533_v34 }
 0x180   : > { %2550 = vst [vmem:[%s3630_s21 + $0xa60] sm:$0xff] %v1526_v38  ;;  %v535_v38 = vld [vmem:[%s3611_s28 + $0xb70] sm:$0xff]  ;;  %v1559_v41 = vmul.f32 %v3618_v1, %v534_v36 }
 0x181   : > { %2551 = vst [vmem:[%s3630_s21 + $0xa68] sm:$0xff] %v1527_v40  ;;  %v536_v40 = vld [vmem:[%s3611_s28 + $0xb78] sm:$0xff]  ;;  %v1560_v43 = vmul.f32 %v3618_v1, %v535_v38 }
 0x182   : > { %2552 = vst [vmem:[%s3630_s21 + $0xa70] sm:$0xff] %v1528_v42  ;;  %v537_v42 = vld [vmem:[%s3611_s28 + $0xb80] sm:$0xff]  ;;  %v1561_v45 = vmul.f32 %v3618_v1, %v536_v40 }
 0x183   : > { %2553 = vst [vmem:[%s3630_s21 + $0xa78] sm:$0xff] %v1529_v44  ;;  %v538_v44 = vld [vmem:[%s3611_s28 + $0xb88] sm:$0xff]  ;;  %v1562_v47 = vmul.f32 %v3618_v1, %v537_v42 }
 0x184   : > { %2554 = vst [vmem:[%s3630_s21 + $0xa80] sm:$0xff] %v1530_v46  ;;  %v539_v46 = vld [vmem:[%s3611_s28 + $0xb90] sm:$0xff]  ;;  %v1563_v49 = vmul.f32 %v3618_v1, %v538_v44 }
 0x185   : > { %2555 = vst [vmem:[%s3630_s21 + $0xa88] sm:$0xff] %v1531_v48  ;;  %v540_v48 = vld [vmem:[%s3611_s28 + $0xb98] sm:$0xff]  ;;  %v1564_v51 = vmul.f32 %v3618_v1, %v539_v46 }
 0x186   : > { %2556 = vst [vmem:[%s3630_s21 + $0xa90] sm:$0xff] %v1532_v50  ;;  %v541_v50 = vld [vmem:[%s3611_s28 + $0xba0] sm:$0xff]  ;;  %v1565_v53 = vmul.f32 %v3618_v1, %v540_v48 }
 0x187   : > { %2557 = vst [vmem:[%s3630_s21 + $0xa98] sm:$0xff] %v1533_v52  ;;  %v542_v52 = vld [vmem:[%s3611_s28 + $0xba8] sm:$0xff]  ;;  %v1566_v55 = vmul.f32 %v3618_v1, %v541_v50 }
 0x188   : > { %2558 = vst [vmem:[%s3630_s21 + $0xaa0] sm:$0xff] %v1534_v54  ;;  %v543_v54 = vld [vmem:[%s3611_s28 + $0xbb0] sm:$0xff]  ;;  %v1567_v57 = vmul.f32 %v3618_v1, %v542_v52 }
 0x189   : > { %2559 = vst [vmem:[%s3630_s21 + $0xaa8] sm:$0xff] %v1535_v56  ;;  %v544_v56 = vld [vmem:[%s3611_s28 + $0xbb8] sm:$0xff]  ;;  %v1568_v59 = vmul.f32 %v3618_v1, %v543_v54 }
 0x18a   : > { %2560 = vst [vmem:[%s3630_s21 + $0xab0] sm:$0xff] %v1536_v58  ;;  %v545_v58 = vld [vmem:[%s3611_s28 + $0xbc0] sm:$0xff]  ;;  %v1569_v61 = vmul.f32 %v3618_v1, %v544_v56 }
 0x18b   : > { %2561 = vst [vmem:[%s3630_s21 + $0xab8] sm:$0xff] %v1537_v60  ;;  %v546_v60 = vld [vmem:[%s3611_s28 + $0xbc8] sm:$0xff]  ;;  %v1570_v63 = vmul.f32 %v3618_v1, %v545_v58 }
 0x18c   : > { %2562 = vst [vmem:[%s3630_s21 + $0xac0] sm:$0xff] %v1538_v62  ;;  %v547_v62 = vld [vmem:[%s3611_s28 + $0xbd0] sm:$0xff]  ;;  %v1571_v2 = vmul.f32 %v3618_v1, %v546_v60 }
 0x18d   : > { %2563 = vst [vmem:[%s3630_s21 + $0xac8] sm:$0xff] %v1539_v0  ;;  %v548_v0 = vld [vmem:[%s3611_s28 + $0xbd8] sm:$0xff]  ;;  %v1572_v4 = vmul.f32 %v3618_v1, %v547_v62 }
 0x18e   : > { %2564 = vst [vmem:[%s3630_s21 + $0xad0] sm:$0xff] %v1540_v3  ;;  %v549_v3 = vld [vmem:[%s3611_s28 + $0xbe0] sm:$0xff]  ;;  %v1573_v6 = vmul.f32 %v3618_v1, %v548_v0 }
 0x18f   : > { %2565 = vst [vmem:[%s3630_s21 + $0xad8] sm:$0xff] %v1541_v5  ;;  %v550_v5 = vld [vmem:[%s3611_s28 + $0xbe8] sm:$0xff]  ;;  %v1574_v8 = vmul.f32 %v3618_v1, %v549_v3 }
 0x190   : > { %2566 = vst [vmem:[%s3630_s21 + $0xae0] sm:$0xff] %v1542_v7  ;;  %v551_v7 = vld [vmem:[%s3611_s28 + $0xbf0] sm:$0xff]  ;;  %v1575_v10 = vmul.f32 %v3618_v1, %v550_v5 }
 0x191   : > { %2567 = vst [vmem:[%s3630_s21 + $0xae8] sm:$0xff] %v1543_v9  ;;  %v552_v9 = vld [vmem:[%s3611_s28 + $0xbf8] sm:$0xff]  ;;  %v1576_v12 = vmul.f32 %v3618_v1, %v551_v7 }
 0x192   : > { %2568 = vst [vmem:[%s3630_s21 + $0xaf0] sm:$0xff] %v1544_v11  ;;  %v553_v11 = vld [vmem:[%s3611_s28 + $0xc00] sm:$0xff]  ;;  %v1577_v14 = vmul.f32 %v3618_v1, %v552_v9 }
 0x193   : > { %2569 = vst [vmem:[%s3630_s21 + $0xaf8] sm:$0xff] %v1545_v13  ;;  %v554_v13 = vld [vmem:[%s3611_s28 + $0xc08] sm:$0xff]  ;;  %v1578_v16 = vmul.f32 %v3618_v1, %v553_v11 }
 0x194   : > { %2570 = vst [vmem:[%s3630_s21 + $0xb00] sm:$0xff] %v1546_v15  ;;  %v555_v15 = vld [vmem:[%s3611_s28 + $0xc10] sm:$0xff]  ;;  %v1579_v18 = vmul.f32 %v3618_v1, %v554_v13 }
 0x195   : > { %2571 = vst [vmem:[%s3630_s21 + $0xb08] sm:$0xff] %v1547_v17  ;;  %v556_v17 = vld [vmem:[%s3611_s28 + $0xc18] sm:$0xff]  ;;  %v1580_v20 = vmul.f32 %v3618_v1, %v555_v15 }
 0x196   : > { %2572 = vst [vmem:[%s3630_s21 + $0xb10] sm:$0xff] %v1548_v19  ;;  %v557_v19 = vld [vmem:[%s3611_s28 + $0xc20] sm:$0xff]  ;;  %v1581_v22 = vmul.f32 %v3618_v1, %v556_v17 }
 0x197   : > { %2573 = vst [vmem:[%s3630_s21 + $0xb18] sm:$0xff] %v1549_v21  ;;  %v558_v21 = vld [vmem:[%s3611_s28 + $0xc28] sm:$0xff]  ;;  %v1582_v24 = vmul.f32 %v3618_v1, %v557_v19 }
 0x198   : > { %2574 = vst [vmem:[%s3630_s21 + $0xb20] sm:$0xff] %v1550_v23  ;;  %v559_v23 = vld [vmem:[%s3611_s28 + $0xc30] sm:$0xff]  ;;  %v1583_v26 = vmul.f32 %v3618_v1, %v558_v21 }
 0x199   : > { %2575 = vst [vmem:[%s3630_s21 + $0xb28] sm:$0xff] %v1551_v25  ;;  %v560_v25 = vld [vmem:[%s3611_s28 + $0xc38] sm:$0xff]  ;;  %v1584_v28 = vmul.f32 %v3618_v1, %v559_v23 }
 0x19a   : > { %2576 = vst [vmem:[%s3630_s21 + $0xb30] sm:$0xff] %v1552_v27  ;;  %v561_v27 = vld [vmem:[%s3611_s28 + $0xc40] sm:$0xff]  ;;  %v1585_v30 = vmul.f32 %v3618_v1, %v560_v25 }
 0x19b   : > { %2577 = vst [vmem:[%s3630_s21 + $0xb38] sm:$0xff] %v1553_v29  ;;  %v562_v29 = vld [vmem:[%s3611_s28 + $0xc48] sm:$0xff]  ;;  %v1586_v32 = vmul.f32 %v3618_v1, %v561_v27 }
 0x19c   : > { %2578 = vst [vmem:[%s3630_s21 + $0xb40] sm:$0xff] %v1554_v31  ;;  %v563_v31 = vld [vmem:[%s3611_s28 + $0xc50] sm:$0xff]  ;;  %v1587_v34 = vmul.f32 %v3618_v1, %v562_v29 }
 0x19d   : > { %2579 = vst [vmem:[%s3630_s21 + $0xb48] sm:$0xff] %v1555_v33  ;;  %v564_v33 = vld [vmem:[%s3611_s28 + $0xc58] sm:$0xff]  ;;  %v1588_v36 = vmul.f32 %v3618_v1, %v563_v31 }
 0x19e   : > { %2580 = vst [vmem:[%s3630_s21 + $0xb50] sm:$0xff] %v1556_v35  ;;  %v565_v35 = vld [vmem:[%s3611_s28 + $0xc60] sm:$0xff]  ;;  %v1589_v38 = vmul.f32 %v3618_v1, %v564_v33 }
 0x19f   : > { %2581 = vst [vmem:[%s3630_s21 + $0xb58] sm:$0xff] %v1557_v37  ;;  %v566_v37 = vld [vmem:[%s3611_s28 + $0xc68] sm:$0xff]  ;;  %v1590_v40 = vmul.f32 %v3618_v1, %v565_v35 }
 0x1a0   : > { %2582 = vst [vmem:[%s3630_s21 + $0xb60] sm:$0xff] %v1558_v39  ;;  %v567_v39 = vld [vmem:[%s3611_s28 + $0xc70] sm:$0xff]  ;;  %v1591_v42 = vmul.f32 %v3618_v1, %v566_v37 }
 0x1a1   : > { %2583 = vst [vmem:[%s3630_s21 + $0xb68] sm:$0xff] %v1559_v41  ;;  %v568_v41 = vld [vmem:[%s3611_s28 + $0xc78] sm:$0xff]  ;;  %v1592_v44 = vmul.f32 %v3618_v1, %v567_v39 }
 0x1a2   : > { %2584 = vst [vmem:[%s3630_s21 + $0xb70] sm:$0xff] %v1560_v43  ;;  %v569_v43 = vld [vmem:[%s3611_s28 + $0xc80] sm:$0xff]  ;;  %v1593_v46 = vmul.f32 %v3618_v1, %v568_v41 }
 0x1a3   : > { %2585 = vst [vmem:[%s3630_s21 + $0xb78] sm:$0xff] %v1561_v45  ;;  %v570_v45 = vld [vmem:[%s3611_s28 + $0xc88] sm:$0xff]  ;;  %v1594_v48 = vmul.f32 %v3618_v1, %v569_v43 }
 0x1a4   : > { %2586 = vst [vmem:[%s3630_s21 + $0xb80] sm:$0xff] %v1562_v47  ;;  %v571_v47 = vld [vmem:[%s3611_s28 + $0xc90] sm:$0xff]  ;;  %v1595_v50 = vmul.f32 %v3618_v1, %v570_v45 }
 0x1a5   : > { %2587 = vst [vmem:[%s3630_s21 + $0xb88] sm:$0xff] %v1563_v49  ;;  %v572_v49 = vld [vmem:[%s3611_s28 + $0xc98] sm:$0xff]  ;;  %v1596_v52 = vmul.f32 %v3618_v1, %v571_v47 }
 0x1a6   : > { %2588 = vst [vmem:[%s3630_s21 + $0xb90] sm:$0xff] %v1564_v51  ;;  %v573_v51 = vld [vmem:[%s3611_s28 + $0xca0] sm:$0xff]  ;;  %v1597_v54 = vmul.f32 %v3618_v1, %v572_v49 }
 0x1a7   : > { %2589 = vst [vmem:[%s3630_s21 + $0xb98] sm:$0xff] %v1565_v53  ;;  %v574_v53 = vld [vmem:[%s3611_s28 + $0xca8] sm:$0xff]  ;;  %v1598_v56 = vmul.f32 %v3618_v1, %v573_v51 }
 0x1a8   : > { %2590 = vst [vmem:[%s3630_s21 + $0xba0] sm:$0xff] %v1566_v55  ;;  %v575_v55 = vld [vmem:[%s3611_s28 + $0xcb0] sm:$0xff]  ;;  %v1599_v58 = vmul.f32 %v3618_v1, %v574_v53 }
 0x1a9   : > { %2591 = vst [vmem:[%s3630_s21 + $0xba8] sm:$0xff] %v1567_v57  ;;  %v576_v57 = vld [vmem:[%s3611_s28 + $0xcb8] sm:$0xff]  ;;  %v1600_v60 = vmul.f32 %v3618_v1, %v575_v55 }
 0x1aa   : > { %2592 = vst [vmem:[%s3630_s21 + $0xbb0] sm:$0xff] %v1568_v59  ;;  %v577_v59 = vld [vmem:[%s3611_s28 + $0xcc0] sm:$0xff]  ;;  %v1601_v62 = vmul.f32 %v3618_v1, %v576_v57 }
 0x1ab   : > { %2593 = vst [vmem:[%s3630_s21 + $0xbb8] sm:$0xff] %v1569_v61  ;;  %v578_v61 = vld [vmem:[%s3611_s28 + $0xcc8] sm:$0xff]  ;;  %v1602_v0 = vmul.f32 %v3618_v1, %v577_v59 }
 0x1ac   : > { %2594 = vst [vmem:[%s3630_s21 + $0xbc0] sm:$0xff] %v1570_v63  ;;  %v579_v63 = vld [vmem:[%s3611_s28 + $0xcd0] sm:$0xff]  ;;  %v1603_v3 = vmul.f32 %v3618_v1, %v578_v61 }
 0x1ad   : > { %2595 = vst [vmem:[%s3630_s21 + $0xbc8] sm:$0xff] %v1571_v2  ;;  %v580_v2 = vld [vmem:[%s3611_s28 + $0xcd8] sm:$0xff]  ;;  %v1604_v5 = vmul.f32 %v3618_v1, %v579_v63 }
 0x1ae   : > { %2596 = vst [vmem:[%s3630_s21 + $0xbd0] sm:$0xff] %v1572_v4  ;;  %v581_v4 = vld [vmem:[%s3611_s28 + $0xce0] sm:$0xff]  ;;  %v1605_v7 = vmul.f32 %v3618_v1, %v580_v2 }
 0x1af   : > { %2597 = vst [vmem:[%s3630_s21 + $0xbd8] sm:$0xff] %v1573_v6  ;;  %v582_v6 = vld [vmem:[%s3611_s28 + $0xce8] sm:$0xff]  ;;  %v1606_v9 = vmul.f32 %v3618_v1, %v581_v4 }
 0x1b0   : > { %2598 = vst [vmem:[%s3630_s21 + $0xbe0] sm:$0xff] %v1574_v8  ;;  %v583_v8 = vld [vmem:[%s3611_s28 + $0xcf0] sm:$0xff]  ;;  %v1607_v11 = vmul.f32 %v3618_v1, %v582_v6 }
 0x1b1   : > { %2599 = vst [vmem:[%s3630_s21 + $0xbe8] sm:$0xff] %v1575_v10  ;;  %v584_v10 = vld [vmem:[%s3611_s28 + $0xcf8] sm:$0xff]  ;;  %v1608_v13 = vmul.f32 %v3618_v1, %v583_v8 }
 0x1b2   : > { %2600 = vst [vmem:[%s3630_s21 + $0xbf0] sm:$0xff] %v1576_v12  ;;  %v585_v12 = vld [vmem:[%s3611_s28 + $0xd00] sm:$0xff]  ;;  %v1609_v15 = vmul.f32 %v3618_v1, %v584_v10 }
 0x1b3   : > { %2601 = vst [vmem:[%s3630_s21 + $0xbf8] sm:$0xff] %v1577_v14  ;;  %v586_v14 = vld [vmem:[%s3611_s28 + $0xd08] sm:$0xff]  ;;  %v1610_v17 = vmul.f32 %v3618_v1, %v585_v12 }
 0x1b4   : > { %2602 = vst [vmem:[%s3630_s21 + $0xc00] sm:$0xff] %v1578_v16  ;;  %v587_v16 = vld [vmem:[%s3611_s28 + $0xd10] sm:$0xff]  ;;  %v1611_v19 = vmul.f32 %v3618_v1, %v586_v14 }
 0x1b5   : > { %2603 = vst [vmem:[%s3630_s21 + $0xc08] sm:$0xff] %v1579_v18  ;;  %v588_v18 = vld [vmem:[%s3611_s28 + $0xd18] sm:$0xff]  ;;  %v1612_v21 = vmul.f32 %v3618_v1, %v587_v16 }
 0x1b6   : > { %2604 = vst [vmem:[%s3630_s21 + $0xc10] sm:$0xff] %v1580_v20  ;;  %v589_v20 = vld [vmem:[%s3611_s28 + $0xd20] sm:$0xff]  ;;  %v1613_v23 = vmul.f32 %v3618_v1, %v588_v18 }
 0x1b7   : > { %2605 = vst [vmem:[%s3630_s21 + $0xc18] sm:$0xff] %v1581_v22  ;;  %v590_v22 = vld [vmem:[%s3611_s28 + $0xd28] sm:$0xff]  ;;  %v1614_v25 = vmul.f32 %v3618_v1, %v589_v20 }
 0x1b8   : > { %2606 = vst [vmem:[%s3630_s21 + $0xc20] sm:$0xff] %v1582_v24  ;;  %v591_v24 = vld [vmem:[%s3611_s28 + $0xd30] sm:$0xff]  ;;  %v1615_v27 = vmul.f32 %v3618_v1, %v590_v22 }
 0x1b9   : > { %2607 = vst [vmem:[%s3630_s21 + $0xc28] sm:$0xff] %v1583_v26  ;;  %v592_v26 = vld [vmem:[%s3611_s28 + $0xd38] sm:$0xff]  ;;  %v1616_v29 = vmul.f32 %v3618_v1, %v591_v24 }
 0x1ba   : > { %2608 = vst [vmem:[%s3630_s21 + $0xc30] sm:$0xff] %v1584_v28  ;;  %v593_v28 = vld [vmem:[%s3611_s28 + $0xd40] sm:$0xff]  ;;  %v1617_v31 = vmul.f32 %v3618_v1, %v592_v26 }
 0x1bb   : > { %2609 = vst [vmem:[%s3630_s21 + $0xc38] sm:$0xff] %v1585_v30  ;;  %v594_v30 = vld [vmem:[%s3611_s28 + $0xd48] sm:$0xff]  ;;  %v1618_v33 = vmul.f32 %v3618_v1, %v593_v28 }
 0x1bc   : > { %2610 = vst [vmem:[%s3630_s21 + $0xc40] sm:$0xff] %v1586_v32  ;;  %v595_v32 = vld [vmem:[%s3611_s28 + $0xd50] sm:$0xff]  ;;  %v1619_v35 = vmul.f32 %v3618_v1, %v594_v30 }
 0x1bd   : > { %2611 = vst [vmem:[%s3630_s21 + $0xc48] sm:$0xff] %v1587_v34  ;;  %v596_v34 = vld [vmem:[%s3611_s28 + $0xd58] sm:$0xff]  ;;  %v1620_v37 = vmul.f32 %v3618_v1, %v595_v32 }
 0x1be   : > { %2612 = vst [vmem:[%s3630_s21 + $0xc50] sm:$0xff] %v1588_v36  ;;  %v597_v36 = vld [vmem:[%s3611_s28 + $0xd60] sm:$0xff]  ;;  %v1621_v39 = vmul.f32 %v3618_v1, %v596_v34 }
 0x1bf   : > { %2613 = vst [vmem:[%s3630_s21 + $0xc58] sm:$0xff] %v1589_v38  ;;  %v598_v38 = vld [vmem:[%s3611_s28 + $0xd68] sm:$0xff]  ;;  %v1622_v41 = vmul.f32 %v3618_v1, %v597_v36 }
 0x1c0   : > { %2614 = vst [vmem:[%s3630_s21 + $0xc60] sm:$0xff] %v1590_v40  ;;  %v599_v40 = vld [vmem:[%s3611_s28 + $0xd70] sm:$0xff]  ;;  %v1623_v43 = vmul.f32 %v3618_v1, %v598_v38 }
 0x1c1   : > { %2615 = vst [vmem:[%s3630_s21 + $0xc68] sm:$0xff] %v1591_v42  ;;  %v600_v42 = vld [vmem:[%s3611_s28 + $0xd78] sm:$0xff]  ;;  %v1624_v45 = vmul.f32 %v3618_v1, %v599_v40 }
 0x1c2   : > { %2616 = vst [vmem:[%s3630_s21 + $0xc70] sm:$0xff] %v1592_v44  ;;  %v601_v44 = vld [vmem:[%s3611_s28 + $0xd80] sm:$0xff]  ;;  %v1625_v47 = vmul.f32 %v3618_v1, %v600_v42 }
 0x1c3   : > { %2617 = vst [vmem:[%s3630_s21 + $0xc78] sm:$0xff] %v1593_v46  ;;  %v602_v46 = vld [vmem:[%s3611_s28 + $0xd88] sm:$0xff]  ;;  %v1626_v49 = vmul.f32 %v3618_v1, %v601_v44 }
 0x1c4   : > { %2618 = vst [vmem:[%s3630_s21 + $0xc80] sm:$0xff] %v1594_v48  ;;  %v603_v48 = vld [vmem:[%s3611_s28 + $0xd90] sm:$0xff]  ;;  %v1627_v51 = vmul.f32 %v3618_v1, %v602_v46 }
 0x1c5   : > { %2619 = vst [vmem:[%s3630_s21 + $0xc88] sm:$0xff] %v1595_v50  ;;  %v604_v50 = vld [vmem:[%s3611_s28 + $0xd98] sm:$0xff]  ;;  %v1628_v53 = vmul.f32 %v3618_v1, %v603_v48 }
 0x1c6   : > { %2620 = vst [vmem:[%s3630_s21 + $0xc90] sm:$0xff] %v1596_v52  ;;  %v605_v52 = vld [vmem:[%s3611_s28 + $0xda0] sm:$0xff]  ;;  %v1629_v55 = vmul.f32 %v3618_v1, %v604_v50 }
 0x1c7   : > { %2621 = vst [vmem:[%s3630_s21 + $0xc98] sm:$0xff] %v1597_v54  ;;  %v606_v54 = vld [vmem:[%s3611_s28 + $0xda8] sm:$0xff]  ;;  %v1630_v57 = vmul.f32 %v3618_v1, %v605_v52 }
 0x1c8   : > { %2622 = vst [vmem:[%s3630_s21 + $0xca0] sm:$0xff] %v1598_v56  ;;  %v607_v56 = vld [vmem:[%s3611_s28 + $0xdb0] sm:$0xff]  ;;  %v1631_v59 = vmul.f32 %v3618_v1, %v606_v54 }
 0x1c9   : > { %2623 = vst [vmem:[%s3630_s21 + $0xca8] sm:$0xff] %v1599_v58  ;;  %v608_v58 = vld [vmem:[%s3611_s28 + $0xdb8] sm:$0xff]  ;;  %v1632_v61 = vmul.f32 %v3618_v1, %v607_v56 }
 0x1ca   : > { %2624 = vst [vmem:[%s3630_s21 + $0xcb0] sm:$0xff] %v1600_v60  ;;  %v609_v60 = vld [vmem:[%s3611_s28 + $0xdc0] sm:$0xff]  ;;  %v1633_v63 = vmul.f32 %v3618_v1, %v608_v58 }
 0x1cb   : > { %2625 = vst [vmem:[%s3630_s21 + $0xcb8] sm:$0xff] %v1601_v62  ;;  %v610_v62 = vld [vmem:[%s3611_s28 + $0xdc8] sm:$0xff]  ;;  %v1634_v2 = vmul.f32 %v3618_v1, %v609_v60 }
 0x1cc   : > { %2626 = vst [vmem:[%s3630_s21 + $0xcc0] sm:$0xff] %v1602_v0  ;;  %v611_v0 = vld [vmem:[%s3611_s28 + $0xdd0] sm:$0xff]  ;;  %v1635_v4 = vmul.f32 %v3618_v1, %v610_v62 }
 0x1cd   : > { %2627 = vst [vmem:[%s3630_s21 + $0xcc8] sm:$0xff] %v1603_v3  ;;  %v612_v3 = vld [vmem:[%s3611_s28 + $0xdd8] sm:$0xff]  ;;  %v1636_v6 = vmul.f32 %v3618_v1, %v611_v0 }
 0x1ce   : > { %2628 = vst [vmem:[%s3630_s21 + $0xcd0] sm:$0xff] %v1604_v5  ;;  %v613_v5 = vld [vmem:[%s3611_s28 + $0xde0] sm:$0xff]  ;;  %v1637_v8 = vmul.f32 %v3618_v1, %v612_v3 }
 0x1cf   : > { %2629 = vst [vmem:[%s3630_s21 + $0xcd8] sm:$0xff] %v1605_v7  ;;  %v614_v7 = vld [vmem:[%s3611_s28 + $0xde8] sm:$0xff]  ;;  %v1638_v10 = vmul.f32 %v3618_v1, %v613_v5 }
 0x1d0   : > { %2630 = vst [vmem:[%s3630_s21 + $0xce0] sm:$0xff] %v1606_v9  ;;  %v615_v9 = vld [vmem:[%s3611_s28 + $0xdf0] sm:$0xff]  ;;  %v1639_v12 = vmul.f32 %v3618_v1, %v614_v7 }
 0x1d1   : > { %2631 = vst [vmem:[%s3630_s21 + $0xce8] sm:$0xff] %v1607_v11  ;;  %v616_v11 = vld [vmem:[%s3611_s28 + $0xdf8] sm:$0xff]  ;;  %v1640_v14 = vmul.f32 %v3618_v1, %v615_v9 }
 0x1d2   : > { %2632 = vst [vmem:[%s3630_s21 + $0xcf0] sm:$0xff] %v1608_v13  ;;  %v617_v13 = vld [vmem:[%s3611_s28 + $0xe00] sm:$0xff]  ;;  %v1641_v16 = vmul.f32 %v3618_v1, %v616_v11 }
 0x1d3   : > { %2633 = vst [vmem:[%s3630_s21 + $0xcf8] sm:$0xff] %v1609_v15  ;;  %v618_v15 = vld [vmem:[%s3611_s28 + $0xe08] sm:$0xff]  ;;  %v1642_v18 = vmul.f32 %v3618_v1, %v617_v13 }
 0x1d4   : > { %2634 = vst [vmem:[%s3630_s21 + $0xd00] sm:$0xff] %v1610_v17  ;;  %v619_v17 = vld [vmem:[%s3611_s28 + $0xe10] sm:$0xff]  ;;  %v1643_v20 = vmul.f32 %v3618_v1, %v618_v15 }
 0x1d5   : > { %2635 = vst [vmem:[%s3630_s21 + $0xd08] sm:$0xff] %v1611_v19  ;;  %v620_v19 = vld [vmem:[%s3611_s28 + $0xe18] sm:$0xff]  ;;  %v1644_v22 = vmul.f32 %v3618_v1, %v619_v17 }
 0x1d6   : > { %2636 = vst [vmem:[%s3630_s21 + $0xd10] sm:$0xff] %v1612_v21  ;;  %v621_v21 = vld [vmem:[%s3611_s28 + $0xe20] sm:$0xff]  ;;  %v1645_v24 = vmul.f32 %v3618_v1, %v620_v19 }
 0x1d7   : > { %2637 = vst [vmem:[%s3630_s21 + $0xd18] sm:$0xff] %v1613_v23  ;;  %v622_v23 = vld [vmem:[%s3611_s28 + $0xe28] sm:$0xff]  ;;  %v1646_v26 = vmul.f32 %v3618_v1, %v621_v21 }
 0x1d8   : > { %2638 = vst [vmem:[%s3630_s21 + $0xd20] sm:$0xff] %v1614_v25  ;;  %v623_v25 = vld [vmem:[%s3611_s28 + $0xe30] sm:$0xff]  ;;  %v1647_v28 = vmul.f32 %v3618_v1, %v622_v23 }
 0x1d9   : > { %2639 = vst [vmem:[%s3630_s21 + $0xd28] sm:$0xff] %v1615_v27  ;;  %v624_v27 = vld [vmem:[%s3611_s28 + $0xe38] sm:$0xff]  ;;  %v1648_v30 = vmul.f32 %v3618_v1, %v623_v25 }
 0x1da   : > { %2640 = vst [vmem:[%s3630_s21 + $0xd30] sm:$0xff] %v1616_v29  ;;  %v625_v29 = vld [vmem:[%s3611_s28 + $0xe40] sm:$0xff]  ;;  %v1649_v32 = vmul.f32 %v3618_v1, %v624_v27 }
 0x1db   : > { %2641 = vst [vmem:[%s3630_s21 + $0xd38] sm:$0xff] %v1617_v31  ;;  %v626_v31 = vld [vmem:[%s3611_s28 + $0xe48] sm:$0xff]  ;;  %v1650_v34 = vmul.f32 %v3618_v1, %v625_v29 }
 0x1dc   : > { %2642 = vst [vmem:[%s3630_s21 + $0xd40] sm:$0xff] %v1618_v33  ;;  %v627_v33 = vld [vmem:[%s3611_s28 + $0xe50] sm:$0xff]  ;;  %v1651_v36 = vmul.f32 %v3618_v1, %v626_v31 }
 0x1dd   : > { %2643 = vst [vmem:[%s3630_s21 + $0xd48] sm:$0xff] %v1619_v35  ;;  %v628_v35 = vld [vmem:[%s3611_s28 + $0xe58] sm:$0xff]  ;;  %v1652_v38 = vmul.f32 %v3618_v1, %v627_v33 }
 0x1de   : > { %2644 = vst [vmem:[%s3630_s21 + $0xd50] sm:$0xff] %v1620_v37  ;;  %v629_v37 = vld [vmem:[%s3611_s28 + $0xe60] sm:$0xff]  ;;  %v1653_v40 = vmul.f32 %v3618_v1, %v628_v35 }
 0x1df   : > { %2645 = vst [vmem:[%s3630_s21 + $0xd58] sm:$0xff] %v1621_v39  ;;  %v630_v39 = vld [vmem:[%s3611_s28 + $0xe68] sm:$0xff]  ;;  %v1654_v42 = vmul.f32 %v3618_v1, %v629_v37 }
 0x1e0   : > { %2646 = vst [vmem:[%s3630_s21 + $0xd60] sm:$0xff] %v1622_v41  ;;  %v631_v41 = vld [vmem:[%s3611_s28 + $0xe70] sm:$0xff]  ;;  %v1655_v44 = vmul.f32 %v3618_v1, %v630_v39 }
 0x1e1   : > { %2647 = vst [vmem:[%s3630_s21 + $0xd68] sm:$0xff] %v1623_v43  ;;  %v632_v43 = vld [vmem:[%s3611_s28 + $0xe78] sm:$0xff]  ;;  %v1656_v46 = vmul.f32 %v3618_v1, %v631_v41 }
 0x1e2   : > { %2648 = vst [vmem:[%s3630_s21 + $0xd70] sm:$0xff] %v1624_v45  ;;  %v633_v45 = vld [vmem:[%s3611_s28 + $0xe80] sm:$0xff]  ;;  %v1657_v48 = vmul.f32 %v3618_v1, %v632_v43 }
 0x1e3   : > { %2649 = vst [vmem:[%s3630_s21 + $0xd78] sm:$0xff] %v1625_v47  ;;  %v634_v47 = vld [vmem:[%s3611_s28 + $0xe88] sm:$0xff]  ;;  %v1658_v50 = vmul.f32 %v3618_v1, %v633_v45 }
 0x1e4   : > { %2650 = vst [vmem:[%s3630_s21 + $0xd80] sm:$0xff] %v1626_v49  ;;  %v635_v49 = vld [vmem:[%s3611_s28 + $0xe90] sm:$0xff]  ;;  %v1659_v52 = vmul.f32 %v3618_v1, %v634_v47 }
 0x1e5   : > { %2651 = vst [vmem:[%s3630_s21 + $0xd88] sm:$0xff] %v1627_v51  ;;  %v636_v51 = vld [vmem:[%s3611_s28 + $0xe98] sm:$0xff]  ;;  %v1660_v54 = vmul.f32 %v3618_v1, %v635_v49 }
 0x1e6   : > { %2652 = vst [vmem:[%s3630_s21 + $0xd90] sm:$0xff] %v1628_v53  ;;  %v637_v53 = vld [vmem:[%s3611_s28 + $0xea0] sm:$0xff]  ;;  %v1661_v56 = vmul.f32 %v3618_v1, %v636_v51 }
 0x1e7   : > { %2653 = vst [vmem:[%s3630_s21 + $0xd98] sm:$0xff] %v1629_v55  ;;  %v638_v55 = vld [vmem:[%s3611_s28 + $0xea8] sm:$0xff]  ;;  %v1662_v58 = vmul.f32 %v3618_v1, %v637_v53 }
 0x1e8   : > { %2654 = vst [vmem:[%s3630_s21 + $0xda0] sm:$0xff] %v1630_v57  ;;  %v639_v57 = vld [vmem:[%s3611_s28 + $0xeb0] sm:$0xff]  ;;  %v1663_v60 = vmul.f32 %v3618_v1, %v638_v55 }
 0x1e9   : > { %2655 = vst [vmem:[%s3630_s21 + $0xda8] sm:$0xff] %v1631_v59  ;;  %v640_v59 = vld [vmem:[%s3611_s28 + $0xeb8] sm:$0xff]  ;;  %v1664_v62 = vmul.f32 %v3618_v1, %v639_v57 }
 0x1ea   : > { %2656 = vst [vmem:[%s3630_s21 + $0xdb0] sm:$0xff] %v1632_v61  ;;  %v641_v61 = vld [vmem:[%s3611_s28 + $0xec0] sm:$0xff]  ;;  %v1665_v0 = vmul.f32 %v3618_v1, %v640_v59 }
 0x1eb   : > { %2657 = vst [vmem:[%s3630_s21 + $0xdb8] sm:$0xff] %v1633_v63  ;;  %v642_v63 = vld [vmem:[%s3611_s28 + $0xec8] sm:$0xff]  ;;  %v1666_v3 = vmul.f32 %v3618_v1, %v641_v61 }
 0x1ec   : > { %2658 = vst [vmem:[%s3630_s21 + $0xdc0] sm:$0xff] %v1634_v2  ;;  %v643_v2 = vld [vmem:[%s3611_s28 + $0xed0] sm:$0xff]  ;;  %v1667_v5 = vmul.f32 %v3618_v1, %v642_v63 }
 0x1ed   : > { %2659 = vst [vmem:[%s3630_s21 + $0xdc8] sm:$0xff] %v1635_v4  ;;  %v644_v4 = vld [vmem:[%s3611_s28 + $0xed8] sm:$0xff]  ;;  %v1668_v7 = vmul.f32 %v3618_v1, %v643_v2 }
 0x1ee   : > { %2660 = vst [vmem:[%s3630_s21 + $0xdd0] sm:$0xff] %v1636_v6  ;;  %v645_v6 = vld [vmem:[%s3611_s28 + $0xee0] sm:$0xff]  ;;  %v1669_v9 = vmul.f32 %v3618_v1, %v644_v4 }
 0x1ef   : > { %2661 = vst [vmem:[%s3630_s21 + $0xdd8] sm:$0xff] %v1637_v8  ;;  %v646_v8 = vld [vmem:[%s3611_s28 + $0xee8] sm:$0xff]  ;;  %v1670_v11 = vmul.f32 %v3618_v1, %v645_v6 }
 0x1f0   : > { %2662 = vst [vmem:[%s3630_s21 + $0xde0] sm:$0xff] %v1638_v10  ;;  %v647_v10 = vld [vmem:[%s3611_s28 + $0xef0] sm:$0xff]  ;;  %v1671_v13 = vmul.f32 %v3618_v1, %v646_v8 }
 0x1f1   : > { %2663 = vst [vmem:[%s3630_s21 + $0xde8] sm:$0xff] %v1639_v12  ;;  %v648_v12 = vld [vmem:[%s3611_s28 + $0xef8] sm:$0xff]  ;;  %v1672_v15 = vmul.f32 %v3618_v1, %v647_v10 }
 0x1f2   : > { %2664 = vst [vmem:[%s3630_s21 + $0xdf0] sm:$0xff] %v1640_v14  ;;  %v649_v14 = vld [vmem:[%s3611_s28 + $0xf00] sm:$0xff]  ;;  %v1673_v17 = vmul.f32 %v3618_v1, %v648_v12 }
 0x1f3   : > { %2665 = vst [vmem:[%s3630_s21 + $0xdf8] sm:$0xff] %v1641_v16  ;;  %v650_v16 = vld [vmem:[%s3611_s28 + $0xf08] sm:$0xff]  ;;  %v1674_v19 = vmul.f32 %v3618_v1, %v649_v14 }
 0x1f4   : > { %2666 = vst [vmem:[%s3630_s21 + $0xe00] sm:$0xff] %v1642_v18  ;;  %v651_v18 = vld [vmem:[%s3611_s28 + $0xf10] sm:$0xff]  ;;  %v1675_v21 = vmul.f32 %v3618_v1, %v650_v16 }
 0x1f5   : > { %2667 = vst [vmem:[%s3630_s21 + $0xe08] sm:$0xff] %v1643_v20  ;;  %v652_v20 = vld [vmem:[%s3611_s28 + $0xf18] sm:$0xff]  ;;  %v1676_v23 = vmul.f32 %v3618_v1, %v651_v18 }
 0x1f6   : > { %2668 = vst [vmem:[%s3630_s21 + $0xe10] sm:$0xff] %v1644_v22  ;;  %v653_v22 = vld [vmem:[%s3611_s28 + $0xf20] sm:$0xff]  ;;  %v1677_v25 = vmul.f32 %v3618_v1, %v652_v20 }
 0x1f7   : > { %2669 = vst [vmem:[%s3630_s21 + $0xe18] sm:$0xff] %v1645_v24  ;;  %v654_v24 = vld [vmem:[%s3611_s28 + $0xf28] sm:$0xff]  ;;  %v1678_v27 = vmul.f32 %v3618_v1, %v653_v22 }
 0x1f8   : > { %2670 = vst [vmem:[%s3630_s21 + $0xe20] sm:$0xff] %v1646_v26  ;;  %v655_v26 = vld [vmem:[%s3611_s28 + $0xf30] sm:$0xff]  ;;  %v1679_v29 = vmul.f32 %v3618_v1, %v654_v24 }
 0x1f9   : > { %2671 = vst [vmem:[%s3630_s21 + $0xe28] sm:$0xff] %v1647_v28  ;;  %v656_v28 = vld [vmem:[%s3611_s28 + $0xf38] sm:$0xff]  ;;  %v1680_v31 = vmul.f32 %v3618_v1, %v655_v26 }
 0x1fa   : > { %2672 = vst [vmem:[%s3630_s21 + $0xe30] sm:$0xff] %v1648_v30  ;;  %v657_v30 = vld [vmem:[%s3611_s28 + $0xf40] sm:$0xff]  ;;  %v1681_v33 = vmul.f32 %v3618_v1, %v656_v28 }
 0x1fb   : > { %2673 = vst [vmem:[%s3630_s21 + $0xe38] sm:$0xff] %v1649_v32  ;;  %v658_v32 = vld [vmem:[%s3611_s28 + $0xf48] sm:$0xff]  ;;  %v1682_v35 = vmul.f32 %v3618_v1, %v657_v30 }
 0x1fc   : > { %2674 = vst [vmem:[%s3630_s21 + $0xe40] sm:$0xff] %v1650_v34  ;;  %v659_v34 = vld [vmem:[%s3611_s28 + $0xf50] sm:$0xff]  ;;  %v1683_v37 = vmul.f32 %v3618_v1, %v658_v32 }
 0x1fd   : > { %2675 = vst [vmem:[%s3630_s21 + $0xe48] sm:$0xff] %v1651_v36  ;;  %v660_v36 = vld [vmem:[%s3611_s28 + $0xf58] sm:$0xff]  ;;  %v1684_v39 = vmul.f32 %v3618_v1, %v659_v34 }
 0x1fe   : > { %2676 = vst [vmem:[%s3630_s21 + $0xe50] sm:$0xff] %v1652_v38  ;;  %v661_v38 = vld [vmem:[%s3611_s28 + $0xf60] sm:$0xff]  ;;  %v1685_v41 = vmul.f32 %v3618_v1, %v660_v36 }
 0x1ff   : > { %2677 = vst [vmem:[%s3630_s21 + $0xe58] sm:$0xff] %v1653_v40  ;;  %v662_v40 = vld [vmem:[%s3611_s28 + $0xf68] sm:$0xff]  ;;  %v1686_v43 = vmul.f32 %v3618_v1, %v661_v38 }
 0x200   : > { %2678 = vst [vmem:[%s3630_s21 + $0xe60] sm:$0xff] %v1654_v42  ;;  %v663_v42 = vld [vmem:[%s3611_s28 + $0xf70] sm:$0xff]  ;;  %v1687_v45 = vmul.f32 %v3618_v1, %v662_v40 }
 0x201   : > { %2679 = vst [vmem:[%s3630_s21 + $0xe68] sm:$0xff] %v1655_v44  ;;  %v664_v44 = vld [vmem:[%s3611_s28 + $0xf78] sm:$0xff]  ;;  %v1688_v47 = vmul.f32 %v3618_v1, %v663_v42 }
 0x202   : > { %2680 = vst [vmem:[%s3630_s21 + $0xe70] sm:$0xff] %v1656_v46  ;;  %v665_v46 = vld [vmem:[%s3611_s28 + $0xf80] sm:$0xff]  ;;  %v1689_v49 = vmul.f32 %v3618_v1, %v664_v44 }
 0x203   : > { %2681 = vst [vmem:[%s3630_s21 + $0xe78] sm:$0xff] %v1657_v48  ;;  %v666_v48 = vld [vmem:[%s3611_s28 + $0xf88] sm:$0xff]  ;;  %v1690_v51 = vmul.f32 %v3618_v1, %v665_v46 }
 0x204   : > { %2682 = vst [vmem:[%s3630_s21 + $0xe80] sm:$0xff] %v1658_v50  ;;  %v667_v50 = vld [vmem:[%s3611_s28 + $0xf90] sm:$0xff]  ;;  %v1691_v53 = vmul.f32 %v3618_v1, %v666_v48 }
 0x205   : > { %2683 = vst [vmem:[%s3630_s21 + $0xe88] sm:$0xff] %v1659_v52  ;;  %v668_v52 = vld [vmem:[%s3611_s28 + $0xf98] sm:$0xff]  ;;  %v1692_v55 = vmul.f32 %v3618_v1, %v667_v50 }
 0x206   : > { %2684 = vst [vmem:[%s3630_s21 + $0xe90] sm:$0xff] %v1660_v54  ;;  %v669_v54 = vld [vmem:[%s3611_s28 + $0xfa0] sm:$0xff]  ;;  %v1693_v57 = vmul.f32 %v3618_v1, %v668_v52 }
 0x207   : > { %2685 = vst [vmem:[%s3630_s21 + $0xe98] sm:$0xff] %v1661_v56  ;;  %v670_v56 = vld [vmem:[%s3611_s28 + $0xfa8] sm:$0xff]  ;;  %v1694_v59 = vmul.f32 %v3618_v1, %v669_v54 }
 0x208   : > { %2686 = vst [vmem:[%s3630_s21 + $0xea0] sm:$0xff] %v1662_v58  ;;  %v671_v58 = vld [vmem:[%s3611_s28 + $0xfb0] sm:$0xff]  ;;  %v1695_v61 = vmul.f32 %v3618_v1, %v670_v56 }
 0x209   : > { %2687 = vst [vmem:[%s3630_s21 + $0xea8] sm:$0xff] %v1663_v60  ;;  %v672_v60 = vld [vmem:[%s3611_s28 + $0xfb8] sm:$0xff]  ;;  %v1696_v63 = vmul.f32 %v3618_v1, %v671_v58 }
 0x20a   : > { %2688 = vst [vmem:[%s3630_s21 + $0xeb0] sm:$0xff] %v1664_v62  ;;  %v673_v62 = vld [vmem:[%s3611_s28 + $0xfc0] sm:$0xff]  ;;  %v1697_v2 = vmul.f32 %v3618_v1, %v672_v60 }
 0x20b   : > { %2689 = vst [vmem:[%s3630_s21 + $0xeb8] sm:$0xff] %v1665_v0  ;;  %v674_v0 = vld [vmem:[%s3611_s28 + $0xfc8] sm:$0xff]  ;;  %v1698_v4 = vmul.f32 %v3618_v1, %v673_v62 }
 0x20c   : > { %2690 = vst [vmem:[%s3630_s21 + $0xec0] sm:$0xff] %v1666_v3  ;;  %v675_v3 = vld [vmem:[%s3611_s28 + $0xfd0] sm:$0xff]  ;;  %v1699_v6 = vmul.f32 %v3618_v1, %v674_v0 }
 0x20d   : > { %2691 = vst [vmem:[%s3630_s21 + $0xec8] sm:$0xff] %v1667_v5  ;;  %v676_v5 = vld [vmem:[%s3611_s28 + $0xfd8] sm:$0xff]  ;;  %v1700_v8 = vmul.f32 %v3618_v1, %v675_v3 }
 0x20e   : > { %2692 = vst [vmem:[%s3630_s21 + $0xed0] sm:$0xff] %v1668_v7  ;;  %v677_v7 = vld [vmem:[%s3611_s28 + $0xfe0] sm:$0xff]  ;;  %v1701_v10 = vmul.f32 %v3618_v1, %v676_v5 }
 0x20f   : > { %2693 = vst [vmem:[%s3630_s21 + $0xed8] sm:$0xff] %v1669_v9  ;;  %v678_v9 = vld [vmem:[%s3611_s28 + $0xfe8] sm:$0xff]  ;;  %v1702_v12 = vmul.f32 %v3618_v1, %v677_v7 }
 0x210   : > { %2694 = vst [vmem:[%s3630_s21 + $0xee0] sm:$0xff] %v1670_v11  ;;  %v679_v11 = vld [vmem:[%s3611_s28 + $0xff0] sm:$0xff]  ;;  %v1703_v14 = vmul.f32 %v3618_v1, %v678_v9 }
 0x211   : > { %2695 = vst [vmem:[%s3630_s21 + $0xee8] sm:$0xff] %v1671_v13  ;;  %v680_v13 = vld [vmem:[%s3611_s28 + $0xff8] sm:$0xff]  ;;  %v1704_v16 = vmul.f32 %v3618_v1, %v679_v11 }
 0x212   : > { %2696 = vst [vmem:[%s3630_s21 + $0xef0] sm:$0xff] %v1672_v15  ;;  %v681_v15 = vld [vmem:[%s3611_s28 + $0x1000] sm:$0xff]  ;;  %v1705_v18 = vmul.f32 %v3618_v1, %v680_v13 }
 0x213   : > { %2697 = vst [vmem:[%s3630_s21 + $0xef8] sm:$0xff] %v1673_v17  ;;  %v682_v17 = vld [vmem:[%s3611_s28 + $0x1008] sm:$0xff]  ;;  %v1706_v20 = vmul.f32 %v3618_v1, %v681_v15 }
 0x214   : > { %2698 = vst [vmem:[%s3630_s21 + $0xf00] sm:$0xff] %v1674_v19  ;;  %v683_v19 = vld [vmem:[%s3611_s28 + $0x1010] sm:$0xff]  ;;  %v1707_v22 = vmul.f32 %v3618_v1, %v682_v17 }
 0x215   : > { %2699 = vst [vmem:[%s3630_s21 + $0xf08] sm:$0xff] %v1675_v21  ;;  %v684_v21 = vld [vmem:[%s3611_s28 + $0x1018] sm:$0xff]  ;;  %v1708_v24 = vmul.f32 %v3618_v1, %v683_v19 }
 0x216   : > { %2700 = vst [vmem:[%s3630_s21 + $0xf10] sm:$0xff] %v1676_v23  ;;  %v685_v23 = vld [vmem:[%s3611_s28 + $0x1020] sm:$0xff]  ;;  %v1709_v26 = vmul.f32 %v3618_v1, %v684_v21 }
 0x217   : > { %2701 = vst [vmem:[%s3630_s21 + $0xf18] sm:$0xff] %v1677_v25  ;;  %v686_v25 = vld [vmem:[%s3611_s28 + $0x1028] sm:$0xff]  ;;  %v1710_v28 = vmul.f32 %v3618_v1, %v685_v23 }
 0x218   : > { %2702 = vst [vmem:[%s3630_s21 + $0xf20] sm:$0xff] %v1678_v27  ;;  %v687_v27 = vld [vmem:[%s3611_s28 + $0x1030] sm:$0xff]  ;;  %v1711_v30 = vmul.f32 %v3618_v1, %v686_v25 }
 0x219   : > { %2703 = vst [vmem:[%s3630_s21 + $0xf28] sm:$0xff] %v1679_v29  ;;  %v688_v29 = vld [vmem:[%s3611_s28 + $0x1038] sm:$0xff]  ;;  %v1712_v32 = vmul.f32 %v3618_v1, %v687_v27 }
 0x21a   : > { %2704 = vst [vmem:[%s3630_s21 + $0xf30] sm:$0xff] %v1680_v31  ;;  %v689_v31 = vld [vmem:[%s3611_s28 + $0x1040] sm:$0xff]  ;;  %v1713_v34 = vmul.f32 %v3618_v1, %v688_v29 }
 0x21b   : > { %2705 = vst [vmem:[%s3630_s21 + $0xf38] sm:$0xff] %v1681_v33  ;;  %v690_v33 = vld [vmem:[%s3611_s28 + $0x1048] sm:$0xff]  ;;  %v1714_v36 = vmul.f32 %v3618_v1, %v689_v31 }
 0x21c   : > { %2706 = vst [vmem:[%s3630_s21 + $0xf40] sm:$0xff] %v1682_v35  ;;  %v691_v35 = vld [vmem:[%s3611_s28 + $0x1050] sm:$0xff]  ;;  %v1715_v38 = vmul.f32 %v3618_v1, %v690_v33 }
 0x21d   : > { %2707 = vst [vmem:[%s3630_s21 + $0xf48] sm:$0xff] %v1683_v37  ;;  %v692_v37 = vld [vmem:[%s3611_s28 + $0x1058] sm:$0xff]  ;;  %v1716_v40 = vmul.f32 %v3618_v1, %v691_v35 }
 0x21e   : > { %2708 = vst [vmem:[%s3630_s21 + $0xf50] sm:$0xff] %v1684_v39  ;;  %v693_v39 = vld [vmem:[%s3611_s28 + $0x1060] sm:$0xff]  ;;  %v1717_v42 = vmul.f32 %v3618_v1, %v692_v37 }
 0x21f   : > { %2709 = vst [vmem:[%s3630_s21 + $0xf58] sm:$0xff] %v1685_v41  ;;  %v694_v41 = vld [vmem:[%s3611_s28 + $0x1068] sm:$0xff]  ;;  %v1718_v44 = vmul.f32 %v3618_v1, %v693_v39 }
 0x220   : > { %2710 = vst [vmem:[%s3630_s21 + $0xf60] sm:$0xff] %v1686_v43  ;;  %v695_v43 = vld [vmem:[%s3611_s28 + $0x1070] sm:$0xff]  ;;  %v1719_v46 = vmul.f32 %v3618_v1, %v694_v41 }
 0x221   : > { %2711 = vst [vmem:[%s3630_s21 + $0xf68] sm:$0xff] %v1687_v45  ;;  %v696_v45 = vld [vmem:[%s3611_s28 + $0x1078] sm:$0xff]  ;;  %v1720_v48 = vmul.f32 %v3618_v1, %v695_v43 }
 0x222   : > { %2712 = vst [vmem:[%s3630_s21 + $0xf70] sm:$0xff] %v1688_v47  ;;  %v697_v47 = vld [vmem:[%s3611_s28 + $0x1080] sm:$0xff]  ;;  %v1721_v50 = vmul.f32 %v3618_v1, %v696_v45 }
 0x223   : > { %2713 = vst [vmem:[%s3630_s21 + $0xf78] sm:$0xff] %v1689_v49  ;;  %v698_v49 = vld [vmem:[%s3611_s28 + $0x1088] sm:$0xff]  ;;  %v1722_v52 = vmul.f32 %v3618_v1, %v697_v47 }
 0x224   : > { %2714 = vst [vmem:[%s3630_s21 + $0xf80] sm:$0xff] %v1690_v51  ;;  %v699_v51 = vld [vmem:[%s3611_s28 + $0x1090] sm:$0xff]  ;;  %v1723_v54 = vmul.f32 %v3618_v1, %v698_v49 }
 0x225   : > { %2715 = vst [vmem:[%s3630_s21 + $0xf88] sm:$0xff] %v1691_v53  ;;  %v700_v53 = vld [vmem:[%s3611_s28 + $0x1098] sm:$0xff]  ;;  %v1724_v56 = vmul.f32 %v3618_v1, %v699_v51 }
 0x226   : > { %2716 = vst [vmem:[%s3630_s21 + $0xf90] sm:$0xff] %v1692_v55  ;;  %v701_v55 = vld [vmem:[%s3611_s28 + $0x10a0] sm:$0xff]  ;;  %v1725_v58 = vmul.f32 %v3618_v1, %v700_v53 }
 0x227   : > { %2717 = vst [vmem:[%s3630_s21 + $0xf98] sm:$0xff] %v1693_v57  ;;  %v702_v57 = vld [vmem:[%s3611_s28 + $0x10a8] sm:$0xff]  ;;  %v1726_v60 = vmul.f32 %v3618_v1, %v701_v55 }
 0x228   : > { %2718 = vst [vmem:[%s3630_s21 + $0xfa0] sm:$0xff] %v1694_v59  ;;  %v703_v59 = vld [vmem:[%s3611_s28 + $0x10b0] sm:$0xff]  ;;  %v1727_v62 = vmul.f32 %v3618_v1, %v702_v57 }
 0x229   : > { %2719 = vst [vmem:[%s3630_s21 + $0xfa8] sm:$0xff] %v1695_v61  ;;  %v704_v61 = vld [vmem:[%s3611_s28 + $0x10b8] sm:$0xff]  ;;  %v1728_v0 = vmul.f32 %v3618_v1, %v703_v59 }
 0x22a   : > { %2720 = vst [vmem:[%s3630_s21 + $0xfb0] sm:$0xff] %v1696_v63  ;;  %v705_v63 = vld [vmem:[%s3611_s28 + $0x10c0] sm:$0xff]  ;;  %v1729_v3 = vmul.f32 %v3618_v1, %v704_v61 }
 0x22b   : > { %2721 = vst [vmem:[%s3630_s21 + $0xfb8] sm:$0xff] %v1697_v2  ;;  %v706_v2 = vld [vmem:[%s3611_s28 + $0x10c8] sm:$0xff]  ;;  %v1730_v5 = vmul.f32 %v3618_v1, %v705_v63 }
 0x22c   : > { %2722 = vst [vmem:[%s3630_s21 + $0xfc0] sm:$0xff] %v1698_v4  ;;  %v707_v4 = vld [vmem:[%s3611_s28 + $0x10d0] sm:$0xff]  ;;  %v1731_v7 = vmul.f32 %v3618_v1, %v706_v2 }
 0x22d   : > { %2723 = vst [vmem:[%s3630_s21 + $0xfc8] sm:$0xff] %v1699_v6  ;;  %v708_v6 = vld [vmem:[%s3611_s28 + $0x10d8] sm:$0xff]  ;;  %v1732_v9 = vmul.f32 %v3618_v1, %v707_v4 }
 0x22e   : > { %2724 = vst [vmem:[%s3630_s21 + $0xfd0] sm:$0xff] %v1700_v8  ;;  %v709_v8 = vld [vmem:[%s3611_s28 + $0x10e0] sm:$0xff]  ;;  %v1733_v11 = vmul.f32 %v3618_v1, %v708_v6 }
 0x22f   : > { %2725 = vst [vmem:[%s3630_s21 + $0xfd8] sm:$0xff] %v1701_v10  ;;  %v710_v10 = vld [vmem:[%s3611_s28 + $0x10e8] sm:$0xff]  ;;  %v1734_v13 = vmul.f32 %v3618_v1, %v709_v8 }
 0x230   : > { %2726 = vst [vmem:[%s3630_s21 + $0xfe0] sm:$0xff] %v1702_v12  ;;  %v711_v12 = vld [vmem:[%s3611_s28 + $0x10f0] sm:$0xff]  ;;  %v1735_v15 = vmul.f32 %v3618_v1, %v710_v10 }
 0x231   : > { %2727 = vst [vmem:[%s3630_s21 + $0xfe8] sm:$0xff] %v1703_v14  ;;  %v712_v14 = vld [vmem:[%s3611_s28 + $0x10f8] sm:$0xff]  ;;  %v1736_v17 = vmul.f32 %v3618_v1, %v711_v12 }
 0x232   : > { %2728 = vst [vmem:[%s3630_s21 + $0xff0] sm:$0xff] %v1704_v16  ;;  %v713_v16 = vld [vmem:[%s3611_s28 + $0x1100] sm:$0xff]  ;;  %v1737_v19 = vmul.f32 %v3618_v1, %v712_v14 }
 0x233   : > { %2729 = vst [vmem:[%s3630_s21 + $0xff8] sm:$0xff] %v1705_v18  ;;  %v714_v18 = vld [vmem:[%s3611_s28 + $0x1108] sm:$0xff]  ;;  %v1738_v21 = vmul.f32 %v3618_v1, %v713_v16 }
 0x234   : > { %2730 = vst [vmem:[%s3630_s21 + $0x1000] sm:$0xff] %v1706_v20  ;;  %v715_v20 = vld [vmem:[%s3611_s28 + $0x1110] sm:$0xff]  ;;  %v1739_v23 = vmul.f32 %v3618_v1, %v714_v18 }
 0x235   : > { %2731 = vst [vmem:[%s3630_s21 + $0x1008] sm:$0xff] %v1707_v22  ;;  %v716_v22 = vld [vmem:[%s3611_s28 + $0x1118] sm:$0xff]  ;;  %v1740_v25 = vmul.f32 %v3618_v1, %v715_v20 }
 0x236   : > { %2732 = vst [vmem:[%s3630_s21 + $0x1010] sm:$0xff] %v1708_v24  ;;  %v717_v24 = vld [vmem:[%s3611_s28 + $0x1120] sm:$0xff]  ;;  %v1741_v27 = vmul.f32 %v3618_v1, %v716_v22 }
 0x237   : > { %2733 = vst [vmem:[%s3630_s21 + $0x1018] sm:$0xff] %v1709_v26  ;;  %v718_v26 = vld [vmem:[%s3611_s28 + $0x1128] sm:$0xff]  ;;  %v1742_v29 = vmul.f32 %v3618_v1, %v717_v24 }
 0x238   : > { %2734 = vst [vmem:[%s3630_s21 + $0x1020] sm:$0xff] %v1710_v28  ;;  %v719_v28 = vld [vmem:[%s3611_s28 + $0x1130] sm:$0xff]  ;;  %v1743_v31 = vmul.f32 %v3618_v1, %v718_v26 }
 0x239   : > { %2735 = vst [vmem:[%s3630_s21 + $0x1028] sm:$0xff] %v1711_v30  ;;  %v720_v30 = vld [vmem:[%s3611_s28 + $0x1138] sm:$0xff]  ;;  %v1744_v33 = vmul.f32 %v3618_v1, %v719_v28 }
 0x23a   : > { %2736 = vst [vmem:[%s3630_s21 + $0x1030] sm:$0xff] %v1712_v32  ;;  %v721_v32 = vld [vmem:[%s3611_s28 + $0x1140] sm:$0xff]  ;;  %v1745_v35 = vmul.f32 %v3618_v1, %v720_v30 }
 0x23b   : > { %2737 = vst [vmem:[%s3630_s21 + $0x1038] sm:$0xff] %v1713_v34  ;;  %v722_v34 = vld [vmem:[%s3611_s28 + $0x1148] sm:$0xff]  ;;  %v1746_v37 = vmul.f32 %v3618_v1, %v721_v32 }
 0x23c   : > { %2738 = vst [vmem:[%s3630_s21 + $0x1040] sm:$0xff] %v1714_v36  ;;  %v723_v36 = vld [vmem:[%s3611_s28 + $0x1150] sm:$0xff]  ;;  %v1747_v39 = vmul.f32 %v3618_v1, %v722_v34 }
 0x23d   : > { %2739 = vst [vmem:[%s3630_s21 + $0x1048] sm:$0xff] %v1715_v38  ;;  %v724_v38 = vld [vmem:[%s3611_s28 + $0x1158] sm:$0xff]  ;;  %v1748_v41 = vmul.f32 %v3618_v1, %v723_v36 }
 0x23e   : > { %2740 = vst [vmem:[%s3630_s21 + $0x1050] sm:$0xff] %v1716_v40  ;;  %v725_v40 = vld [vmem:[%s3611_s28 + $0x1160] sm:$0xff]  ;;  %v1749_v43 = vmul.f32 %v3618_v1, %v724_v38 }
 0x23f   : > { %2741 = vst [vmem:[%s3630_s21 + $0x1058] sm:$0xff] %v1717_v42  ;;  %v726_v42 = vld [vmem:[%s3611_s28 + $0x1168] sm:$0xff]  ;;  %v1750_v45 = vmul.f32 %v3618_v1, %v725_v40 }
 0x240   : > { %2742 = vst [vmem:[%s3630_s21 + $0x1060] sm:$0xff] %v1718_v44  ;;  %v727_v44 = vld [vmem:[%s3611_s28 + $0x1170] sm:$0xff]  ;;  %v1751_v47 = vmul.f32 %v3618_v1, %v726_v42 }
 0x241   : > { %2743 = vst [vmem:[%s3630_s21 + $0x1068] sm:$0xff] %v1719_v46  ;;  %v728_v46 = vld [vmem:[%s3611_s28 + $0x1178] sm:$0xff]  ;;  %v1752_v49 = vmul.f32 %v3618_v1, %v727_v44 }
 0x242   : > { %2744 = vst [vmem:[%s3630_s21 + $0x1070] sm:$0xff] %v1720_v48  ;;  %v729_v48 = vld [vmem:[%s3611_s28 + $0x1180] sm:$0xff]  ;;  %v1753_v51 = vmul.f32 %v3618_v1, %v728_v46 }
 0x243   : > { %2745 = vst [vmem:[%s3630_s21 + $0x1078] sm:$0xff] %v1721_v50  ;;  %v730_v50 = vld [vmem:[%s3611_s28 + $0x1188] sm:$0xff]  ;;  %v1754_v53 = vmul.f32 %v3618_v1, %v729_v48 }
 0x244   : > { %2746 = vst [vmem:[%s3630_s21 + $0x1080] sm:$0xff] %v1722_v52  ;;  %v731_v52 = vld [vmem:[%s3611_s28 + $0x1190] sm:$0xff]  ;;  %v1755_v55 = vmul.f32 %v3618_v1, %v730_v50 }
 0x245   : > { %2747 = vst [vmem:[%s3630_s21 + $0x1088] sm:$0xff] %v1723_v54  ;;  %v732_v54 = vld [vmem:[%s3611_s28 + $0x1198] sm:$0xff]  ;;  %v1756_v57 = vmul.f32 %v3618_v1, %v731_v52 }
 0x246   : > { %2748 = vst [vmem:[%s3630_s21 + $0x1090] sm:$0xff] %v1724_v56  ;;  %v733_v56 = vld [vmem:[%s3611_s28 + $0x11a0] sm:$0xff]  ;;  %v1757_v59 = vmul.f32 %v3618_v1, %v732_v54 }
 0x247   : > { %2749 = vst [vmem:[%s3630_s21 + $0x1098] sm:$0xff] %v1725_v58  ;;  %v734_v58 = vld [vmem:[%s3611_s28 + $0x11a8] sm:$0xff]  ;;  %v1758_v61 = vmul.f32 %v3618_v1, %v733_v56 }
 0x248   : > { %2750 = vst [vmem:[%s3630_s21 + $0x10a0] sm:$0xff] %v1726_v60  ;;  %v735_v60 = vld [vmem:[%s3611_s28 + $0x11b0] sm:$0xff]  ;;  %v1759_v63 = vmul.f32 %v3618_v1, %v734_v58 }
 0x249   : > { %2751 = vst [vmem:[%s3630_s21 + $0x10a8] sm:$0xff] %v1727_v62  ;;  %v736_v62 = vld [vmem:[%s3611_s28 + $0x11b8] sm:$0xff]  ;;  %v1760_v2 = vmul.f32 %v3618_v1, %v735_v60 }
 0x24a   : > { %2752 = vst [vmem:[%s3630_s21 + $0x10b0] sm:$0xff] %v1728_v0  ;;  %v737_v0 = vld [vmem:[%s3611_s28 + $0x11c0] sm:$0xff]  ;;  %v1761_v4 = vmul.f32 %v3618_v1, %v736_v62 }
 0x24b   : > { %2753 = vst [vmem:[%s3630_s21 + $0x10b8] sm:$0xff] %v1729_v3  ;;  %v738_v3 = vld [vmem:[%s3611_s28 + $0x11c8] sm:$0xff]  ;;  %v1762_v6 = vmul.f32 %v3618_v1, %v737_v0 }
 0x24c   : > { %2754 = vst [vmem:[%s3630_s21 + $0x10c0] sm:$0xff] %v1730_v5  ;;  %v739_v5 = vld [vmem:[%s3611_s28 + $0x11d0] sm:$0xff]  ;;  %v1763_v8 = vmul.f32 %v3618_v1, %v738_v3 }
 0x24d   : > { %2755 = vst [vmem:[%s3630_s21 + $0x10c8] sm:$0xff] %v1731_v7  ;;  %v740_v7 = vld [vmem:[%s3611_s28 + $0x11d8] sm:$0xff]  ;;  %v1764_v10 = vmul.f32 %v3618_v1, %v739_v5 }
 0x24e   : > { %2756 = vst [vmem:[%s3630_s21 + $0x10d0] sm:$0xff] %v1732_v9  ;;  %v741_v9 = vld [vmem:[%s3611_s28 + $0x11e0] sm:$0xff]  ;;  %v1765_v12 = vmul.f32 %v3618_v1, %v740_v7 }
 0x24f   : > { %2757 = vst [vmem:[%s3630_s21 + $0x10d8] sm:$0xff] %v1733_v11  ;;  %v742_v11 = vld [vmem:[%s3611_s28 + $0x11e8] sm:$0xff]  ;;  %v1766_v14 = vmul.f32 %v3618_v1, %v741_v9 }
 0x250   : > { %2758 = vst [vmem:[%s3630_s21 + $0x10e0] sm:$0xff] %v1734_v13  ;;  %v743_v13 = vld [vmem:[%s3611_s28 + $0x11f0] sm:$0xff]  ;;  %v1767_v16 = vmul.f32 %v3618_v1, %v742_v11 }
 0x251   : > { %2759 = vst [vmem:[%s3630_s21 + $0x10e8] sm:$0xff] %v1735_v15  ;;  %v744_v15 = vld [vmem:[%s3611_s28 + $0x11f8] sm:$0xff]  ;;  %v1768_v18 = vmul.f32 %v3618_v1, %v743_v13 }
 0x252   : > { %2760 = vst [vmem:[%s3630_s21 + $0x10f0] sm:$0xff] %v1736_v17  ;;  %v745_v17 = vld [vmem:[%s3611_s28 + $0x1200] sm:$0xff]  ;;  %v1769_v20 = vmul.f32 %v3618_v1, %v744_v15 }
 0x253   : > { %2761 = vst [vmem:[%s3630_s21 + $0x10f8] sm:$0xff] %v1737_v19  ;;  %v746_v19 = vld [vmem:[%s3611_s28 + $0x1208] sm:$0xff]  ;;  %v1770_v22 = vmul.f32 %v3618_v1, %v745_v17 }
 0x254   : > { %2762 = vst [vmem:[%s3630_s21 + $0x1100] sm:$0xff] %v1738_v21  ;;  %v747_v21 = vld [vmem:[%s3611_s28 + $0x1210] sm:$0xff]  ;;  %v1771_v24 = vmul.f32 %v3618_v1, %v746_v19 }
 0x255   : > { %2763 = vst [vmem:[%s3630_s21 + $0x1108] sm:$0xff] %v1739_v23  ;;  %v748_v23 = vld [vmem:[%s3611_s28 + $0x1218] sm:$0xff]  ;;  %v1772_v26 = vmul.f32 %v3618_v1, %v747_v21 }
 0x256   : > { %2764 = vst [vmem:[%s3630_s21 + $0x1110] sm:$0xff] %v1740_v25  ;;  %v749_v25 = vld [vmem:[%s3611_s28 + $0x1220] sm:$0xff]  ;;  %v1773_v28 = vmul.f32 %v3618_v1, %v748_v23 }
 0x257   : > { %2765 = vst [vmem:[%s3630_s21 + $0x1118] sm:$0xff] %v1741_v27  ;;  %v750_v27 = vld [vmem:[%s3611_s28 + $0x1228] sm:$0xff]  ;;  %v1774_v30 = vmul.f32 %v3618_v1, %v749_v25 }
 0x258   : > { %2766 = vst [vmem:[%s3630_s21 + $0x1120] sm:$0xff] %v1742_v29  ;;  %v751_v29 = vld [vmem:[%s3611_s28 + $0x1230] sm:$0xff]  ;;  %v1775_v32 = vmul.f32 %v3618_v1, %v750_v27 }
 0x259   : > { %2767 = vst [vmem:[%s3630_s21 + $0x1128] sm:$0xff] %v1743_v31  ;;  %v752_v31 = vld [vmem:[%s3611_s28 + $0x1238] sm:$0xff]  ;;  %v1776_v34 = vmul.f32 %v3618_v1, %v751_v29 }
 0x25a   : > { %2768 = vst [vmem:[%s3630_s21 + $0x1130] sm:$0xff] %v1744_v33  ;;  %v753_v33 = vld [vmem:[%s3611_s28 + $0x1240] sm:$0xff]  ;;  %v1777_v36 = vmul.f32 %v3618_v1, %v752_v31 }
 0x25b   : > { %2769 = vst [vmem:[%s3630_s21 + $0x1138] sm:$0xff] %v1745_v35  ;;  %v754_v35 = vld [vmem:[%s3611_s28 + $0x1248] sm:$0xff]  ;;  %v1778_v38 = vmul.f32 %v3618_v1, %v753_v33 }
 0x25c   : > { %2770 = vst [vmem:[%s3630_s21 + $0x1140] sm:$0xff] %v1746_v37  ;;  %v755_v37 = vld [vmem:[%s3611_s28 + $0x1250] sm:$0xff]  ;;  %v1779_v40 = vmul.f32 %v3618_v1, %v754_v35 }
 0x25d   : > { %2771 = vst [vmem:[%s3630_s21 + $0x1148] sm:$0xff] %v1747_v39  ;;  %v756_v39 = vld [vmem:[%s3611_s28 + $0x1258] sm:$0xff]  ;;  %v1780_v42 = vmul.f32 %v3618_v1, %v755_v37 }
 0x25e   : > { %2772 = vst [vmem:[%s3630_s21 + $0x1150] sm:$0xff] %v1748_v41  ;;  %v757_v41 = vld [vmem:[%s3611_s28 + $0x1260] sm:$0xff]  ;;  %v1781_v44 = vmul.f32 %v3618_v1, %v756_v39 }
 0x25f   : > { %2773 = vst [vmem:[%s3630_s21 + $0x1158] sm:$0xff] %v1749_v43  ;;  %v758_v43 = vld [vmem:[%s3611_s28 + $0x1268] sm:$0xff]  ;;  %v1782_v46 = vmul.f32 %v3618_v1, %v757_v41 }
 0x260   : > { %2774 = vst [vmem:[%s3630_s21 + $0x1160] sm:$0xff] %v1750_v45  ;;  %v759_v45 = vld [vmem:[%s3611_s28 + $0x1270] sm:$0xff]  ;;  %v1783_v48 = vmul.f32 %v3618_v1, %v758_v43 }
 0x261   : > { %2775 = vst [vmem:[%s3630_s21 + $0x1168] sm:$0xff] %v1751_v47  ;;  %v760_v47 = vld [vmem:[%s3611_s28 + $0x1278] sm:$0xff]  ;;  %v1784_v50 = vmul.f32 %v3618_v1, %v759_v45 }
 0x262   : > { %2776 = vst [vmem:[%s3630_s21 + $0x1170] sm:$0xff] %v1752_v49  ;;  %v761_v49 = vld [vmem:[%s3611_s28 + $0x1280] sm:$0xff]  ;;  %v1785_v52 = vmul.f32 %v3618_v1, %v760_v47 }
 0x263   : > { %2777 = vst [vmem:[%s3630_s21 + $0x1178] sm:$0xff] %v1753_v51  ;;  %v762_v51 = vld [vmem:[%s3611_s28 + $0x1288] sm:$0xff]  ;;  %v1786_v54 = vmul.f32 %v3618_v1, %v761_v49 }
 0x264   : > { %2778 = vst [vmem:[%s3630_s21 + $0x1180] sm:$0xff] %v1754_v53  ;;  %v763_v53 = vld [vmem:[%s3611_s28 + $0x1290] sm:$0xff]  ;;  %v1787_v56 = vmul.f32 %v3618_v1, %v762_v51 }
 0x265   : > { %2779 = vst [vmem:[%s3630_s21 + $0x1188] sm:$0xff] %v1755_v55  ;;  %v764_v55 = vld [vmem:[%s3611_s28 + $0x1298] sm:$0xff]  ;;  %v1788_v58 = vmul.f32 %v3618_v1, %v763_v53 }
 0x266   : > { %2780 = vst [vmem:[%s3630_s21 + $0x1190] sm:$0xff] %v1756_v57  ;;  %v765_v57 = vld [vmem:[%s3611_s28 + $0x12a0] sm:$0xff]  ;;  %v1789_v60 = vmul.f32 %v3618_v1, %v764_v55 }
 0x267   : > { %2781 = vst [vmem:[%s3630_s21 + $0x1198] sm:$0xff] %v1757_v59  ;;  %v766_v59 = vld [vmem:[%s3611_s28 + $0x12a8] sm:$0xff]  ;;  %v1790_v62 = vmul.f32 %v3618_v1, %v765_v57 }
 0x268   : > { %2782 = vst [vmem:[%s3630_s21 + $0x11a0] sm:$0xff] %v1758_v61  ;;  %v767_v61 = vld [vmem:[%s3611_s28 + $0x12b0] sm:$0xff]  ;;  %v1791_v0 = vmul.f32 %v3618_v1, %v766_v59 }
 0x269   : > { %2783 = vst [vmem:[%s3630_s21 + $0x11a8] sm:$0xff] %v1759_v63  ;;  %v768_v63 = vld [vmem:[%s3611_s28 + $0x12b8] sm:$0xff]  ;;  %v1792_v3 = vmul.f32 %v3618_v1, %v767_v61 }
 0x26a   : > { %2784 = vst [vmem:[%s3630_s21 + $0x11b0] sm:$0xff] %v1760_v2  ;;  %v769_v2 = vld [vmem:[%s3611_s28 + $0x12c0] sm:$0xff]  ;;  %v1793_v5 = vmul.f32 %v3618_v1, %v768_v63 }
 0x26b   : > { %2785 = vst [vmem:[%s3630_s21 + $0x11b8] sm:$0xff] %v1761_v4  ;;  %v770_v4 = vld [vmem:[%s3611_s28 + $0x12c8] sm:$0xff]  ;;  %v1794_v7 = vmul.f32 %v3618_v1, %v769_v2 }
 0x26c   : > { %2786 = vst [vmem:[%s3630_s21 + $0x11c0] sm:$0xff] %v1762_v6  ;;  %v771_v6 = vld [vmem:[%s3611_s28 + $0x12d0] sm:$0xff]  ;;  %v1795_v9 = vmul.f32 %v3618_v1, %v770_v4 }
 0x26d   : > { %2787 = vst [vmem:[%s3630_s21 + $0x11c8] sm:$0xff] %v1763_v8  ;;  %v772_v8 = vld [vmem:[%s3611_s28 + $0x12d8] sm:$0xff]  ;;  %v1796_v11 = vmul.f32 %v3618_v1, %v771_v6 }
 0x26e   : > { %2788 = vst [vmem:[%s3630_s21 + $0x11d0] sm:$0xff] %v1764_v10  ;;  %v773_v10 = vld [vmem:[%s3611_s28 + $0x12e0] sm:$0xff]  ;;  %v1797_v13 = vmul.f32 %v3618_v1, %v772_v8 }
 0x26f   : > { %2789 = vst [vmem:[%s3630_s21 + $0x11d8] sm:$0xff] %v1765_v12  ;;  %v774_v12 = vld [vmem:[%s3611_s28 + $0x12e8] sm:$0xff]  ;;  %v1798_v15 = vmul.f32 %v3618_v1, %v773_v10 }
 0x270   : > { %2790 = vst [vmem:[%s3630_s21 + $0x11e0] sm:$0xff] %v1766_v14  ;;  %v775_v14 = vld [vmem:[%s3611_s28 + $0x12f0] sm:$0xff]  ;;  %v1799_v17 = vmul.f32 %v3618_v1, %v774_v12 }
 0x271   : > { %2791 = vst [vmem:[%s3630_s21 + $0x11e8] sm:$0xff] %v1767_v16  ;;  %v776_v16 = vld [vmem:[%s3611_s28 + $0x12f8] sm:$0xff]  ;;  %v1800_v19 = vmul.f32 %v3618_v1, %v775_v14 }
 0x272   : > { %2792 = vst [vmem:[%s3630_s21 + $0x11f0] sm:$0xff] %v1768_v18  ;;  %v777_v18 = vld [vmem:[%s3611_s28 + $0x1300] sm:$0xff]  ;;  %v1801_v21 = vmul.f32 %v3618_v1, %v776_v16 }
 0x273   : > { %2793 = vst [vmem:[%s3630_s21 + $0x11f8] sm:$0xff] %v1769_v20  ;;  %v778_v20 = vld [vmem:[%s3611_s28 + $0x1308] sm:$0xff]  ;;  %v1802_v23 = vmul.f32 %v3618_v1, %v777_v18 }
 0x274   : > { %2794 = vst [vmem:[%s3630_s21 + $0x1200] sm:$0xff] %v1770_v22  ;;  %v779_v22 = vld [vmem:[%s3611_s28 + $0x1310] sm:$0xff]  ;;  %v1803_v25 = vmul.f32 %v3618_v1, %v778_v20 }
 0x275   : > { %2795 = vst [vmem:[%s3630_s21 + $0x1208] sm:$0xff] %v1771_v24  ;;  %v780_v24 = vld [vmem:[%s3611_s28 + $0x1318] sm:$0xff]  ;;  %v1804_v27 = vmul.f32 %v3618_v1, %v779_v22 }
 0x276   : > { %2796 = vst [vmem:[%s3630_s21 + $0x1210] sm:$0xff] %v1772_v26  ;;  %v781_v26 = vld [vmem:[%s3611_s28 + $0x1320] sm:$0xff]  ;;  %v1805_v29 = vmul.f32 %v3618_v1, %v780_v24 }
 0x277   : > { %2797 = vst [vmem:[%s3630_s21 + $0x1218] sm:$0xff] %v1773_v28  ;;  %v782_v28 = vld [vmem:[%s3611_s28 + $0x1328] sm:$0xff]  ;;  %v1806_v31 = vmul.f32 %v3618_v1, %v781_v26 }
 0x278   : > { %2798 = vst [vmem:[%s3630_s21 + $0x1220] sm:$0xff] %v1774_v30  ;;  %v783_v30 = vld [vmem:[%s3611_s28 + $0x1330] sm:$0xff]  ;;  %v1807_v33 = vmul.f32 %v3618_v1, %v782_v28 }
 0x279   : > { %2799 = vst [vmem:[%s3630_s21 + $0x1228] sm:$0xff] %v1775_v32  ;;  %v784_v32 = vld [vmem:[%s3611_s28 + $0x1338] sm:$0xff]  ;;  %v1808_v35 = vmul.f32 %v3618_v1, %v783_v30 }
 0x27a   : > { %2800 = vst [vmem:[%s3630_s21 + $0x1230] sm:$0xff] %v1776_v34  ;;  %v785_v34 = vld [vmem:[%s3611_s28 + $0x1340] sm:$0xff]  ;;  %v1809_v37 = vmul.f32 %v3618_v1, %v784_v32 }
 0x27b   : > { %2801 = vst [vmem:[%s3630_s21 + $0x1238] sm:$0xff] %v1777_v36  ;;  %v786_v36 = vld [vmem:[%s3611_s28 + $0x1348] sm:$0xff]  ;;  %v1810_v39 = vmul.f32 %v3618_v1, %v785_v34 }
 0x27c   : > { %2802 = vst [vmem:[%s3630_s21 + $0x1240] sm:$0xff] %v1778_v38  ;;  %v787_v38 = vld [vmem:[%s3611_s28 + $0x1350] sm:$0xff]  ;;  %v1811_v41 = vmul.f32 %v3618_v1, %v786_v36 }
 0x27d   : > { %2803 = vst [vmem:[%s3630_s21 + $0x1248] sm:$0xff] %v1779_v40  ;;  %v788_v40 = vld [vmem:[%s3611_s28 + $0x1358] sm:$0xff]  ;;  %v1812_v43 = vmul.f32 %v3618_v1, %v787_v38 }
 0x27e   : > { %2804 = vst [vmem:[%s3630_s21 + $0x1250] sm:$0xff] %v1780_v42  ;;  %v789_v42 = vld [vmem:[%s3611_s28 + $0x1360] sm:$0xff]  ;;  %v1813_v45 = vmul.f32 %v3618_v1, %v788_v40 }
 0x27f   : > { %2805 = vst [vmem:[%s3630_s21 + $0x1258] sm:$0xff] %v1781_v44  ;;  %v790_v44 = vld [vmem:[%s3611_s28 + $0x1368] sm:$0xff]  ;;  %v1814_v47 = vmul.f32 %v3618_v1, %v789_v42 }
 0x280   : > { %2806 = vst [vmem:[%s3630_s21 + $0x1260] sm:$0xff] %v1782_v46  ;;  %v791_v46 = vld [vmem:[%s3611_s28 + $0x1370] sm:$0xff]  ;;  %v1815_v49 = vmul.f32 %v3618_v1, %v790_v44 }
 0x281   : > { %2807 = vst [vmem:[%s3630_s21 + $0x1268] sm:$0xff] %v1783_v48  ;;  %v792_v48 = vld [vmem:[%s3611_s28 + $0x1378] sm:$0xff]  ;;  %v1816_v51 = vmul.f32 %v3618_v1, %v791_v46 }
 0x282   : > { %2808 = vst [vmem:[%s3630_s21 + $0x1270] sm:$0xff] %v1784_v50  ;;  %v793_v50 = vld [vmem:[%s3611_s28 + $0x1380] sm:$0xff]  ;;  %v1817_v53 = vmul.f32 %v3618_v1, %v792_v48 }
 0x283   : > { %2809 = vst [vmem:[%s3630_s21 + $0x1278] sm:$0xff] %v1785_v52  ;;  %v794_v52 = vld [vmem:[%s3611_s28 + $0x1388] sm:$0xff]  ;;  %v1818_v55 = vmul.f32 %v3618_v1, %v793_v50 }
 0x284   : > { %2810 = vst [vmem:[%s3630_s21 + $0x1280] sm:$0xff] %v1786_v54  ;;  %v795_v54 = vld [vmem:[%s3611_s28 + $0x1390] sm:$0xff]  ;;  %v1819_v57 = vmul.f32 %v3618_v1, %v794_v52 }
 0x285   : > { %2811 = vst [vmem:[%s3630_s21 + $0x1288] sm:$0xff] %v1787_v56  ;;  %v796_v56 = vld [vmem:[%s3611_s28 + $0x1398] sm:$0xff]  ;;  %v1820_v59 = vmul.f32 %v3618_v1, %v795_v54 }
 0x286   : > { %2812 = vst [vmem:[%s3630_s21 + $0x1290] sm:$0xff] %v1788_v58  ;;  %v797_v58 = vld [vmem:[%s3611_s28 + $0x13a0] sm:$0xff]  ;;  %v1821_v61 = vmul.f32 %v3618_v1, %v796_v56 }
 0x287   : > { %2813 = vst [vmem:[%s3630_s21 + $0x1298] sm:$0xff] %v1789_v60  ;;  %v798_v60 = vld [vmem:[%s3611_s28 + $0x13a8] sm:$0xff]  ;;  %v1822_v63 = vmul.f32 %v3618_v1, %v797_v58 }
 0x288   : > { %2814 = vst [vmem:[%s3630_s21 + $0x12a0] sm:$0xff] %v1790_v62  ;;  %v799_v62 = vld [vmem:[%s3611_s28 + $0x13b0] sm:$0xff]  ;;  %v1823_v2 = vmul.f32 %v3618_v1, %v798_v60 }
 0x289   : > { %2815 = vst [vmem:[%s3630_s21 + $0x12a8] sm:$0xff] %v1791_v0  ;;  %v800_v0 = vld [vmem:[%s3611_s28 + $0x13b8] sm:$0xff]  ;;  %v1824_v4 = vmul.f32 %v3618_v1, %v799_v62 }
 0x28a   : > { %2816 = vst [vmem:[%s3630_s21 + $0x12b0] sm:$0xff] %v1792_v3  ;;  %v801_v3 = vld [vmem:[%s3611_s28 + $0x13c0] sm:$0xff]  ;;  %v1825_v6 = vmul.f32 %v3618_v1, %v800_v0 }
 0x28b   : > { %2817 = vst [vmem:[%s3630_s21 + $0x12b8] sm:$0xff] %v1793_v5  ;;  %v802_v5 = vld [vmem:[%s3611_s28 + $0x13c8] sm:$0xff]  ;;  %v1826_v8 = vmul.f32 %v3618_v1, %v801_v3 }
 0x28c   : > { %2818 = vst [vmem:[%s3630_s21 + $0x12c0] sm:$0xff] %v1794_v7  ;;  %v803_v7 = vld [vmem:[%s3611_s28 + $0x13d0] sm:$0xff]  ;;  %v1827_v10 = vmul.f32 %v3618_v1, %v802_v5 }
 0x28d   : > { %2819 = vst [vmem:[%s3630_s21 + $0x12c8] sm:$0xff] %v1795_v9  ;;  %v804_v9 = vld [vmem:[%s3611_s28 + $0x13d8] sm:$0xff]  ;;  %v1828_v12 = vmul.f32 %v3618_v1, %v803_v7 }
 0x28e   : > { %2820 = vst [vmem:[%s3630_s21 + $0x12d0] sm:$0xff] %v1796_v11  ;;  %v805_v11 = vld [vmem:[%s3611_s28 + $0x13e0] sm:$0xff]  ;;  %v1829_v14 = vmul.f32 %v3618_v1, %v804_v9 }
 0x28f   : > { %2821 = vst [vmem:[%s3630_s21 + $0x12d8] sm:$0xff] %v1797_v13  ;;  %v806_v13 = vld [vmem:[%s3611_s28 + $0x13e8] sm:$0xff]  ;;  %v1830_v16 = vmul.f32 %v3618_v1, %v805_v11 }
 0x290   : > { %2822 = vst [vmem:[%s3630_s21 + $0x12e0] sm:$0xff] %v1798_v15  ;;  %v807_v15 = vld [vmem:[%s3611_s28 + $0x13f0] sm:$0xff]  ;;  %v1831_v18 = vmul.f32 %v3618_v1, %v806_v13 }
 0x291   : > { %2823 = vst [vmem:[%s3630_s21 + $0x12e8] sm:$0xff] %v1799_v17  ;;  %v808_v17 = vld [vmem:[%s3611_s28 + $0x13f8] sm:$0xff]  ;;  %v1832_v20 = vmul.f32 %v3618_v1, %v807_v15 }
 0x292   : > { %2824 = vst [vmem:[%s3630_s21 + $0x12f0] sm:$0xff] %v1800_v19  ;;  %v809_v19 = vld [vmem:[%s3611_s28 + $0x1400] sm:$0xff]  ;;  %v1833_v22 = vmul.f32 %v3618_v1, %v808_v17 }
 0x293   : > { %2825 = vst [vmem:[%s3630_s21 + $0x12f8] sm:$0xff] %v1801_v21  ;;  %v810_v21 = vld [vmem:[%s3611_s28 + $0x1408] sm:$0xff]  ;;  %v1834_v24 = vmul.f32 %v3618_v1, %v809_v19 }
 0x294   : > { %2826 = vst [vmem:[%s3630_s21 + $0x1300] sm:$0xff] %v1802_v23  ;;  %v811_v23 = vld [vmem:[%s3611_s28 + $0x1410] sm:$0xff]  ;;  %v1835_v26 = vmul.f32 %v3618_v1, %v810_v21 }
 0x295   : > { %2827 = vst [vmem:[%s3630_s21 + $0x1308] sm:$0xff] %v1803_v25  ;;  %v812_v25 = vld [vmem:[%s3611_s28 + $0x1418] sm:$0xff]  ;;  %v1836_v28 = vmul.f32 %v3618_v1, %v811_v23 }
 0x296   : > { %2828 = vst [vmem:[%s3630_s21 + $0x1310] sm:$0xff] %v1804_v27  ;;  %v813_v27 = vld [vmem:[%s3611_s28 + $0x1420] sm:$0xff]  ;;  %v1837_v30 = vmul.f32 %v3618_v1, %v812_v25 }
 0x297   : > { %2829 = vst [vmem:[%s3630_s21 + $0x1318] sm:$0xff] %v1805_v29  ;;  %v814_v29 = vld [vmem:[%s3611_s28 + $0x1428] sm:$0xff]  ;;  %v1838_v32 = vmul.f32 %v3618_v1, %v813_v27 }
 0x298   : > { %2830 = vst [vmem:[%s3630_s21 + $0x1320] sm:$0xff] %v1806_v31  ;;  %v815_v31 = vld [vmem:[%s3611_s28 + $0x1430] sm:$0xff]  ;;  %v1839_v34 = vmul.f32 %v3618_v1, %v814_v29 }
 0x299   : > { %2831 = vst [vmem:[%s3630_s21 + $0x1328] sm:$0xff] %v1807_v33  ;;  %v816_v33 = vld [vmem:[%s3611_s28 + $0x1438] sm:$0xff]  ;;  %v1840_v36 = vmul.f32 %v3618_v1, %v815_v31 }
 0x29a   : > { %2832 = vst [vmem:[%s3630_s21 + $0x1330] sm:$0xff] %v1808_v35  ;;  %v817_v35 = vld [vmem:[%s3611_s28 + $0x1440] sm:$0xff]  ;;  %v1841_v38 = vmul.f32 %v3618_v1, %v816_v33 }
 0x29b   : > { %2833 = vst [vmem:[%s3630_s21 + $0x1338] sm:$0xff] %v1809_v37  ;;  %v818_v37 = vld [vmem:[%s3611_s28 + $0x1448] sm:$0xff]  ;;  %v1842_v40 = vmul.f32 %v3618_v1, %v817_v35 }
 0x29c   : > { %2834 = vst [vmem:[%s3630_s21 + $0x1340] sm:$0xff] %v1810_v39  ;;  %v819_v39 = vld [vmem:[%s3611_s28 + $0x1450] sm:$0xff]  ;;  %v1843_v42 = vmul.f32 %v3618_v1, %v818_v37 }
 0x29d   : > { %2835 = vst [vmem:[%s3630_s21 + $0x1348] sm:$0xff] %v1811_v41  ;;  %v820_v41 = vld [vmem:[%s3611_s28 + $0x1458] sm:$0xff]  ;;  %v1844_v44 = vmul.f32 %v3618_v1, %v819_v39 }
 0x29e   : > { %2836 = vst [vmem:[%s3630_s21 + $0x1350] sm:$0xff] %v1812_v43  ;;  %v821_v43 = vld [vmem:[%s3611_s28 + $0x1460] sm:$0xff]  ;;  %v1845_v46 = vmul.f32 %v3618_v1, %v820_v41 }
 0x29f   : > { %2837 = vst [vmem:[%s3630_s21 + $0x1358] sm:$0xff] %v1813_v45  ;;  %v822_v45 = vld [vmem:[%s3611_s28 + $0x1468] sm:$0xff]  ;;  %v1846_v48 = vmul.f32 %v3618_v1, %v821_v43 }
 0x2a0   : > { %2838 = vst [vmem:[%s3630_s21 + $0x1360] sm:$0xff] %v1814_v47  ;;  %v823_v47 = vld [vmem:[%s3611_s28 + $0x1470] sm:$0xff]  ;;  %v1847_v50 = vmul.f32 %v3618_v1, %v822_v45 }
 0x2a1   : > { %2839 = vst [vmem:[%s3630_s21 + $0x1368] sm:$0xff] %v1815_v49  ;;  %v824_v49 = vld [vmem:[%s3611_s28 + $0x1478] sm:$0xff]  ;;  %v1848_v52 = vmul.f32 %v3618_v1, %v823_v47 }
 0x2a2   : > { %2840 = vst [vmem:[%s3630_s21 + $0x1370] sm:$0xff] %v1816_v51  ;;  %v825_v51 = vld [vmem:[%s3611_s28 + $0x1480] sm:$0xff]  ;;  %v1849_v54 = vmul.f32 %v3618_v1, %v824_v49 }
 0x2a3   : > { %2841 = vst [vmem:[%s3630_s21 + $0x1378] sm:$0xff] %v1817_v53  ;;  %v826_v53 = vld [vmem:[%s3611_s28 + $0x1488] sm:$0xff]  ;;  %v1850_v56 = vmul.f32 %v3618_v1, %v825_v51 }
 0x2a4   : > { %2842 = vst [vmem:[%s3630_s21 + $0x1380] sm:$0xff] %v1818_v55  ;;  %v827_v55 = vld [vmem:[%s3611_s28 + $0x1490] sm:$0xff]  ;;  %v1851_v58 = vmul.f32 %v3618_v1, %v826_v53 }
 0x2a5   : > { %2843 = vst [vmem:[%s3630_s21 + $0x1388] sm:$0xff] %v1819_v57  ;;  %v828_v57 = vld [vmem:[%s3611_s28 + $0x1498] sm:$0xff]  ;;  %v1852_v60 = vmul.f32 %v3618_v1, %v827_v55 }
 0x2a6   : > { %2844 = vst [vmem:[%s3630_s21 + $0x1390] sm:$0xff] %v1820_v59  ;;  %v829_v59 = vld [vmem:[%s3611_s28 + $0x14a0] sm:$0xff]  ;;  %v1853_v62 = vmul.f32 %v3618_v1, %v828_v57 }
 0x2a7   : > { %2845 = vst [vmem:[%s3630_s21 + $0x1398] sm:$0xff] %v1821_v61  ;;  %v830_v61 = vld [vmem:[%s3611_s28 + $0x14a8] sm:$0xff]  ;;  %v1854_v0 = vmul.f32 %v3618_v1, %v829_v59 }
 0x2a8   : > { %2846 = vst [vmem:[%s3630_s21 + $0x13a0] sm:$0xff] %v1822_v63  ;;  %v831_v63 = vld [vmem:[%s3611_s28 + $0x14b0] sm:$0xff]  ;;  %v1855_v3 = vmul.f32 %v3618_v1, %v830_v61 }
 0x2a9   : > { %2847 = vst [vmem:[%s3630_s21 + $0x13a8] sm:$0xff] %v1823_v2  ;;  %v832_v2 = vld [vmem:[%s3611_s28 + $0x14b8] sm:$0xff]  ;;  %v1856_v5 = vmul.f32 %v3618_v1, %v831_v63 }
 0x2aa   : > { %2848 = vst [vmem:[%s3630_s21 + $0x13b0] sm:$0xff] %v1824_v4  ;;  %v833_v4 = vld [vmem:[%s3611_s28 + $0x14c0] sm:$0xff]  ;;  %v1857_v7 = vmul.f32 %v3618_v1, %v832_v2 }
 0x2ab   : > { %2849 = vst [vmem:[%s3630_s21 + $0x13b8] sm:$0xff] %v1825_v6  ;;  %v834_v6 = vld [vmem:[%s3611_s28 + $0x14c8] sm:$0xff]  ;;  %v1858_v9 = vmul.f32 %v3618_v1, %v833_v4 }
 0x2ac   : > { %2850 = vst [vmem:[%s3630_s21 + $0x13c0] sm:$0xff] %v1826_v8  ;;  %v835_v8 = vld [vmem:[%s3611_s28 + $0x14d0] sm:$0xff]  ;;  %v1859_v11 = vmul.f32 %v3618_v1, %v834_v6 }
 0x2ad   : > { %2851 = vst [vmem:[%s3630_s21 + $0x13c8] sm:$0xff] %v1827_v10  ;;  %v836_v10 = vld [vmem:[%s3611_s28 + $0x14d8] sm:$0xff]  ;;  %v1860_v13 = vmul.f32 %v3618_v1, %v835_v8 }
 0x2ae   : > { %2852 = vst [vmem:[%s3630_s21 + $0x13d0] sm:$0xff] %v1828_v12  ;;  %v837_v12 = vld [vmem:[%s3611_s28 + $0x14e0] sm:$0xff]  ;;  %v1861_v15 = vmul.f32 %v3618_v1, %v836_v10 }
 0x2af   : > { %2853 = vst [vmem:[%s3630_s21 + $0x13d8] sm:$0xff] %v1829_v14  ;;  %v838_v14 = vld [vmem:[%s3611_s28 + $0x14e8] sm:$0xff]  ;;  %v1862_v17 = vmul.f32 %v3618_v1, %v837_v12 }
 0x2b0   : > { %2854 = vst [vmem:[%s3630_s21 + $0x13e0] sm:$0xff] %v1830_v16  ;;  %v839_v16 = vld [vmem:[%s3611_s28 + $0x14f0] sm:$0xff]  ;;  %v1863_v19 = vmul.f32 %v3618_v1, %v838_v14 }
 0x2b1   : > { %2855 = vst [vmem:[%s3630_s21 + $0x13e8] sm:$0xff] %v1831_v18  ;;  %v840_v18 = vld [vmem:[%s3611_s28 + $0x14f8] sm:$0xff]  ;;  %v1864_v21 = vmul.f32 %v3618_v1, %v839_v16 }
 0x2b2   : > { %2856 = vst [vmem:[%s3630_s21 + $0x13f0] sm:$0xff] %v1832_v20  ;;  %v841_v20 = vld [vmem:[%s3611_s28 + $0x1500] sm:$0xff]  ;;  %v1865_v23 = vmul.f32 %v3618_v1, %v840_v18 }
 0x2b3   : > { %2857 = vst [vmem:[%s3630_s21 + $0x13f8] sm:$0xff] %v1833_v22  ;;  %v842_v22 = vld [vmem:[%s3611_s28 + $0x1508] sm:$0xff]  ;;  %v1866_v25 = vmul.f32 %v3618_v1, %v841_v20 }
 0x2b4   : > { %2858 = vst [vmem:[%s3630_s21 + $0x1400] sm:$0xff] %v1834_v24  ;;  %v843_v24 = vld [vmem:[%s3611_s28 + $0x1510] sm:$0xff]  ;;  %v1867_v27 = vmul.f32 %v3618_v1, %v842_v22 }
 0x2b5   : > { %2859 = vst [vmem:[%s3630_s21 + $0x1408] sm:$0xff] %v1835_v26  ;;  %v844_v26 = vld [vmem:[%s3611_s28 + $0x1518] sm:$0xff]  ;;  %v1868_v29 = vmul.f32 %v3618_v1, %v843_v24 }
 0x2b6   : > { %2860 = vst [vmem:[%s3630_s21 + $0x1410] sm:$0xff] %v1836_v28  ;;  %v845_v28 = vld [vmem:[%s3611_s28 + $0x1520] sm:$0xff]  ;;  %v1869_v31 = vmul.f32 %v3618_v1, %v844_v26 }
 0x2b7   : > { %2861 = vst [vmem:[%s3630_s21 + $0x1418] sm:$0xff] %v1837_v30  ;;  %v846_v30 = vld [vmem:[%s3611_s28 + $0x1528] sm:$0xff]  ;;  %v1870_v33 = vmul.f32 %v3618_v1, %v845_v28 }
 0x2b8   : > { %2862 = vst [vmem:[%s3630_s21 + $0x1420] sm:$0xff] %v1838_v32  ;;  %v847_v32 = vld [vmem:[%s3611_s28 + $0x1530] sm:$0xff]  ;;  %v1871_v35 = vmul.f32 %v3618_v1, %v846_v30 }
 0x2b9   : > { %2863 = vst [vmem:[%s3630_s21 + $0x1428] sm:$0xff] %v1839_v34  ;;  %v848_v34 = vld [vmem:[%s3611_s28 + $0x1538] sm:$0xff]  ;;  %v1872_v37 = vmul.f32 %v3618_v1, %v847_v32 }
 0x2ba   : > { %2864 = vst [vmem:[%s3630_s21 + $0x1430] sm:$0xff] %v1840_v36  ;;  %v849_v36 = vld [vmem:[%s3611_s28 + $0x1540] sm:$0xff]  ;;  %v1873_v39 = vmul.f32 %v3618_v1, %v848_v34 }
 0x2bb   : > { %2865 = vst [vmem:[%s3630_s21 + $0x1438] sm:$0xff] %v1841_v38  ;;  %v850_v38 = vld [vmem:[%s3611_s28 + $0x1548] sm:$0xff]  ;;  %v1874_v41 = vmul.f32 %v3618_v1, %v849_v36 }
 0x2bc   : > { %2866 = vst [vmem:[%s3630_s21 + $0x1440] sm:$0xff] %v1842_v40  ;;  %v851_v40 = vld [vmem:[%s3611_s28 + $0x1550] sm:$0xff]  ;;  %v1875_v43 = vmul.f32 %v3618_v1, %v850_v38 }
 0x2bd   : > { %2867 = vst [vmem:[%s3630_s21 + $0x1448] sm:$0xff] %v1843_v42  ;;  %v852_v42 = vld [vmem:[%s3611_s28 + $0x1558] sm:$0xff]  ;;  %v1876_v45 = vmul.f32 %v3618_v1, %v851_v40 }
 0x2be   : > { %2868 = vst [vmem:[%s3630_s21 + $0x1450] sm:$0xff] %v1844_v44  ;;  %v853_v44 = vld [vmem:[%s3611_s28 + $0x1560] sm:$0xff]  ;;  %v1877_v47 = vmul.f32 %v3618_v1, %v852_v42 }
 0x2bf   : > { %2869 = vst [vmem:[%s3630_s21 + $0x1458] sm:$0xff] %v1845_v46  ;;  %v854_v46 = vld [vmem:[%s3611_s28 + $0x1568] sm:$0xff]  ;;  %v1878_v49 = vmul.f32 %v3618_v1, %v853_v44 }
 0x2c0   : > { %2870 = vst [vmem:[%s3630_s21 + $0x1460] sm:$0xff] %v1846_v48  ;;  %v855_v48 = vld [vmem:[%s3611_s28 + $0x1570] sm:$0xff]  ;;  %v1879_v51 = vmul.f32 %v3618_v1, %v854_v46 }
 0x2c1   : > { %2871 = vst [vmem:[%s3630_s21 + $0x1468] sm:$0xff] %v1847_v50  ;;  %v856_v50 = vld [vmem:[%s3611_s28 + $0x1578] sm:$0xff]  ;;  %v1880_v53 = vmul.f32 %v3618_v1, %v855_v48 }
 0x2c2   : > { %2872 = vst [vmem:[%s3630_s21 + $0x1470] sm:$0xff] %v1848_v52  ;;  %v857_v52 = vld [vmem:[%s3611_s28 + $0x1580] sm:$0xff]  ;;  %v1881_v55 = vmul.f32 %v3618_v1, %v856_v50 }
 0x2c3   : > { %2873 = vst [vmem:[%s3630_s21 + $0x1478] sm:$0xff] %v1849_v54  ;;  %v858_v54 = vld [vmem:[%s3611_s28 + $0x1588] sm:$0xff]  ;;  %v1882_v57 = vmul.f32 %v3618_v1, %v857_v52 }
 0x2c4   : > { %2874 = vst [vmem:[%s3630_s21 + $0x1480] sm:$0xff] %v1850_v56  ;;  %v859_v56 = vld [vmem:[%s3611_s28 + $0x1590] sm:$0xff]  ;;  %v1883_v59 = vmul.f32 %v3618_v1, %v858_v54 }
 0x2c5   : > { %2875 = vst [vmem:[%s3630_s21 + $0x1488] sm:$0xff] %v1851_v58  ;;  %v860_v58 = vld [vmem:[%s3611_s28 + $0x1598] sm:$0xff]  ;;  %v1884_v61 = vmul.f32 %v3618_v1, %v859_v56 }
 0x2c6   : > { %2876 = vst [vmem:[%s3630_s21 + $0x1490] sm:$0xff] %v1852_v60  ;;  %v861_v60 = vld [vmem:[%s3611_s28 + $0x15a0] sm:$0xff]  ;;  %v1885_v63 = vmul.f32 %v3618_v1, %v860_v58 }
 0x2c7   : > { %2877 = vst [vmem:[%s3630_s21 + $0x1498] sm:$0xff] %v1853_v62  ;;  %v862_v62 = vld [vmem:[%s3611_s28 + $0x15a8] sm:$0xff]  ;;  %v1886_v2 = vmul.f32 %v3618_v1, %v861_v60 }
 0x2c8   : > { %2878 = vst [vmem:[%s3630_s21 + $0x14a0] sm:$0xff] %v1854_v0  ;;  %v863_v0 = vld [vmem:[%s3611_s28 + $0x15b0] sm:$0xff]  ;;  %v1887_v4 = vmul.f32 %v3618_v1, %v862_v62 }
 0x2c9   : > { %2879 = vst [vmem:[%s3630_s21 + $0x14a8] sm:$0xff] %v1855_v3  ;;  %v864_v3 = vld [vmem:[%s3611_s28 + $0x15b8] sm:$0xff]  ;;  %v1888_v6 = vmul.f32 %v3618_v1, %v863_v0 }
 0x2ca   : > { %2880 = vst [vmem:[%s3630_s21 + $0x14b0] sm:$0xff] %v1856_v5  ;;  %v865_v5 = vld [vmem:[%s3611_s28 + $0x15c0] sm:$0xff]  ;;  %v1889_v8 = vmul.f32 %v3618_v1, %v864_v3 }
 0x2cb   : > { %2881 = vst [vmem:[%s3630_s21 + $0x14b8] sm:$0xff] %v1857_v7  ;;  %v866_v7 = vld [vmem:[%s3611_s28 + $0x15c8] sm:$0xff]  ;;  %v1890_v10 = vmul.f32 %v3618_v1, %v865_v5 }
 0x2cc   : > { %2882 = vst [vmem:[%s3630_s21 + $0x14c0] sm:$0xff] %v1858_v9  ;;  %v867_v9 = vld [vmem:[%s3611_s28 + $0x15d0] sm:$0xff]  ;;  %v1891_v12 = vmul.f32 %v3618_v1, %v866_v7 }
 0x2cd   : > { %2883 = vst [vmem:[%s3630_s21 + $0x14c8] sm:$0xff] %v1859_v11  ;;  %v868_v11 = vld [vmem:[%s3611_s28 + $0x15d8] sm:$0xff]  ;;  %v1892_v14 = vmul.f32 %v3618_v1, %v867_v9 }
 0x2ce   : > { %2884 = vst [vmem:[%s3630_s21 + $0x14d0] sm:$0xff] %v1860_v13  ;;  %v869_v13 = vld [vmem:[%s3611_s28 + $0x15e0] sm:$0xff]  ;;  %v1893_v16 = vmul.f32 %v3618_v1, %v868_v11 }
 0x2cf   : > { %2885 = vst [vmem:[%s3630_s21 + $0x14d8] sm:$0xff] %v1861_v15  ;;  %v870_v15 = vld [vmem:[%s3611_s28 + $0x15e8] sm:$0xff]  ;;  %v1894_v18 = vmul.f32 %v3618_v1, %v869_v13 }
 0x2d0   : > { %2886 = vst [vmem:[%s3630_s21 + $0x14e0] sm:$0xff] %v1862_v17  ;;  %v871_v17 = vld [vmem:[%s3611_s28 + $0x15f0] sm:$0xff]  ;;  %v1895_v20 = vmul.f32 %v3618_v1, %v870_v15 }
 0x2d1   : > { %2887 = vst [vmem:[%s3630_s21 + $0x14e8] sm:$0xff] %v1863_v19  ;;  %v872_v19 = vld [vmem:[%s3611_s28 + $0x15f8] sm:$0xff]  ;;  %v1896_v22 = vmul.f32 %v3618_v1, %v871_v17 }
 0x2d2   : > { %2888 = vst [vmem:[%s3630_s21 + $0x14f0] sm:$0xff] %v1864_v21  ;;  %v873_v21 = vld [vmem:[%s3611_s28 + $0x1600] sm:$0xff]  ;;  %v1897_v24 = vmul.f32 %v3618_v1, %v872_v19 }
 0x2d3   : > { %2889 = vst [vmem:[%s3630_s21 + $0x14f8] sm:$0xff] %v1865_v23  ;;  %v874_v23 = vld [vmem:[%s3611_s28 + $0x1608] sm:$0xff]  ;;  %v1898_v26 = vmul.f32 %v3618_v1, %v873_v21 }
 0x2d4   : > { %2890 = vst [vmem:[%s3630_s21 + $0x1500] sm:$0xff] %v1866_v25  ;;  %v875_v25 = vld [vmem:[%s3611_s28 + $0x1610] sm:$0xff]  ;;  %v1899_v28 = vmul.f32 %v3618_v1, %v874_v23 }
 0x2d5   : > { %2891 = vst [vmem:[%s3630_s21 + $0x1508] sm:$0xff] %v1867_v27  ;;  %v876_v27 = vld [vmem:[%s3611_s28 + $0x1618] sm:$0xff]  ;;  %v1900_v30 = vmul.f32 %v3618_v1, %v875_v25 }
 0x2d6   : > { %2892 = vst [vmem:[%s3630_s21 + $0x1510] sm:$0xff] %v1868_v29  ;;  %v877_v29 = vld [vmem:[%s3611_s28 + $0x1620] sm:$0xff]  ;;  %v1901_v32 = vmul.f32 %v3618_v1, %v876_v27 }
 0x2d7   : > { %2893 = vst [vmem:[%s3630_s21 + $0x1518] sm:$0xff] %v1869_v31  ;;  %v878_v31 = vld [vmem:[%s3611_s28 + $0x1628] sm:$0xff]  ;;  %v1902_v34 = vmul.f32 %v3618_v1, %v877_v29 }
 0x2d8   : > { %2894 = vst [vmem:[%s3630_s21 + $0x1520] sm:$0xff] %v1870_v33  ;;  %v879_v33 = vld [vmem:[%s3611_s28 + $0x1630] sm:$0xff]  ;;  %v1903_v36 = vmul.f32 %v3618_v1, %v878_v31 }
 0x2d9   : > { %2895 = vst [vmem:[%s3630_s21 + $0x1528] sm:$0xff] %v1871_v35  ;;  %v880_v35 = vld [vmem:[%s3611_s28 + $0x1638] sm:$0xff]  ;;  %v1904_v38 = vmul.f32 %v3618_v1, %v879_v33 }
 0x2da   : > { %2896 = vst [vmem:[%s3630_s21 + $0x1530] sm:$0xff] %v1872_v37  ;;  %v881_v37 = vld [vmem:[%s3611_s28 + $0x1640] sm:$0xff]  ;;  %v1905_v40 = vmul.f32 %v3618_v1, %v880_v35 }
 0x2db   : > { %2897 = vst [vmem:[%s3630_s21 + $0x1538] sm:$0xff] %v1873_v39  ;;  %v882_v39 = vld [vmem:[%s3611_s28 + $0x1648] sm:$0xff]  ;;  %v1906_v42 = vmul.f32 %v3618_v1, %v881_v37 }
 0x2dc   : > { %2898 = vst [vmem:[%s3630_s21 + $0x1540] sm:$0xff] %v1874_v41  ;;  %v883_v41 = vld [vmem:[%s3611_s28 + $0x1650] sm:$0xff]  ;;  %v1907_v44 = vmul.f32 %v3618_v1, %v882_v39 }
 0x2dd   : > { %2899 = vst [vmem:[%s3630_s21 + $0x1548] sm:$0xff] %v1875_v43  ;;  %v884_v43 = vld [vmem:[%s3611_s28 + $0x1658] sm:$0xff]  ;;  %v1908_v46 = vmul.f32 %v3618_v1, %v883_v41 }
 0x2de   : > { %2900 = vst [vmem:[%s3630_s21 + $0x1550] sm:$0xff] %v1876_v45  ;;  %v885_v45 = vld [vmem:[%s3611_s28 + $0x1660] sm:$0xff]  ;;  %v1909_v48 = vmul.f32 %v3618_v1, %v884_v43 }
 0x2df   : > { %2901 = vst [vmem:[%s3630_s21 + $0x1558] sm:$0xff] %v1877_v47  ;;  %v886_v47 = vld [vmem:[%s3611_s28 + $0x1668] sm:$0xff]  ;;  %v1910_v50 = vmul.f32 %v3618_v1, %v885_v45 }
 0x2e0   : > { %2902 = vst [vmem:[%s3630_s21 + $0x1560] sm:$0xff] %v1878_v49  ;;  %v887_v49 = vld [vmem:[%s3611_s28 + $0x1670] sm:$0xff]  ;;  %v1911_v52 = vmul.f32 %v3618_v1, %v886_v47 }
 0x2e1   : > { %2903 = vst [vmem:[%s3630_s21 + $0x1568] sm:$0xff] %v1879_v51  ;;  %v888_v51 = vld [vmem:[%s3611_s28 + $0x1678] sm:$0xff]  ;;  %v1912_v54 = vmul.f32 %v3618_v1, %v887_v49 }
 0x2e2   : > { %2904 = vst [vmem:[%s3630_s21 + $0x1570] sm:$0xff] %v1880_v53  ;;  %v889_v53 = vld [vmem:[%s3611_s28 + $0x1680] sm:$0xff]  ;;  %v1913_v56 = vmul.f32 %v3618_v1, %v888_v51 }
 0x2e3   : > { %2905 = vst [vmem:[%s3630_s21 + $0x1578] sm:$0xff] %v1881_v55  ;;  %v890_v55 = vld [vmem:[%s3611_s28 + $0x1688] sm:$0xff]  ;;  %v1914_v58 = vmul.f32 %v3618_v1, %v889_v53 }
 0x2e4   : > { %2906 = vst [vmem:[%s3630_s21 + $0x1580] sm:$0xff] %v1882_v57  ;;  %v891_v57 = vld [vmem:[%s3611_s28 + $0x1690] sm:$0xff]  ;;  %v1915_v60 = vmul.f32 %v3618_v1, %v890_v55 }
 0x2e5   : > { %2907 = vst [vmem:[%s3630_s21 + $0x1588] sm:$0xff] %v1883_v59  ;;  %v892_v59 = vld [vmem:[%s3611_s28 + $0x1698] sm:$0xff]  ;;  %v1916_v62 = vmul.f32 %v3618_v1, %v891_v57 }
 0x2e6   : > { %2908 = vst [vmem:[%s3630_s21 + $0x1590] sm:$0xff] %v1884_v61  ;;  %v893_v61 = vld [vmem:[%s3611_s28 + $0x16a0] sm:$0xff]  ;;  %v1917_v0 = vmul.f32 %v3618_v1, %v892_v59 }
 0x2e7   : > { %2909 = vst [vmem:[%s3630_s21 + $0x1598] sm:$0xff] %v1885_v63  ;;  %v894_v63 = vld [vmem:[%s3611_s28 + $0x16a8] sm:$0xff]  ;;  %v1918_v3 = vmul.f32 %v3618_v1, %v893_v61 }
 0x2e8   : > { %2910 = vst [vmem:[%s3630_s21 + $0x15a0] sm:$0xff] %v1886_v2  ;;  %v895_v2 = vld [vmem:[%s3611_s28 + $0x16b0] sm:$0xff]  ;;  %v1919_v5 = vmul.f32 %v3618_v1, %v894_v63 }
 0x2e9   : > { %2911 = vst [vmem:[%s3630_s21 + $0x15a8] sm:$0xff] %v1887_v4  ;;  %v896_v4 = vld [vmem:[%s3611_s28 + $0x16b8] sm:$0xff]  ;;  %v1920_v7 = vmul.f32 %v3618_v1, %v895_v2 }
 0x2ea   : > { %2912 = vst [vmem:[%s3630_s21 + $0x15b0] sm:$0xff] %v1888_v6  ;;  %v897_v6 = vld [vmem:[%s3611_s28 + $0x16c0] sm:$0xff]  ;;  %v1921_v9 = vmul.f32 %v3618_v1, %v896_v4 }
 0x2eb   : > { %2913 = vst [vmem:[%s3630_s21 + $0x15b8] sm:$0xff] %v1889_v8  ;;  %v898_v8 = vld [vmem:[%s3611_s28 + $0x16c8] sm:$0xff]  ;;  %v1922_v11 = vmul.f32 %v3618_v1, %v897_v6 }
 0x2ec   : > { %2914 = vst [vmem:[%s3630_s21 + $0x15c0] sm:$0xff] %v1890_v10  ;;  %v899_v10 = vld [vmem:[%s3611_s28 + $0x16d0] sm:$0xff]  ;;  %v1923_v13 = vmul.f32 %v3618_v1, %v898_v8 }
 0x2ed   : > { %2915 = vst [vmem:[%s3630_s21 + $0x15c8] sm:$0xff] %v1891_v12  ;;  %v900_v12 = vld [vmem:[%s3611_s28 + $0x16d8] sm:$0xff]  ;;  %v1924_v15 = vmul.f32 %v3618_v1, %v899_v10 }
 0x2ee   : > { %2916 = vst [vmem:[%s3630_s21 + $0x15d0] sm:$0xff] %v1892_v14  ;;  %v901_v14 = vld [vmem:[%s3611_s28 + $0x16e0] sm:$0xff]  ;;  %v1925_v17 = vmul.f32 %v3618_v1, %v900_v12 }
 0x2ef   : > { %2917 = vst [vmem:[%s3630_s21 + $0x15d8] sm:$0xff] %v1893_v16  ;;  %v902_v16 = vld [vmem:[%s3611_s28 + $0x16e8] sm:$0xff]  ;;  %v1926_v19 = vmul.f32 %v3618_v1, %v901_v14 }
 0x2f0   : > { %2918 = vst [vmem:[%s3630_s21 + $0x15e0] sm:$0xff] %v1894_v18  ;;  %v903_v18 = vld [vmem:[%s3611_s28 + $0x16f0] sm:$0xff]  ;;  %v1927_v21 = vmul.f32 %v3618_v1, %v902_v16 }
 0x2f1   : > { %2919 = vst [vmem:[%s3630_s21 + $0x15e8] sm:$0xff] %v1895_v20  ;;  %v904_v20 = vld [vmem:[%s3611_s28 + $0x16f8] sm:$0xff]  ;;  %v1928_v23 = vmul.f32 %v3618_v1, %v903_v18 }
 0x2f2   : > { %2920 = vst [vmem:[%s3630_s21 + $0x15f0] sm:$0xff] %v1896_v22  ;;  %v905_v22 = vld [vmem:[%s3611_s28 + $0x1700] sm:$0xff]  ;;  %v1929_v25 = vmul.f32 %v3618_v1, %v904_v20 }
 0x2f3   : > { %2921 = vst [vmem:[%s3630_s21 + $0x15f8] sm:$0xff] %v1897_v24  ;;  %v906_v24 = vld [vmem:[%s3611_s28 + $0x1708] sm:$0xff]  ;;  %v1930_v27 = vmul.f32 %v3618_v1, %v905_v22 }
 0x2f4   : > { %2922 = vst [vmem:[%s3630_s21 + $0x1600] sm:$0xff] %v1898_v26  ;;  %v907_v26 = vld [vmem:[%s3611_s28 + $0x1710] sm:$0xff]  ;;  %v1931_v29 = vmul.f32 %v3618_v1, %v906_v24 }
 0x2f5   : > { %2923 = vst [vmem:[%s3630_s21 + $0x1608] sm:$0xff] %v1899_v28  ;;  %v908_v28 = vld [vmem:[%s3611_s28 + $0x1718] sm:$0xff]  ;;  %v1932_v31 = vmul.f32 %v3618_v1, %v907_v26 }
 0x2f6   : > { %2924 = vst [vmem:[%s3630_s21 + $0x1610] sm:$0xff] %v1900_v30  ;;  %v909_v30 = vld [vmem:[%s3611_s28 + $0x1720] sm:$0xff]  ;;  %v1933_v33 = vmul.f32 %v3618_v1, %v908_v28 }
 0x2f7   : > { %2925 = vst [vmem:[%s3630_s21 + $0x1618] sm:$0xff] %v1901_v32  ;;  %v910_v32 = vld [vmem:[%s3611_s28 + $0x1728] sm:$0xff]  ;;  %v1934_v35 = vmul.f32 %v3618_v1, %v909_v30 }
 0x2f8   : > { %2926 = vst [vmem:[%s3630_s21 + $0x1620] sm:$0xff] %v1902_v34  ;;  %v911_v34 = vld [vmem:[%s3611_s28 + $0x1730] sm:$0xff]  ;;  %v1935_v37 = vmul.f32 %v3618_v1, %v910_v32 }
 0x2f9   : > { %2927 = vst [vmem:[%s3630_s21 + $0x1628] sm:$0xff] %v1903_v36  ;;  %v912_v36 = vld [vmem:[%s3611_s28 + $0x1738] sm:$0xff]  ;;  %v1936_v39 = vmul.f32 %v3618_v1, %v911_v34 }
 0x2fa   : > { %2928 = vst [vmem:[%s3630_s21 + $0x1630] sm:$0xff] %v1904_v38  ;;  %v913_v38 = vld [vmem:[%s3611_s28 + $0x1740] sm:$0xff]  ;;  %v1937_v41 = vmul.f32 %v3618_v1, %v912_v36 }
 0x2fb   : > { %2929 = vst [vmem:[%s3630_s21 + $0x1638] sm:$0xff] %v1905_v40  ;;  %v914_v40 = vld [vmem:[%s3611_s28 + $0x1748] sm:$0xff]  ;;  %v1938_v43 = vmul.f32 %v3618_v1, %v913_v38 }
 0x2fc   : > { %2930 = vst [vmem:[%s3630_s21 + $0x1640] sm:$0xff] %v1906_v42  ;;  %v915_v42 = vld [vmem:[%s3611_s28 + $0x1750] sm:$0xff]  ;;  %v1939_v45 = vmul.f32 %v3618_v1, %v914_v40 }
 0x2fd   : > { %2931 = vst [vmem:[%s3630_s21 + $0x1648] sm:$0xff] %v1907_v44  ;;  %v916_v44 = vld [vmem:[%s3611_s28 + $0x1758] sm:$0xff]  ;;  %v1940_v47 = vmul.f32 %v3618_v1, %v915_v42 }
 0x2fe   : > { %2932 = vst [vmem:[%s3630_s21 + $0x1650] sm:$0xff] %v1908_v46  ;;  %v917_v46 = vld [vmem:[%s3611_s28 + $0x1760] sm:$0xff]  ;;  %v1941_v49 = vmul.f32 %v3618_v1, %v916_v44 }
 0x2ff   : > { %2933 = vst [vmem:[%s3630_s21 + $0x1658] sm:$0xff] %v1909_v48  ;;  %v918_v48 = vld [vmem:[%s3611_s28 + $0x1768] sm:$0xff]  ;;  %v1942_v51 = vmul.f32 %v3618_v1, %v917_v46 }
 0x300   : > { %2934 = vst [vmem:[%s3630_s21 + $0x1660] sm:$0xff] %v1910_v50  ;;  %v919_v50 = vld [vmem:[%s3611_s28 + $0x1770] sm:$0xff]  ;;  %v1943_v53 = vmul.f32 %v3618_v1, %v918_v48 }
 0x301   : > { %2935 = vst [vmem:[%s3630_s21 + $0x1668] sm:$0xff] %v1911_v52  ;;  %v920_v52 = vld [vmem:[%s3611_s28 + $0x1778] sm:$0xff]  ;;  %v1944_v55 = vmul.f32 %v3618_v1, %v919_v50 }
 0x302   : > { %2936 = vst [vmem:[%s3630_s21 + $0x1670] sm:$0xff] %v1912_v54  ;;  %v921_v54 = vld [vmem:[%s3611_s28 + $0x1780] sm:$0xff]  ;;  %v1945_v57 = vmul.f32 %v3618_v1, %v920_v52 }
 0x303   : > { %2937 = vst [vmem:[%s3630_s21 + $0x1678] sm:$0xff] %v1913_v56  ;;  %v922_v56 = vld [vmem:[%s3611_s28 + $0x1788] sm:$0xff]  ;;  %v1946_v59 = vmul.f32 %v3618_v1, %v921_v54 }
 0x304   : > { %2938 = vst [vmem:[%s3630_s21 + $0x1680] sm:$0xff] %v1914_v58  ;;  %v923_v58 = vld [vmem:[%s3611_s28 + $0x1790] sm:$0xff]  ;;  %v1947_v61 = vmul.f32 %v3618_v1, %v922_v56 }
 0x305   : > { %2939 = vst [vmem:[%s3630_s21 + $0x1688] sm:$0xff] %v1915_v60  ;;  %v924_v60 = vld [vmem:[%s3611_s28 + $0x1798] sm:$0xff]  ;;  %v1948_v63 = vmul.f32 %v3618_v1, %v923_v58 }
 0x306   : > { %2940 = vst [vmem:[%s3630_s21 + $0x1690] sm:$0xff] %v1916_v62  ;;  %v925_v62 = vld [vmem:[%s3611_s28 + $0x17a0] sm:$0xff]  ;;  %v1949_v2 = vmul.f32 %v3618_v1, %v924_v60 }
 0x307   : > { %2941 = vst [vmem:[%s3630_s21 + $0x1698] sm:$0xff] %v1917_v0  ;;  %v926_v0 = vld [vmem:[%s3611_s28 + $0x17a8] sm:$0xff]  ;;  %v1950_v4 = vmul.f32 %v3618_v1, %v925_v62 }
 0x308   : > { %2942 = vst [vmem:[%s3630_s21 + $0x16a0] sm:$0xff] %v1918_v3  ;;  %v927_v3 = vld [vmem:[%s3611_s28 + $0x17b0] sm:$0xff]  ;;  %v1951_v6 = vmul.f32 %v3618_v1, %v926_v0 }
 0x309   : > { %2943 = vst [vmem:[%s3630_s21 + $0x16a8] sm:$0xff] %v1919_v5  ;;  %v928_v5 = vld [vmem:[%s3611_s28 + $0x17b8] sm:$0xff]  ;;  %v1952_v8 = vmul.f32 %v3618_v1, %v927_v3 }
 0x30a   : > { %2944 = vst [vmem:[%s3630_s21 + $0x16b0] sm:$0xff] %v1920_v7  ;;  %v929_v7 = vld [vmem:[%s3611_s28 + $0x17c0] sm:$0xff]  ;;  %v1953_v10 = vmul.f32 %v3618_v1, %v928_v5 }
 0x30b   : > { %2945 = vst [vmem:[%s3630_s21 + $0x16b8] sm:$0xff] %v1921_v9  ;;  %v930_v9 = vld [vmem:[%s3611_s28 + $0x17c8] sm:$0xff]  ;;  %v1954_v12 = vmul.f32 %v3618_v1, %v929_v7 }
 0x30c   : > { %2946 = vst [vmem:[%s3630_s21 + $0x16c0] sm:$0xff] %v1922_v11  ;;  %v931_v11 = vld [vmem:[%s3611_s28 + $0x17d0] sm:$0xff]  ;;  %v1955_v14 = vmul.f32 %v3618_v1, %v930_v9 }
 0x30d   : > { %2947 = vst [vmem:[%s3630_s21 + $0x16c8] sm:$0xff] %v1923_v13  ;;  %v932_v13 = vld [vmem:[%s3611_s28 + $0x17d8] sm:$0xff]  ;;  %v1956_v16 = vmul.f32 %v3618_v1, %v931_v11 }
 0x30e   : > { %2948 = vst [vmem:[%s3630_s21 + $0x16d0] sm:$0xff] %v1924_v15  ;;  %v933_v15 = vld [vmem:[%s3611_s28 + $0x17e0] sm:$0xff]  ;;  %v1957_v18 = vmul.f32 %v3618_v1, %v932_v13 }
 0x30f   : > { %2949 = vst [vmem:[%s3630_s21 + $0x16d8] sm:$0xff] %v1925_v17  ;;  %v934_v17 = vld [vmem:[%s3611_s28 + $0x17e8] sm:$0xff]  ;;  %v1958_v20 = vmul.f32 %v3618_v1, %v933_v15 }
 0x310   : > { %2950 = vst [vmem:[%s3630_s21 + $0x16e0] sm:$0xff] %v1926_v19  ;;  %v935_v19 = vld [vmem:[%s3611_s28 + $0x17f0] sm:$0xff]  ;;  %v1959_v22 = vmul.f32 %v3618_v1, %v934_v17 }
 0x311   : > { %2951 = vst [vmem:[%s3630_s21 + $0x16e8] sm:$0xff] %v1927_v21  ;;  %v936_v21 = vld [vmem:[%s3611_s28 + $0x17f8] sm:$0xff]  ;;  %v1960_v24 = vmul.f32 %v3618_v1, %v935_v19 }
 0x312   : > { %2952 = vst [vmem:[%s3630_s21 + $0x16f0] sm:$0xff] %v1928_v23  ;;  %v937_v23 = vld [vmem:[%s3611_s28 + $0x1800] sm:$0xff]  ;;  %v1961_v26 = vmul.f32 %v3618_v1, %v936_v21 }
 0x313   : > { %2953 = vst [vmem:[%s3630_s21 + $0x16f8] sm:$0xff] %v1929_v25  ;;  %v938_v25 = vld [vmem:[%s3611_s28 + $0x1808] sm:$0xff]  ;;  %v1962_v28 = vmul.f32 %v3618_v1, %v937_v23 }
 0x314   : > { %2954 = vst [vmem:[%s3630_s21 + $0x1700] sm:$0xff] %v1930_v27  ;;  %v939_v27 = vld [vmem:[%s3611_s28 + $0x1810] sm:$0xff]  ;;  %v1963_v30 = vmul.f32 %v3618_v1, %v938_v25 }
 0x315   : > { %2955 = vst [vmem:[%s3630_s21 + $0x1708] sm:$0xff] %v1931_v29  ;;  %v940_v29 = vld [vmem:[%s3611_s28 + $0x1818] sm:$0xff]  ;;  %v1964_v32 = vmul.f32 %v3618_v1, %v939_v27 }
 0x316   : > { %2956 = vst [vmem:[%s3630_s21 + $0x1710] sm:$0xff] %v1932_v31  ;;  %v941_v31 = vld [vmem:[%s3611_s28 + $0x1820] sm:$0xff]  ;;  %v1965_v34 = vmul.f32 %v3618_v1, %v940_v29 }
 0x317   : > { %2957 = vst [vmem:[%s3630_s21 + $0x1718] sm:$0xff] %v1933_v33  ;;  %v942_v33 = vld [vmem:[%s3611_s28 + $0x1828] sm:$0xff]  ;;  %v1966_v36 = vmul.f32 %v3618_v1, %v941_v31 }
 0x318   : > { %2958 = vst [vmem:[%s3630_s21 + $0x1720] sm:$0xff] %v1934_v35  ;;  %v943_v35 = vld [vmem:[%s3611_s28 + $0x1830] sm:$0xff]  ;;  %v1967_v38 = vmul.f32 %v3618_v1, %v942_v33 }
 0x319   : > { %2959 = vst [vmem:[%s3630_s21 + $0x1728] sm:$0xff] %v1935_v37  ;;  %v944_v37 = vld [vmem:[%s3611_s28 + $0x1838] sm:$0xff]  ;;  %v1968_v40 = vmul.f32 %v3618_v1, %v943_v35 }
 0x31a   : > { %2960 = vst [vmem:[%s3630_s21 + $0x1730] sm:$0xff] %v1936_v39  ;;  %v945_v39 = vld [vmem:[%s3611_s28 + $0x1840] sm:$0xff]  ;;  %v1969_v42 = vmul.f32 %v3618_v1, %v944_v37 }
 0x31b   : > { %2961 = vst [vmem:[%s3630_s21 + $0x1738] sm:$0xff] %v1937_v41  ;;  %v946_v41 = vld [vmem:[%s3611_s28 + $0x1848] sm:$0xff]  ;;  %v1970_v44 = vmul.f32 %v3618_v1, %v945_v39 }
 0x31c   : > { %2962 = vst [vmem:[%s3630_s21 + $0x1740] sm:$0xff] %v1938_v43  ;;  %v947_v43 = vld [vmem:[%s3611_s28 + $0x1850] sm:$0xff]  ;;  %v1971_v46 = vmul.f32 %v3618_v1, %v946_v41 }
 0x31d   : > { %2963 = vst [vmem:[%s3630_s21 + $0x1748] sm:$0xff] %v1939_v45  ;;  %v948_v45 = vld [vmem:[%s3611_s28 + $0x1858] sm:$0xff]  ;;  %v1972_v48 = vmul.f32 %v3618_v1, %v947_v43 }
 0x31e   : > { %2964 = vst [vmem:[%s3630_s21 + $0x1750] sm:$0xff] %v1940_v47  ;;  %v949_v47 = vld [vmem:[%s3611_s28 + $0x1860] sm:$0xff]  ;;  %v1973_v50 = vmul.f32 %v3618_v1, %v948_v45 }
 0x31f   : > { %2965 = vst [vmem:[%s3630_s21 + $0x1758] sm:$0xff] %v1941_v49  ;;  %v950_v49 = vld [vmem:[%s3611_s28 + $0x1868] sm:$0xff]  ;;  %v1974_v52 = vmul.f32 %v3618_v1, %v949_v47 }
 0x320   : > { %2966 = vst [vmem:[%s3630_s21 + $0x1760] sm:$0xff] %v1942_v51  ;;  %v951_v51 = vld [vmem:[%s3611_s28 + $0x1870] sm:$0xff]  ;;  %v1975_v54 = vmul.f32 %v3618_v1, %v950_v49 }
 0x321   : > { %2967 = vst [vmem:[%s3630_s21 + $0x1768] sm:$0xff] %v1943_v53  ;;  %v952_v53 = vld [vmem:[%s3611_s28 + $0x1878] sm:$0xff]  ;;  %v1976_v56 = vmul.f32 %v3618_v1, %v951_v51 }
 0x322   : > { %2968 = vst [vmem:[%s3630_s21 + $0x1770] sm:$0xff] %v1944_v55  ;;  %v953_v55 = vld [vmem:[%s3611_s28 + $0x1880] sm:$0xff]  ;;  %v1977_v58 = vmul.f32 %v3618_v1, %v952_v53 }
 0x323   : > { %2969 = vst [vmem:[%s3630_s21 + $0x1778] sm:$0xff] %v1945_v57  ;;  %v954_v57 = vld [vmem:[%s3611_s28 + $0x1888] sm:$0xff]  ;;  %v1978_v60 = vmul.f32 %v3618_v1, %v953_v55 }
 0x324   : > { %2970 = vst [vmem:[%s3630_s21 + $0x1780] sm:$0xff] %v1946_v59  ;;  %v955_v59 = vld [vmem:[%s3611_s28 + $0x1890] sm:$0xff]  ;;  %v1979_v62 = vmul.f32 %v3618_v1, %v954_v57 }
 0x325   : > { %2971 = vst [vmem:[%s3630_s21 + $0x1788] sm:$0xff] %v1947_v61  ;;  %v956_v61 = vld [vmem:[%s3611_s28 + $0x1898] sm:$0xff]  ;;  %v1980_v0 = vmul.f32 %v3618_v1, %v955_v59 }
 0x326   : > { %2972 = vst [vmem:[%s3630_s21 + $0x1790] sm:$0xff] %v1948_v63  ;;  %v957_v63 = vld [vmem:[%s3611_s28 + $0x18a0] sm:$0xff]  ;;  %v1981_v3 = vmul.f32 %v3618_v1, %v956_v61 }
 0x327   : > { %2973 = vst [vmem:[%s3630_s21 + $0x1798] sm:$0xff] %v1949_v2  ;;  %v958_v2 = vld [vmem:[%s3611_s28 + $0x18a8] sm:$0xff]  ;;  %v1982_v5 = vmul.f32 %v3618_v1, %v957_v63 }
 0x328   : > { %2974 = vst [vmem:[%s3630_s21 + $0x17a0] sm:$0xff] %v1950_v4  ;;  %v959_v4 = vld [vmem:[%s3611_s28 + $0x18b0] sm:$0xff]  ;;  %v1983_v7 = vmul.f32 %v3618_v1, %v958_v2 }
 0x329   : > { %2975 = vst [vmem:[%s3630_s21 + $0x17a8] sm:$0xff] %v1951_v6  ;;  %v960_v6 = vld [vmem:[%s3611_s28 + $0x18b8] sm:$0xff]  ;;  %v1984_v9 = vmul.f32 %v3618_v1, %v959_v4 }
 0x32a   : > { %2976 = vst [vmem:[%s3630_s21 + $0x17b0] sm:$0xff] %v1952_v8  ;;  %v961_v8 = vld [vmem:[%s3611_s28 + $0x18c0] sm:$0xff]  ;;  %v1985_v11 = vmul.f32 %v3618_v1, %v960_v6 }
 0x32b   : > { %2977 = vst [vmem:[%s3630_s21 + $0x17b8] sm:$0xff] %v1953_v10  ;;  %v962_v10 = vld [vmem:[%s3611_s28 + $0x18c8] sm:$0xff]  ;;  %v1986_v13 = vmul.f32 %v3618_v1, %v961_v8 }
 0x32c   : > { %2978 = vst [vmem:[%s3630_s21 + $0x17c0] sm:$0xff] %v1954_v12  ;;  %v963_v12 = vld [vmem:[%s3611_s28 + $0x18d0] sm:$0xff]  ;;  %v1987_v15 = vmul.f32 %v3618_v1, %v962_v10 }
 0x32d   : > { %2979 = vst [vmem:[%s3630_s21 + $0x17c8] sm:$0xff] %v1955_v14  ;;  %v964_v14 = vld [vmem:[%s3611_s28 + $0x18d8] sm:$0xff]  ;;  %v1988_v17 = vmul.f32 %v3618_v1, %v963_v12 }
 0x32e   : > { %2980 = vst [vmem:[%s3630_s21 + $0x17d0] sm:$0xff] %v1956_v16  ;;  %v965_v16 = vld [vmem:[%s3611_s28 + $0x18e0] sm:$0xff]  ;;  %v1989_v19 = vmul.f32 %v3618_v1, %v964_v14 }
 0x32f   : > { %2981 = vst [vmem:[%s3630_s21 + $0x17d8] sm:$0xff] %v1957_v18  ;;  %v966_v18 = vld [vmem:[%s3611_s28 + $0x18e8] sm:$0xff]  ;;  %v1990_v21 = vmul.f32 %v3618_v1, %v965_v16 }
 0x330   : > { %2982 = vst [vmem:[%s3630_s21 + $0x17e0] sm:$0xff] %v1958_v20  ;;  %v967_v20 = vld [vmem:[%s3611_s28 + $0x18f0] sm:$0xff]  ;;  %v1991_v23 = vmul.f32 %v3618_v1, %v966_v18 }
 0x331   : > { %2983 = vst [vmem:[%s3630_s21 + $0x17e8] sm:$0xff] %v1959_v22  ;;  %v968_v22 = vld [vmem:[%s3611_s28 + $0x18f8] sm:$0xff]  ;;  %v1992_v25 = vmul.f32 %v3618_v1, %v967_v20 }
 0x332   : > { %2984 = vst [vmem:[%s3630_s21 + $0x17f0] sm:$0xff] %v1960_v24  ;;  %v969_v24 = vld [vmem:[%s3611_s28 + $0x1900] sm:$0xff]  ;;  %v1993_v27 = vmul.f32 %v3618_v1, %v968_v22 }
 0x333   : > { %2985 = vst [vmem:[%s3630_s21 + $0x17f8] sm:$0xff] %v1961_v26  ;;  %v970_v26 = vld [vmem:[%s3611_s28 + $0x1908] sm:$0xff]  ;;  %v1994_v29 = vmul.f32 %v3618_v1, %v969_v24 }
 0x334   : > { %2986 = vst [vmem:[%s3630_s21 + $0x1800] sm:$0xff] %v1962_v28  ;;  %v971_v28 = vld [vmem:[%s3611_s28 + $0x1910] sm:$0xff]  ;;  %v1995_v31 = vmul.f32 %v3618_v1, %v970_v26 }
 0x335   : > { %2987 = vst [vmem:[%s3630_s21 + $0x1808] sm:$0xff] %v1963_v30  ;;  %v972_v30 = vld [vmem:[%s3611_s28 + $0x1918] sm:$0xff]  ;;  %v1996_v33 = vmul.f32 %v3618_v1, %v971_v28 }
 0x336   : > { %2988 = vst [vmem:[%s3630_s21 + $0x1810] sm:$0xff] %v1964_v32  ;;  %v973_v32 = vld [vmem:[%s3611_s28 + $0x1920] sm:$0xff]  ;;  %v1997_v35 = vmul.f32 %v3618_v1, %v972_v30 }
 0x337   : > { %2989 = vst [vmem:[%s3630_s21 + $0x1818] sm:$0xff] %v1965_v34  ;;  %v974_v34 = vld [vmem:[%s3611_s28 + $0x1928] sm:$0xff]  ;;  %v1998_v37 = vmul.f32 %v3618_v1, %v973_v32 }
 0x338   : > { %2990 = vst [vmem:[%s3630_s21 + $0x1820] sm:$0xff] %v1966_v36  ;;  %v975_v36 = vld [vmem:[%s3611_s28 + $0x1930] sm:$0xff]  ;;  %v1999_v39 = vmul.f32 %v3618_v1, %v974_v34 }
 0x339   : > { %2991 = vst [vmem:[%s3630_s21 + $0x1828] sm:$0xff] %v1967_v38  ;;  %v976_v38 = vld [vmem:[%s3611_s28 + $0x1938] sm:$0xff]  ;;  %v2000_v41 = vmul.f32 %v3618_v1, %v975_v36 }
 0x33a   : > { %2992 = vst [vmem:[%s3630_s21 + $0x1830] sm:$0xff] %v1968_v40  ;;  %v977_v40 = vld [vmem:[%s3611_s28 + $0x1940] sm:$0xff]  ;;  %v2001_v43 = vmul.f32 %v3618_v1, %v976_v38 }
 0x33b   : > { %2993 = vst [vmem:[%s3630_s21 + $0x1838] sm:$0xff] %v1969_v42  ;;  %v978_v42 = vld [vmem:[%s3611_s28 + $0x1948] sm:$0xff]  ;;  %v2002_v45 = vmul.f32 %v3618_v1, %v977_v40 }
 0x33c   : > { %2994 = vst [vmem:[%s3630_s21 + $0x1840] sm:$0xff] %v1970_v44  ;;  %v979_v44 = vld [vmem:[%s3611_s28 + $0x1950] sm:$0xff]  ;;  %v2003_v47 = vmul.f32 %v3618_v1, %v978_v42 }
 0x33d   : > { %2995 = vst [vmem:[%s3630_s21 + $0x1848] sm:$0xff] %v1971_v46  ;;  %v980_v46 = vld [vmem:[%s3611_s28 + $0x1958] sm:$0xff]  ;;  %v2004_v49 = vmul.f32 %v3618_v1, %v979_v44 }
 0x33e   : > { %2996 = vst [vmem:[%s3630_s21 + $0x1850] sm:$0xff] %v1972_v48  ;;  %v981_v48 = vld [vmem:[%s3611_s28 + $0x1960] sm:$0xff]  ;;  %v2005_v51 = vmul.f32 %v3618_v1, %v980_v46 }
 0x33f   : > { %2997 = vst [vmem:[%s3630_s21 + $0x1858] sm:$0xff] %v1973_v50  ;;  %v982_v50 = vld [vmem:[%s3611_s28 + $0x1968] sm:$0xff]  ;;  %v2006_v53 = vmul.f32 %v3618_v1, %v981_v48 }
 0x340   : > { %2998 = vst [vmem:[%s3630_s21 + $0x1860] sm:$0xff] %v1974_v52  ;;  %v983_v52 = vld [vmem:[%s3611_s28 + $0x1970] sm:$0xff]  ;;  %v2007_v55 = vmul.f32 %v3618_v1, %v982_v50 }
 0x341   : > { %2999 = vst [vmem:[%s3630_s21 + $0x1868] sm:$0xff] %v1975_v54  ;;  %v984_v54 = vld [vmem:[%s3611_s28 + $0x1978] sm:$0xff]  ;;  %v2008_v57 = vmul.f32 %v3618_v1, %v983_v52 }
 0x342   : > { %3000 = vst [vmem:[%s3630_s21 + $0x1870] sm:$0xff] %v1976_v56  ;;  %v985_v56 = vld [vmem:[%s3611_s28 + $0x1980] sm:$0xff]  ;;  %v2009_v59 = vmul.f32 %v3618_v1, %v984_v54 }
 0x343   : > { %3001 = vst [vmem:[%s3630_s21 + $0x1878] sm:$0xff] %v1977_v58  ;;  %v986_v58 = vld [vmem:[%s3611_s28 + $0x1988] sm:$0xff]  ;;  %v2010_v61 = vmul.f32 %v3618_v1, %v985_v56 }
 0x344   : > { %3002 = vst [vmem:[%s3630_s21 + $0x1880] sm:$0xff] %v1978_v60  ;;  %v987_v60 = vld [vmem:[%s3611_s28 + $0x1990] sm:$0xff]  ;;  %v2011_v63 = vmul.f32 %v3618_v1, %v986_v58 }
 0x345   : > { %3003 = vst [vmem:[%s3630_s21 + $0x1888] sm:$0xff] %v1979_v62  ;;  %v988_v62 = vld [vmem:[%s3611_s28 + $0x1998] sm:$0xff]  ;;  %v2012_v2 = vmul.f32 %v3618_v1, %v987_v60 }
 0x346   : > { %3004 = vst [vmem:[%s3630_s21 + $0x1890] sm:$0xff] %v1980_v0  ;;  %v989_v0 = vld [vmem:[%s3611_s28 + $0x19a0] sm:$0xff]  ;;  %v2013_v4 = vmul.f32 %v3618_v1, %v988_v62 }
 0x347   : > { %3005 = vst [vmem:[%s3630_s21 + $0x1898] sm:$0xff] %v1981_v3  ;;  %v990_v3 = vld [vmem:[%s3611_s28 + $0x19a8] sm:$0xff]  ;;  %v2014_v6 = vmul.f32 %v3618_v1, %v989_v0 }
 0x348   : > { %3006 = vst [vmem:[%s3630_s21 + $0x18a0] sm:$0xff] %v1982_v5  ;;  %v991_v5 = vld [vmem:[%s3611_s28 + $0x19b0] sm:$0xff]  ;;  %v2015_v8 = vmul.f32 %v3618_v1, %v990_v3 }
 0x349   : > { %3007 = vst [vmem:[%s3630_s21 + $0x18a8] sm:$0xff] %v1983_v7  ;;  %v992_v7 = vld [vmem:[%s3611_s28 + $0x19b8] sm:$0xff]  ;;  %v2016_v10 = vmul.f32 %v3618_v1, %v991_v5 }
 0x34a   : > { %3008 = vst [vmem:[%s3630_s21 + $0x18b0] sm:$0xff] %v1984_v9  ;;  %v993_v9 = vld [vmem:[%s3611_s28 + $0x19c0] sm:$0xff]  ;;  %v2017_v12 = vmul.f32 %v3618_v1, %v992_v7 }
 0x34b   : > { %3009 = vst [vmem:[%s3630_s21 + $0x18b8] sm:$0xff] %v1985_v11  ;;  %v994_v11 = vld [vmem:[%s3611_s28 + $0x19c8] sm:$0xff]  ;;  %v2018_v14 = vmul.f32 %v3618_v1, %v993_v9 }
 0x34c   : > { %3010 = vst [vmem:[%s3630_s21 + $0x18c0] sm:$0xff] %v1986_v13  ;;  %v995_v13 = vld [vmem:[%s3611_s28 + $0x19d0] sm:$0xff]  ;;  %v2019_v16 = vmul.f32 %v3618_v1, %v994_v11 }
 0x34d   : > { %3011 = vst [vmem:[%s3630_s21 + $0x18c8] sm:$0xff] %v1987_v15  ;;  %v996_v15 = vld [vmem:[%s3611_s28 + $0x19d8] sm:$0xff]  ;;  %v2020_v18 = vmul.f32 %v3618_v1, %v995_v13 }
 0x34e   : > { %3012 = vst [vmem:[%s3630_s21 + $0x18d0] sm:$0xff] %v1988_v17  ;;  %v997_v17 = vld [vmem:[%s3611_s28 + $0x19e0] sm:$0xff]  ;;  %v2021_v20 = vmul.f32 %v3618_v1, %v996_v15 }
 0x34f   : > { %3013 = vst [vmem:[%s3630_s21 + $0x18d8] sm:$0xff] %v1989_v19  ;;  %v998_v19 = vld [vmem:[%s3611_s28 + $0x19e8] sm:$0xff]  ;;  %v2022_v22 = vmul.f32 %v3618_v1, %v997_v17 }
 0x350   : > { %3014 = vst [vmem:[%s3630_s21 + $0x18e0] sm:$0xff] %v1990_v21  ;;  %v999_v21 = vld [vmem:[%s3611_s28 + $0x19f0] sm:$0xff]  ;;  %v2023_v24 = vmul.f32 %v3618_v1, %v998_v19 }
 0x351   : > { %3015 = vst [vmem:[%s3630_s21 + $0x18e8] sm:$0xff] %v1991_v23  ;;  %v1000_v23 = vld [vmem:[%s3611_s28 + $0x19f8] sm:$0xff]  ;;  %v2024_v26 = vmul.f32 %v3618_v1, %v999_v21 }
 0x352   : > { %3016 = vst [vmem:[%s3630_s21 + $0x18f0] sm:$0xff] %v1992_v25  ;;  %v1001_v25 = vld [vmem:[%s3611_s28 + $0x1a00] sm:$0xff]  ;;  %v2025_v28 = vmul.f32 %v3618_v1, %v1000_v23 }
 0x353   : > { %3017 = vst [vmem:[%s3630_s21 + $0x18f8] sm:$0xff] %v1993_v27  ;;  %v1002_v27 = vld [vmem:[%s3611_s28 + $0x1a08] sm:$0xff]  ;;  %v2026_v30 = vmul.f32 %v3618_v1, %v1001_v25 }
 0x354   : > { %3018 = vst [vmem:[%s3630_s21 + $0x1900] sm:$0xff] %v1994_v29  ;;  %v1003_v29 = vld [vmem:[%s3611_s28 + $0x1a10] sm:$0xff]  ;;  %v2027_v32 = vmul.f32 %v3618_v1, %v1002_v27 }
 0x355   : > { %3019 = vst [vmem:[%s3630_s21 + $0x1908] sm:$0xff] %v1995_v31  ;;  %v1004_v31 = vld [vmem:[%s3611_s28 + $0x1a18] sm:$0xff]  ;;  %v2028_v34 = vmul.f32 %v3618_v1, %v1003_v29 }
 0x356   : > { %3020 = vst [vmem:[%s3630_s21 + $0x1910] sm:$0xff] %v1996_v33  ;;  %v1005_v33 = vld [vmem:[%s3611_s28 + $0x1a20] sm:$0xff]  ;;  %v2029_v36 = vmul.f32 %v3618_v1, %v1004_v31 }
 0x357   : > { %3021 = vst [vmem:[%s3630_s21 + $0x1918] sm:$0xff] %v1997_v35  ;;  %v1006_v35 = vld [vmem:[%s3611_s28 + $0x1a28] sm:$0xff]  ;;  %v2030_v38 = vmul.f32 %v3618_v1, %v1005_v33 }
 0x358   : > { %3022 = vst [vmem:[%s3630_s21 + $0x1920] sm:$0xff] %v1998_v37  ;;  %v1007_v37 = vld [vmem:[%s3611_s28 + $0x1a30] sm:$0xff]  ;;  %v2031_v40 = vmul.f32 %v3618_v1, %v1006_v35 }
 0x359   : > { %3023 = vst [vmem:[%s3630_s21 + $0x1928] sm:$0xff] %v1999_v39  ;;  %v1008_v39 = vld [vmem:[%s3611_s28 + $0x1a38] sm:$0xff]  ;;  %v2032_v42 = vmul.f32 %v3618_v1, %v1007_v37 }
 0x35a   : > { %3024 = vst [vmem:[%s3630_s21 + $0x1930] sm:$0xff] %v2000_v41  ;;  %v1009_v41 = vld [vmem:[%s3611_s28 + $0x1a40] sm:$0xff]  ;;  %v2033_v44 = vmul.f32 %v3618_v1, %v1008_v39 }
 0x35b   : > { %3025 = vst [vmem:[%s3630_s21 + $0x1938] sm:$0xff] %v2001_v43  ;;  %v1010_v43 = vld [vmem:[%s3611_s28 + $0x1a48] sm:$0xff]  ;;  %v2034_v46 = vmul.f32 %v3618_v1, %v1009_v41 }
 0x35c   : > { %3026 = vst [vmem:[%s3630_s21 + $0x1940] sm:$0xff] %v2002_v45  ;;  %v1011_v45 = vld [vmem:[%s3611_s28 + $0x1a50] sm:$0xff]  ;;  %v2035_v48 = vmul.f32 %v3618_v1, %v1010_v43 }
 0x35d   : > { %3027 = vst [vmem:[%s3630_s21 + $0x1948] sm:$0xff] %v2003_v47  ;;  %v1012_v47 = vld [vmem:[%s3611_s28 + $0x1a58] sm:$0xff]  ;;  %v2036_v50 = vmul.f32 %v3618_v1, %v1011_v45 }
 0x35e   : > { %3028 = vst [vmem:[%s3630_s21 + $0x1950] sm:$0xff] %v2004_v49  ;;  %v1013_v49 = vld [vmem:[%s3611_s28 + $0x1a60] sm:$0xff]  ;;  %v2037_v52 = vmul.f32 %v3618_v1, %v1012_v47 }
 0x35f   : > { %3029 = vst [vmem:[%s3630_s21 + $0x1958] sm:$0xff] %v2005_v51  ;;  %v1014_v51 = vld [vmem:[%s3611_s28 + $0x1a68] sm:$0xff]  ;;  %v2038_v54 = vmul.f32 %v3618_v1, %v1013_v49 }
 0x360   : > { %3030 = vst [vmem:[%s3630_s21 + $0x1960] sm:$0xff] %v2006_v53  ;;  %v1015_v53 = vld [vmem:[%s3611_s28 + $0x1a70] sm:$0xff]  ;;  %v2039_v56 = vmul.f32 %v3618_v1, %v1014_v51 }
 0x361   : > { %3031 = vst [vmem:[%s3630_s21 + $0x1968] sm:$0xff] %v2007_v55  ;;  %v1016_v55 = vld [vmem:[%s3611_s28 + $0x1a78] sm:$0xff]  ;;  %v2040_v58 = vmul.f32 %v3618_v1, %v1015_v53 }
 0x362   : > { %3032 = vst [vmem:[%s3630_s21 + $0x1970] sm:$0xff] %v2008_v57  ;;  %v1017_v57 = vld [vmem:[%s3611_s28 + $0x1a80] sm:$0xff]  ;;  %v2041_v60 = vmul.f32 %v3618_v1, %v1016_v55 }
 0x363   : > { %3033 = vst [vmem:[%s3630_s21 + $0x1978] sm:$0xff] %v2009_v59  ;;  %v1018_v59 = vld [vmem:[%s3611_s28 + $0x1a88] sm:$0xff]  ;;  %v2042_v62 = vmul.f32 %v3618_v1, %v1017_v57 }
 0x364   : > { %3034 = vst [vmem:[%s3630_s21 + $0x1980] sm:$0xff] %v2010_v61  ;;  %v1019_v61 = vld [vmem:[%s3611_s28 + $0x1a90] sm:$0xff]  ;;  %v2043_v0 = vmul.f32 %v3618_v1, %v1018_v59 }
 0x365   : > { %3035 = vst [vmem:[%s3630_s21 + $0x1988] sm:$0xff] %v2011_v63  ;;  %v1020_v63 = vld [vmem:[%s3611_s28 + $0x1a98] sm:$0xff]  ;;  %v2044_v3 = vmul.f32 %v3618_v1, %v1019_v61 }
 0x366   : > { %3036 = vst [vmem:[%s3630_s21 + $0x1990] sm:$0xff] %v2012_v2  ;;  %v1021_v2 = vld [vmem:[%s3611_s28 + $0x1aa0] sm:$0xff]  ;;  %v2045_v5 = vmul.f32 %v3618_v1, %v1020_v63 }
 0x367   : > { %3037 = vst [vmem:[%s3630_s21 + $0x1998] sm:$0xff] %v2013_v4  ;;  %v1022_v4 = vld [vmem:[%s3611_s28 + $0x1aa8] sm:$0xff]  ;;  %v2046_v7 = vmul.f32 %v3618_v1, %v1021_v2 }
 0x368   : > { %3038 = vst [vmem:[%s3630_s21 + $0x19a0] sm:$0xff] %v2014_v6  ;;  %v1023_v6 = vld [vmem:[%s3611_s28 + $0x1ab0] sm:$0xff]  ;;  %v2047_v9 = vmul.f32 %v3618_v1, %v1022_v4 }
 0x369   : > { %3039 = vst [vmem:[%s3630_s21 + $0x19a8] sm:$0xff] %v2015_v8  ;;  %v1024_v8 = vld [vmem:[%s3611_s28 + $0x1ab8] sm:$0xff]  ;;  %v2048_v11 = vmul.f32 %v3618_v1, %v1023_v6 }
 0x36a   : > { %3040 = vst [vmem:[%s3630_s21 + $0x19b0] sm:$0xff] %v2016_v10  ;;  %v1025_v10 = vld [vmem:[%s3611_s28 + $0x1ac0] sm:$0xff]  ;;  %v2049_v13 = vmul.f32 %v3618_v1, %v1024_v8 }
 0x36b   : > { %3041 = vst [vmem:[%s3630_s21 + $0x19b8] sm:$0xff] %v2017_v12  ;;  %v1026_v12 = vld [vmem:[%s3611_s28 + $0x1ac8] sm:$0xff]  ;;  %v2050_v15 = vmul.f32 %v3618_v1, %v1025_v10 }
 0x36c   : > { %3042 = vst [vmem:[%s3630_s21 + $0x19c0] sm:$0xff] %v2018_v14  ;;  %v1027_v14 = vld [vmem:[%s3611_s28 + $0x1ad0] sm:$0xff]  ;;  %v2051_v17 = vmul.f32 %v3618_v1, %v1026_v12 }
 0x36d   : > { %3043 = vst [vmem:[%s3630_s21 + $0x19c8] sm:$0xff] %v2019_v16  ;;  %v1028_v16 = vld [vmem:[%s3611_s28 + $0x1ad8] sm:$0xff]  ;;  %v2052_v19 = vmul.f32 %v3618_v1, %v1027_v14 }
 0x36e   : > { %3044 = vst [vmem:[%s3630_s21 + $0x19d0] sm:$0xff] %v2020_v18  ;;  %v1029_v18 = vld [vmem:[%s3611_s28 + $0x1ae0] sm:$0xff]  ;;  %v2053_v21 = vmul.f32 %v3618_v1, %v1028_v16 }
 0x36f   : > { %3045 = vst [vmem:[%s3630_s21 + $0x19d8] sm:$0xff] %v2021_v20  ;;  %v1030_v20 = vld [vmem:[%s3611_s28 + $0x1ae8] sm:$0xff]  ;;  %v2054_v23 = vmul.f32 %v3618_v1, %v1029_v18 }
 0x370   : > { %3046 = vst [vmem:[%s3630_s21 + $0x19e0] sm:$0xff] %v2022_v22  ;;  %v1031_v22 = vld [vmem:[%s3611_s28 + $0x1af0] sm:$0xff]  ;;  %v2055_v25 = vmul.f32 %v3618_v1, %v1030_v20 }
 0x371   : > { %3047 = vst [vmem:[%s3630_s21 + $0x19e8] sm:$0xff] %v2023_v24  ;;  %v1032_v24 = vld [vmem:[%s3611_s28 + $0x1af8] sm:$0xff]  ;;  %v2056_v27 = vmul.f32 %v3618_v1, %v1031_v22 }
 0x372   : > { %3048 = vst [vmem:[%s3630_s21 + $0x19f0] sm:$0xff] %v2024_v26  ;;  %v1033_v26 = vld [vmem:[%s3611_s28 + $0x1b00] sm:$0xff]  ;;  %v2057_v29 = vmul.f32 %v3618_v1, %v1032_v24 }
 0x373   : > { %3049 = vst [vmem:[%s3630_s21 + $0x19f8] sm:$0xff] %v2025_v28  ;;  %v1034_v28 = vld [vmem:[%s3611_s28 + $0x1b08] sm:$0xff]  ;;  %v2058_v31 = vmul.f32 %v3618_v1, %v1033_v26 }
 0x374   : > { %3050 = vst [vmem:[%s3630_s21 + $0x1a00] sm:$0xff] %v2026_v30  ;;  %v1035_v30 = vld [vmem:[%s3611_s28 + $0x1b10] sm:$0xff]  ;;  %v2059_v33 = vmul.f32 %v3618_v1, %v1034_v28 }
 0x375   : > { %3051 = vst [vmem:[%s3630_s21 + $0x1a08] sm:$0xff] %v2027_v32  ;;  %v1036_v32 = vld [vmem:[%s3611_s28 + $0x1b18] sm:$0xff]  ;;  %v2060_v35 = vmul.f32 %v3618_v1, %v1035_v30 }
 0x376   : > { %3052 = vst [vmem:[%s3630_s21 + $0x1a10] sm:$0xff] %v2028_v34  ;;  %v1037_v34 = vld [vmem:[%s3611_s28 + $0x1b20] sm:$0xff]  ;;  %v2061_v37 = vmul.f32 %v3618_v1, %v1036_v32 }
 0x377   : > { %3053 = vst [vmem:[%s3630_s21 + $0x1a18] sm:$0xff] %v2029_v36  ;;  %v1038_v36 = vld [vmem:[%s3611_s28 + $0x1b28] sm:$0xff]  ;;  %v2062_v39 = vmul.f32 %v3618_v1, %v1037_v34 }
 0x378   : > { %3054 = vst [vmem:[%s3630_s21 + $0x1a20] sm:$0xff] %v2030_v38  ;;  %v1039_v38 = vld [vmem:[%s3611_s28 + $0x1b30] sm:$0xff]  ;;  %v2063_v41 = vmul.f32 %v3618_v1, %v1038_v36 }
 0x379   : > { %3055 = vst [vmem:[%s3630_s21 + $0x1a28] sm:$0xff] %v2031_v40  ;;  %v1040_v40 = vld [vmem:[%s3611_s28 + $0x1b38] sm:$0xff]  ;;  %v2064_v43 = vmul.f32 %v3618_v1, %v1039_v38 }
 0x37a   : > { %3056 = vst [vmem:[%s3630_s21 + $0x1a30] sm:$0xff] %v2032_v42  ;;  %v1041_v42 = vld [vmem:[%s3611_s28 + $0x1b40] sm:$0xff]  ;;  %v2065_v45 = vmul.f32 %v3618_v1, %v1040_v40 }
 0x37b   : > { %3057 = vst [vmem:[%s3630_s21 + $0x1a38] sm:$0xff] %v2033_v44  ;;  %v1042_v44 = vld [vmem:[%s3611_s28 + $0x1b48] sm:$0xff]  ;;  %v2066_v47 = vmul.f32 %v3618_v1, %v1041_v42 }
 0x37c   : > { %3058 = vst [vmem:[%s3630_s21 + $0x1a40] sm:$0xff] %v2034_v46  ;;  %v1043_v46 = vld [vmem:[%s3611_s28 + $0x1b50] sm:$0xff]  ;;  %v2067_v49 = vmul.f32 %v3618_v1, %v1042_v44 }
 0x37d   : > { %3059 = vst [vmem:[%s3630_s21 + $0x1a48] sm:$0xff] %v2035_v48  ;;  %v1044_v48 = vld [vmem:[%s3611_s28 + $0x1b58] sm:$0xff]  ;;  %v2068_v51 = vmul.f32 %v3618_v1, %v1043_v46 }
 0x37e   : > { %3060 = vst [vmem:[%s3630_s21 + $0x1a50] sm:$0xff] %v2036_v50  ;;  %v1045_v50 = vld [vmem:[%s3611_s28 + $0x1b60] sm:$0xff]  ;;  %v2069_v53 = vmul.f32 %v3618_v1, %v1044_v48 }
 0x37f   : > { %3061 = vst [vmem:[%s3630_s21 + $0x1a58] sm:$0xff] %v2037_v52  ;;  %v1046_v52 = vld [vmem:[%s3611_s28 + $0x1b68] sm:$0xff]  ;;  %v2070_v55 = vmul.f32 %v3618_v1, %v1045_v50 }
 0x380   : > { %3062 = vst [vmem:[%s3630_s21 + $0x1a60] sm:$0xff] %v2038_v54  ;;  %v1047_v54 = vld [vmem:[%s3611_s28 + $0x1b70] sm:$0xff]  ;;  %v2071_v57 = vmul.f32 %v3618_v1, %v1046_v52 }
 0x381   : > { %3063 = vst [vmem:[%s3630_s21 + $0x1a68] sm:$0xff] %v2039_v56  ;;  %v1048_v56 = vld [vmem:[%s3611_s28 + $0x1b78] sm:$0xff]  ;;  %v2072_v59 = vmul.f32 %v3618_v1, %v1047_v54 }
 0x382   : > { %3064 = vst [vmem:[%s3630_s21 + $0x1a70] sm:$0xff] %v2040_v58  ;;  %v1049_v58 = vld [vmem:[%s3611_s28 + $0x1b80] sm:$0xff]  ;;  %v2073_v61 = vmul.f32 %v3618_v1, %v1048_v56 }
 0x383   : > { %3065 = vst [vmem:[%s3630_s21 + $0x1a78] sm:$0xff] %v2041_v60  ;;  %v1050_v60 = vld [vmem:[%s3611_s28 + $0x1b88] sm:$0xff]  ;;  %v2074_v63 = vmul.f32 %v3618_v1, %v1049_v58 }
 0x384   : > { %3066 = vst [vmem:[%s3630_s21 + $0x1a80] sm:$0xff] %v2042_v62  ;;  %v1051_v62 = vld [vmem:[%s3611_s28 + $0x1b90] sm:$0xff]  ;;  %v2075_v2 = vmul.f32 %v3618_v1, %v1050_v60 }
 0x385   : > { %3067 = vst [vmem:[%s3630_s21 + $0x1a88] sm:$0xff] %v2043_v0  ;;  %v1052_v0 = vld [vmem:[%s3611_s28 + $0x1b98] sm:$0xff]  ;;  %v2076_v4 = vmul.f32 %v3618_v1, %v1051_v62 }
 0x386   : > { %3068 = vst [vmem:[%s3630_s21 + $0x1a90] sm:$0xff] %v2044_v3  ;;  %v1053_v3 = vld [vmem:[%s3611_s28 + $0x1ba0] sm:$0xff]  ;;  %v2077_v6 = vmul.f32 %v3618_v1, %v1052_v0 }
 0x387   : > { %3069 = vst [vmem:[%s3630_s21 + $0x1a98] sm:$0xff] %v2045_v5  ;;  %v1054_v5 = vld [vmem:[%s3611_s28 + $0x1ba8] sm:$0xff]  ;;  %v2078_v8 = vmul.f32 %v3618_v1, %v1053_v3 }
 0x388   : > { %3070 = vst [vmem:[%s3630_s21 + $0x1aa0] sm:$0xff] %v2046_v7  ;;  %v1055_v7 = vld [vmem:[%s3611_s28 + $0x1bb0] sm:$0xff]  ;;  %v2079_v10 = vmul.f32 %v3618_v1, %v1054_v5 }
 0x389   : > { %3071 = vst [vmem:[%s3630_s21 + $0x1aa8] sm:$0xff] %v2047_v9  ;;  %v1056_v9 = vld [vmem:[%s3611_s28 + $0x1bb8] sm:$0xff]  ;;  %v2080_v12 = vmul.f32 %v3618_v1, %v1055_v7 }
 0x38a   : > { %3072 = vst [vmem:[%s3630_s21 + $0x1ab0] sm:$0xff] %v2048_v11  ;;  %v1057_v11 = vld [vmem:[%s3611_s28 + $0x1bc0] sm:$0xff]  ;;  %v2081_v14 = vmul.f32 %v3618_v1, %v1056_v9 }
 0x38b   : > { %3073 = vst [vmem:[%s3630_s21 + $0x1ab8] sm:$0xff] %v2049_v13  ;;  %v1058_v13 = vld [vmem:[%s3611_s28 + $0x1bc8] sm:$0xff]  ;;  %v2082_v16 = vmul.f32 %v3618_v1, %v1057_v11 }
 0x38c   : > { %3074 = vst [vmem:[%s3630_s21 + $0x1ac0] sm:$0xff] %v2050_v15  ;;  %v1059_v15 = vld [vmem:[%s3611_s28 + $0x1bd0] sm:$0xff]  ;;  %v2083_v18 = vmul.f32 %v3618_v1, %v1058_v13 }
 0x38d   : > { %3075 = vst [vmem:[%s3630_s21 + $0x1ac8] sm:$0xff] %v2051_v17  ;;  %v1060_v17 = vld [vmem:[%s3611_s28 + $0x1bd8] sm:$0xff]  ;;  %v2084_v20 = vmul.f32 %v3618_v1, %v1059_v15 }
 0x38e   : > { %3076 = vst [vmem:[%s3630_s21 + $0x1ad0] sm:$0xff] %v2052_v19  ;;  %v1061_v19 = vld [vmem:[%s3611_s28 + $0x1be0] sm:$0xff]  ;;  %v2085_v22 = vmul.f32 %v3618_v1, %v1060_v17 }
 0x38f   : > { %3077 = vst [vmem:[%s3630_s21 + $0x1ad8] sm:$0xff] %v2053_v21  ;;  %v1062_v21 = vld [vmem:[%s3611_s28 + $0x1be8] sm:$0xff]  ;;  %v2086_v24 = vmul.f32 %v3618_v1, %v1061_v19 }
 0x390   : > { %3078 = vst [vmem:[%s3630_s21 + $0x1ae0] sm:$0xff] %v2054_v23  ;;  %v1063_v23 = vld [vmem:[%s3611_s28 + $0x1bf0] sm:$0xff]  ;;  %v2087_v26 = vmul.f32 %v3618_v1, %v1062_v21 }
 0x391   : > { %3079 = vst [vmem:[%s3630_s21 + $0x1ae8] sm:$0xff] %v2055_v25  ;;  %v1064_v25 = vld [vmem:[%s3611_s28 + $0x1bf8] sm:$0xff]  ;;  %v2088_v28 = vmul.f32 %v3618_v1, %v1063_v23 }
 0x392   : > { %3080 = vst [vmem:[%s3630_s21 + $0x1af0] sm:$0xff] %v2056_v27  ;;  %v1065_v27 = vld [vmem:[%s3611_s28 + $0x1c00] sm:$0xff]  ;;  %v2089_v30 = vmul.f32 %v3618_v1, %v1064_v25 }
 0x393   : > { %3081 = vst [vmem:[%s3630_s21 + $0x1af8] sm:$0xff] %v2057_v29  ;;  %v1066_v29 = vld [vmem:[%s3611_s28 + $0x1c08] sm:$0xff]  ;;  %v2090_v32 = vmul.f32 %v3618_v1, %v1065_v27 }
 0x394   : > { %3082 = vst [vmem:[%s3630_s21 + $0x1b00] sm:$0xff] %v2058_v31  ;;  %v1067_v31 = vld [vmem:[%s3611_s28 + $0x1c10] sm:$0xff]  ;;  %v2091_v34 = vmul.f32 %v3618_v1, %v1066_v29 }
 0x395   : > { %3083 = vst [vmem:[%s3630_s21 + $0x1b08] sm:$0xff] %v2059_v33  ;;  %v1068_v33 = vld [vmem:[%s3611_s28 + $0x1c18] sm:$0xff]  ;;  %v2092_v36 = vmul.f32 %v3618_v1, %v1067_v31 }
 0x396   : > { %3084 = vst [vmem:[%s3630_s21 + $0x1b10] sm:$0xff] %v2060_v35  ;;  %v1069_v35 = vld [vmem:[%s3611_s28 + $0x1c20] sm:$0xff]  ;;  %v2093_v38 = vmul.f32 %v3618_v1, %v1068_v33 }
 0x397   : > { %3085 = vst [vmem:[%s3630_s21 + $0x1b18] sm:$0xff] %v2061_v37  ;;  %v1070_v37 = vld [vmem:[%s3611_s28 + $0x1c28] sm:$0xff]  ;;  %v2094_v40 = vmul.f32 %v3618_v1, %v1069_v35 }
 0x398   : > { %3086 = vst [vmem:[%s3630_s21 + $0x1b20] sm:$0xff] %v2062_v39  ;;  %v1071_v39 = vld [vmem:[%s3611_s28 + $0x1c30] sm:$0xff]  ;;  %v2095_v42 = vmul.f32 %v3618_v1, %v1070_v37 }
 0x399   : > { %3087 = vst [vmem:[%s3630_s21 + $0x1b28] sm:$0xff] %v2063_v41  ;;  %v1072_v41 = vld [vmem:[%s3611_s28 + $0x1c38] sm:$0xff]  ;;  %v2096_v44 = vmul.f32 %v3618_v1, %v1071_v39 }
 0x39a   : > { %3088 = vst [vmem:[%s3630_s21 + $0x1b30] sm:$0xff] %v2064_v43  ;;  %v1073_v43 = vld [vmem:[%s3611_s28 + $0x1c40] sm:$0xff]  ;;  %v2097_v46 = vmul.f32 %v3618_v1, %v1072_v41 }
 0x39b   : > { %3089 = vst [vmem:[%s3630_s21 + $0x1b38] sm:$0xff] %v2065_v45  ;;  %v1074_v45 = vld [vmem:[%s3611_s28 + $0x1c48] sm:$0xff]  ;;  %v2098_v48 = vmul.f32 %v3618_v1, %v1073_v43 }
 0x39c   : > { %3090 = vst [vmem:[%s3630_s21 + $0x1b40] sm:$0xff] %v2066_v47  ;;  %v1075_v47 = vld [vmem:[%s3611_s28 + $0x1c50] sm:$0xff]  ;;  %v2099_v50 = vmul.f32 %v3618_v1, %v1074_v45 }
 0x39d   : > { %3091 = vst [vmem:[%s3630_s21 + $0x1b48] sm:$0xff] %v2067_v49  ;;  %v1076_v49 = vld [vmem:[%s3611_s28 + $0x1c58] sm:$0xff]  ;;  %v2100_v52 = vmul.f32 %v3618_v1, %v1075_v47 }
 0x39e   : > { %3092 = vst [vmem:[%s3630_s21 + $0x1b50] sm:$0xff] %v2068_v51  ;;  %v1077_v51 = vld [vmem:[%s3611_s28 + $0x1c60] sm:$0xff]  ;;  %v2101_v54 = vmul.f32 %v3618_v1, %v1076_v49 }
 0x39f   : > { %3093 = vst [vmem:[%s3630_s21 + $0x1b58] sm:$0xff] %v2069_v53  ;;  %v1078_v53 = vld [vmem:[%s3611_s28 + $0x1c68] sm:$0xff]  ;;  %v2102_v56 = vmul.f32 %v3618_v1, %v1077_v51 }
 0x3a0   : > { %3094 = vst [vmem:[%s3630_s21 + $0x1b60] sm:$0xff] %v2070_v55  ;;  %v1079_v55 = vld [vmem:[%s3611_s28 + $0x1c70] sm:$0xff]  ;;  %v2103_v58 = vmul.f32 %v3618_v1, %v1078_v53 }
 0x3a1   : > { %3095 = vst [vmem:[%s3630_s21 + $0x1b68] sm:$0xff] %v2071_v57  ;;  %v1080_v57 = vld [vmem:[%s3611_s28 + $0x1c78] sm:$0xff]  ;;  %v2104_v60 = vmul.f32 %v3618_v1, %v1079_v55 }
 0x3a2   : > { %3096 = vst [vmem:[%s3630_s21 + $0x1b70] sm:$0xff] %v2072_v59  ;;  %v1081_v59 = vld [vmem:[%s3611_s28 + $0x1c80] sm:$0xff]  ;;  %v2105_v62 = vmul.f32 %v3618_v1, %v1080_v57 }
 0x3a3   : > { %3097 = vst [vmem:[%s3630_s21 + $0x1b78] sm:$0xff] %v2073_v61  ;;  %v1082_v61 = vld [vmem:[%s3611_s28 + $0x1c88] sm:$0xff]  ;;  %v2106_v0 = vmul.f32 %v3618_v1, %v1081_v59 }
 0x3a4   : > { %3098 = vst [vmem:[%s3630_s21 + $0x1b80] sm:$0xff] %v2074_v63  ;;  %v1083_v63 = vld [vmem:[%s3611_s28 + $0x1c90] sm:$0xff]  ;;  %v2107_v3 = vmul.f32 %v3618_v1, %v1082_v61 }
 0x3a5   : > { %3099 = vst [vmem:[%s3630_s21 + $0x1b88] sm:$0xff] %v2075_v2  ;;  %v1084_v2 = vld [vmem:[%s3611_s28 + $0x1c98] sm:$0xff]  ;;  %v2108_v5 = vmul.f32 %v3618_v1, %v1083_v63 }
 0x3a6   : > { %3100 = vst [vmem:[%s3630_s21 + $0x1b90] sm:$0xff] %v2076_v4  ;;  %v1085_v4 = vld [vmem:[%s3611_s28 + $0x1ca0] sm:$0xff]  ;;  %v2109_v7 = vmul.f32 %v3618_v1, %v1084_v2 }
 0x3a7   : > { %3101 = vst [vmem:[%s3630_s21 + $0x1b98] sm:$0xff] %v2077_v6  ;;  %v1086_v6 = vld [vmem:[%s3611_s28 + $0x1ca8] sm:$0xff]  ;;  %v2110_v9 = vmul.f32 %v3618_v1, %v1085_v4 }
 0x3a8   : > { %3102 = vst [vmem:[%s3630_s21 + $0x1ba0] sm:$0xff] %v2078_v8  ;;  %v1087_v8 = vld [vmem:[%s3611_s28 + $0x1cb0] sm:$0xff]  ;;  %v2111_v11 = vmul.f32 %v3618_v1, %v1086_v6 }
 0x3a9   : > { %3103 = vst [vmem:[%s3630_s21 + $0x1ba8] sm:$0xff] %v2079_v10  ;;  %v1088_v10 = vld [vmem:[%s3611_s28 + $0x1cb8] sm:$0xff]  ;;  %v2112_v13 = vmul.f32 %v3618_v1, %v1087_v8 }
 0x3aa   : > { %3104 = vst [vmem:[%s3630_s21 + $0x1bb0] sm:$0xff] %v2080_v12  ;;  %v1089_v12 = vld [vmem:[%s3611_s28 + $0x1cc0] sm:$0xff]  ;;  %v2113_v15 = vmul.f32 %v3618_v1, %v1088_v10 }
 0x3ab   : > { %3105 = vst [vmem:[%s3630_s21 + $0x1bb8] sm:$0xff] %v2081_v14  ;;  %v1090_v14 = vld [vmem:[%s3611_s28 + $0x1cc8] sm:$0xff]  ;;  %v2114_v17 = vmul.f32 %v3618_v1, %v1089_v12 }
 0x3ac   : > { %3106 = vst [vmem:[%s3630_s21 + $0x1bc0] sm:$0xff] %v2082_v16  ;;  %v1091_v16 = vld [vmem:[%s3611_s28 + $0x1cd0] sm:$0xff]  ;;  %v2115_v19 = vmul.f32 %v3618_v1, %v1090_v14 }
 0x3ad   : > { %3107 = vst [vmem:[%s3630_s21 + $0x1bc8] sm:$0xff] %v2083_v18  ;;  %v1092_v18 = vld [vmem:[%s3611_s28 + $0x1cd8] sm:$0xff]  ;;  %v2116_v21 = vmul.f32 %v3618_v1, %v1091_v16 }
 0x3ae   : > { %3108 = vst [vmem:[%s3630_s21 + $0x1bd0] sm:$0xff] %v2084_v20  ;;  %v1093_v20 = vld [vmem:[%s3611_s28 + $0x1ce0] sm:$0xff]  ;;  %v2117_v23 = vmul.f32 %v3618_v1, %v1092_v18 }
 0x3af   : > { %3109 = vst [vmem:[%s3630_s21 + $0x1bd8] sm:$0xff] %v2085_v22  ;;  %v1094_v22 = vld [vmem:[%s3611_s28 + $0x1ce8] sm:$0xff]  ;;  %v2118_v25 = vmul.f32 %v3618_v1, %v1093_v20 }
 0x3b0   : > { %3110 = vst [vmem:[%s3630_s21 + $0x1be0] sm:$0xff] %v2086_v24  ;;  %v1095_v24 = vld [vmem:[%s3611_s28 + $0x1cf0] sm:$0xff]  ;;  %v2119_v27 = vmul.f32 %v3618_v1, %v1094_v22 }
 0x3b1   : > { %3111 = vst [vmem:[%s3630_s21 + $0x1be8] sm:$0xff] %v2087_v26  ;;  %v1096_v26 = vld [vmem:[%s3611_s28 + $0x1cf8] sm:$0xff]  ;;  %v2120_v29 = vmul.f32 %v3618_v1, %v1095_v24 }
 0x3b2   : > { %3112 = vst [vmem:[%s3630_s21 + $0x1bf0] sm:$0xff] %v2088_v28  ;;  %v1097_v28 = vld [vmem:[%s3611_s28 + $0x1d00] sm:$0xff]  ;;  %v2121_v31 = vmul.f32 %v3618_v1, %v1096_v26 }
 0x3b3   : > { %3113 = vst [vmem:[%s3630_s21 + $0x1bf8] sm:$0xff] %v2089_v30  ;;  %v1098_v30 = vld [vmem:[%s3611_s28 + $0x1d08] sm:$0xff]  ;;  %v2122_v33 = vmul.f32 %v3618_v1, %v1097_v28 }
 0x3b4   : > { %3114 = vst [vmem:[%s3630_s21 + $0x1c00] sm:$0xff] %v2090_v32  ;;  %v1099_v32 = vld [vmem:[%s3611_s28 + $0x1d10] sm:$0xff]  ;;  %v2123_v35 = vmul.f32 %v3618_v1, %v1098_v30 }
 0x3b5   : > { %3115 = vst [vmem:[%s3630_s21 + $0x1c08] sm:$0xff] %v2091_v34  ;;  %v1100_v34 = vld [vmem:[%s3611_s28 + $0x1d18] sm:$0xff]  ;;  %v2124_v37 = vmul.f32 %v3618_v1, %v1099_v32 }
 0x3b6   : > { %3116 = vst [vmem:[%s3630_s21 + $0x1c10] sm:$0xff] %v2092_v36  ;;  %v1101_v36 = vld [vmem:[%s3611_s28 + $0x1d20] sm:$0xff]  ;;  %v2125_v39 = vmul.f32 %v3618_v1, %v1100_v34 }
 0x3b7   : > { %3117 = vst [vmem:[%s3630_s21 + $0x1c18] sm:$0xff] %v2093_v38  ;;  %v1102_v38 = vld [vmem:[%s3611_s28 + $0x1d28] sm:$0xff]  ;;  %v2126_v41 = vmul.f32 %v3618_v1, %v1101_v36 }
 0x3b8   : > { %3118 = vst [vmem:[%s3630_s21 + $0x1c20] sm:$0xff] %v2094_v40  ;;  %v1103_v40 = vld [vmem:[%s3611_s28 + $0x1d30] sm:$0xff]  ;;  %v2127_v43 = vmul.f32 %v3618_v1, %v1102_v38 }
 0x3b9   : > { %3119 = vst [vmem:[%s3630_s21 + $0x1c28] sm:$0xff] %v2095_v42  ;;  %v1104_v42 = vld [vmem:[%s3611_s28 + $0x1d38] sm:$0xff]  ;;  %v2128_v45 = vmul.f32 %v3618_v1, %v1103_v40 }
 0x3ba   : > { %3120 = vst [vmem:[%s3630_s21 + $0x1c30] sm:$0xff] %v2096_v44  ;;  %v1105_v44 = vld [vmem:[%s3611_s28 + $0x1d40] sm:$0xff]  ;;  %v2129_v47 = vmul.f32 %v3618_v1, %v1104_v42 }
 0x3bb   : > { %3121 = vst [vmem:[%s3630_s21 + $0x1c38] sm:$0xff] %v2097_v46  ;;  %v1106_v46 = vld [vmem:[%s3611_s28 + $0x1d48] sm:$0xff]  ;;  %v2130_v49 = vmul.f32 %v3618_v1, %v1105_v44 }
 0x3bc   : > { %3122 = vst [vmem:[%s3630_s21 + $0x1c40] sm:$0xff] %v2098_v48  ;;  %v1107_v48 = vld [vmem:[%s3611_s28 + $0x1d50] sm:$0xff]  ;;  %v2131_v51 = vmul.f32 %v3618_v1, %v1106_v46 }
 0x3bd   : > { %3123 = vst [vmem:[%s3630_s21 + $0x1c48] sm:$0xff] %v2099_v50  ;;  %v1108_v50 = vld [vmem:[%s3611_s28 + $0x1d58] sm:$0xff]  ;;  %v2132_v53 = vmul.f32 %v3618_v1, %v1107_v48 }
 0x3be   : > { %3124 = vst [vmem:[%s3630_s21 + $0x1c50] sm:$0xff] %v2100_v52  ;;  %v1109_v52 = vld [vmem:[%s3611_s28 + $0x1d60] sm:$0xff]  ;;  %v2133_v55 = vmul.f32 %v3618_v1, %v1108_v50 }
 0x3bf   : > { %3125 = vst [vmem:[%s3630_s21 + $0x1c58] sm:$0xff] %v2101_v54  ;;  %v1110_v54 = vld [vmem:[%s3611_s28 + $0x1d68] sm:$0xff]  ;;  %v2134_v57 = vmul.f32 %v3618_v1, %v1109_v52 }
 0x3c0   : > { %3126 = vst [vmem:[%s3630_s21 + $0x1c60] sm:$0xff] %v2102_v56  ;;  %v1111_v56 = vld [vmem:[%s3611_s28 + $0x1d70] sm:$0xff]  ;;  %v2135_v59 = vmul.f32 %v3618_v1, %v1110_v54 }
 0x3c1   : > { %3127 = vst [vmem:[%s3630_s21 + $0x1c68] sm:$0xff] %v2103_v58  ;;  %v1112_v58 = vld [vmem:[%s3611_s28 + $0x1d78] sm:$0xff]  ;;  %v2136_v61 = vmul.f32 %v3618_v1, %v1111_v56 }
 0x3c2   : > { %3128 = vst [vmem:[%s3630_s21 + $0x1c70] sm:$0xff] %v2104_v60  ;;  %v1113_v60 = vld [vmem:[%s3611_s28 + $0x1d80] sm:$0xff]  ;;  %v2137_v63 = vmul.f32 %v3618_v1, %v1112_v58 }
 0x3c3   : > { %3129 = vst [vmem:[%s3630_s21 + $0x1c78] sm:$0xff] %v2105_v62  ;;  %v1114_v62 = vld [vmem:[%s3611_s28 + $0x1d88] sm:$0xff]  ;;  %v2138_v2 = vmul.f32 %v3618_v1, %v1113_v60 }
 0x3c4   : > { %3130 = vst [vmem:[%s3630_s21 + $0x1c80] sm:$0xff] %v2106_v0  ;;  %v1115_v0 = vld [vmem:[%s3611_s28 + $0x1d90] sm:$0xff]  ;;  %v2139_v4 = vmul.f32 %v3618_v1, %v1114_v62 }
 0x3c5   : > { %3131 = vst [vmem:[%s3630_s21 + $0x1c88] sm:$0xff] %v2107_v3  ;;  %v1116_v3 = vld [vmem:[%s3611_s28 + $0x1d98] sm:$0xff]  ;;  %v2140_v6 = vmul.f32 %v3618_v1, %v1115_v0 }
 0x3c6   : > { %3132 = vst [vmem:[%s3630_s21 + $0x1c90] sm:$0xff] %v2108_v5  ;;  %v1117_v5 = vld [vmem:[%s3611_s28 + $0x1da0] sm:$0xff]  ;;  %v2141_v8 = vmul.f32 %v3618_v1, %v1116_v3 }
 0x3c7   : > { %3133 = vst [vmem:[%s3630_s21 + $0x1c98] sm:$0xff] %v2109_v7  ;;  %v1118_v7 = vld [vmem:[%s3611_s28 + $0x1da8] sm:$0xff]  ;;  %v2142_v10 = vmul.f32 %v3618_v1, %v1117_v5 }
 0x3c8   : > { %3134 = vst [vmem:[%s3630_s21 + $0x1ca0] sm:$0xff] %v2110_v9  ;;  %v1119_v9 = vld [vmem:[%s3611_s28 + $0x1db0] sm:$0xff]  ;;  %v2143_v12 = vmul.f32 %v3618_v1, %v1118_v7 }
 0x3c9   : > { %3135 = vst [vmem:[%s3630_s21 + $0x1ca8] sm:$0xff] %v2111_v11  ;;  %v1120_v11 = vld [vmem:[%s3611_s28 + $0x1db8] sm:$0xff]  ;;  %v2144_v14 = vmul.f32 %v3618_v1, %v1119_v9 }
 0x3ca   : > { %3136 = vst [vmem:[%s3630_s21 + $0x1cb0] sm:$0xff] %v2112_v13  ;;  %v1121_v13 = vld [vmem:[%s3611_s28 + $0x1dc0] sm:$0xff]  ;;  %v2145_v16 = vmul.f32 %v3618_v1, %v1120_v11 }
 0x3cb   : > { %3137 = vst [vmem:[%s3630_s21 + $0x1cb8] sm:$0xff] %v2113_v15  ;;  %v1122_v15 = vld [vmem:[%s3611_s28 + $0x1dc8] sm:$0xff]  ;;  %v2146_v18 = vmul.f32 %v3618_v1, %v1121_v13 }
 0x3cc   : > { %3138 = vst [vmem:[%s3630_s21 + $0x1cc0] sm:$0xff] %v2114_v17  ;;  %v1123_v17 = vld [vmem:[%s3611_s28 + $0x1dd0] sm:$0xff]  ;;  %v2147_v20 = vmul.f32 %v3618_v1, %v1122_v15 }
 0x3cd   : > { %3139 = vst [vmem:[%s3630_s21 + $0x1cc8] sm:$0xff] %v2115_v19  ;;  %v1124_v19 = vld [vmem:[%s3611_s28 + $0x1dd8] sm:$0xff]  ;;  %v2148_v22 = vmul.f32 %v3618_v1, %v1123_v17 }
 0x3ce   : > { %3140 = vst [vmem:[%s3630_s21 + $0x1cd0] sm:$0xff] %v2116_v21  ;;  %v1125_v21 = vld [vmem:[%s3611_s28 + $0x1de0] sm:$0xff]  ;;  %v2149_v24 = vmul.f32 %v3618_v1, %v1124_v19 }
 0x3cf   : > { %3141 = vst [vmem:[%s3630_s21 + $0x1cd8] sm:$0xff] %v2117_v23  ;;  %v1126_v23 = vld [vmem:[%s3611_s28 + $0x1de8] sm:$0xff]  ;;  %v2150_v26 = vmul.f32 %v3618_v1, %v1125_v21 }
 0x3d0   : > { %3142 = vst [vmem:[%s3630_s21 + $0x1ce0] sm:$0xff] %v2118_v25  ;;  %v1127_v25 = vld [vmem:[%s3611_s28 + $0x1df0] sm:$0xff]  ;;  %v2151_v28 = vmul.f32 %v3618_v1, %v1126_v23 }
 0x3d1   : > { %3143 = vst [vmem:[%s3630_s21 + $0x1ce8] sm:$0xff] %v2119_v27  ;;  %v1128_v27 = vld [vmem:[%s3611_s28 + $0x1df8] sm:$0xff]  ;;  %v2152_v30 = vmul.f32 %v3618_v1, %v1127_v25 }
 0x3d2   : > { %3144 = vst [vmem:[%s3630_s21 + $0x1cf0] sm:$0xff] %v2120_v29  ;;  %v1129_v29 = vld [vmem:[%s3611_s28 + $0x1e00] sm:$0xff]  ;;  %v2153_v32 = vmul.f32 %v3618_v1, %v1128_v27 }
 0x3d3   : > { %3145 = vst [vmem:[%s3630_s21 + $0x1cf8] sm:$0xff] %v2121_v31  ;;  %v1130_v31 = vld [vmem:[%s3611_s28 + $0x1e08] sm:$0xff]  ;;  %v2154_v34 = vmul.f32 %v3618_v1, %v1129_v29 }
 0x3d4   : > { %3146 = vst [vmem:[%s3630_s21 + $0x1d00] sm:$0xff] %v2122_v33  ;;  %v1131_v33 = vld [vmem:[%s3611_s28 + $0x1e10] sm:$0xff]  ;;  %v2155_v36 = vmul.f32 %v3618_v1, %v1130_v31 }
 0x3d5   : > { %3147 = vst [vmem:[%s3630_s21 + $0x1d08] sm:$0xff] %v2123_v35  ;;  %v1132_v35 = vld [vmem:[%s3611_s28 + $0x1e18] sm:$0xff]  ;;  %v2156_v38 = vmul.f32 %v3618_v1, %v1131_v33 }
 0x3d6   : > { %3148 = vst [vmem:[%s3630_s21 + $0x1d10] sm:$0xff] %v2124_v37  ;;  %v1133_v37 = vld [vmem:[%s3611_s28 + $0x1e20] sm:$0xff]  ;;  %v2157_v40 = vmul.f32 %v3618_v1, %v1132_v35 }
 0x3d7   : > { %3149 = vst [vmem:[%s3630_s21 + $0x1d18] sm:$0xff] %v2125_v39  ;;  %v1134_v39 = vld [vmem:[%s3611_s28 + $0x1e28] sm:$0xff]  ;;  %v2158_v42 = vmul.f32 %v3618_v1, %v1133_v37 }
 0x3d8   : > { %3150 = vst [vmem:[%s3630_s21 + $0x1d20] sm:$0xff] %v2126_v41  ;;  %v1135_v41 = vld [vmem:[%s3611_s28 + $0x1e30] sm:$0xff]  ;;  %v2159_v44 = vmul.f32 %v3618_v1, %v1134_v39 }
 0x3d9   : > { %3151 = vst [vmem:[%s3630_s21 + $0x1d28] sm:$0xff] %v2127_v43  ;;  %v1136_v43 = vld [vmem:[%s3611_s28 + $0x1e38] sm:$0xff]  ;;  %v2160_v46 = vmul.f32 %v3618_v1, %v1135_v41 }
 0x3da   : > { %3152 = vst [vmem:[%s3630_s21 + $0x1d30] sm:$0xff] %v2128_v45  ;;  %v1137_v45 = vld [vmem:[%s3611_s28 + $0x1e40] sm:$0xff]  ;;  %v2161_v48 = vmul.f32 %v3618_v1, %v1136_v43 }
 0x3db   : > { %3153 = vst [vmem:[%s3630_s21 + $0x1d38] sm:$0xff] %v2129_v47  ;;  %v1138_v47 = vld [vmem:[%s3611_s28 + $0x1e48] sm:$0xff]  ;;  %v2162_v50 = vmul.f32 %v3618_v1, %v1137_v45 }
 0x3dc   : > { %3154 = vst [vmem:[%s3630_s21 + $0x1d40] sm:$0xff] %v2130_v49  ;;  %v1139_v49 = vld [vmem:[%s3611_s28 + $0x1e50] sm:$0xff]  ;;  %v2163_v52 = vmul.f32 %v3618_v1, %v1138_v47 }
 0x3dd   : > { %3155 = vst [vmem:[%s3630_s21 + $0x1d48] sm:$0xff] %v2131_v51  ;;  %v1140_v51 = vld [vmem:[%s3611_s28 + $0x1e58] sm:$0xff]  ;;  %v2164_v54 = vmul.f32 %v3618_v1, %v1139_v49 }
 0x3de   : > { %3156 = vst [vmem:[%s3630_s21 + $0x1d50] sm:$0xff] %v2132_v53  ;;  %v1141_v53 = vld [vmem:[%s3611_s28 + $0x1e60] sm:$0xff]  ;;  %v2165_v56 = vmul.f32 %v3618_v1, %v1140_v51 }
 0x3df   : > { %3157 = vst [vmem:[%s3630_s21 + $0x1d58] sm:$0xff] %v2133_v55  ;;  %v1142_v55 = vld [vmem:[%s3611_s28 + $0x1e68] sm:$0xff]  ;;  %v2166_v58 = vmul.f32 %v3618_v1, %v1141_v53 }
 0x3e0   : > { %3158 = vst [vmem:[%s3630_s21 + $0x1d60] sm:$0xff] %v2134_v57  ;;  %v1143_v57 = vld [vmem:[%s3611_s28 + $0x1e70] sm:$0xff]  ;;  %v2167_v60 = vmul.f32 %v3618_v1, %v1142_v55 }
 0x3e1   : > { %3159 = vst [vmem:[%s3630_s21 + $0x1d68] sm:$0xff] %v2135_v59  ;;  %v1144_v59 = vld [vmem:[%s3611_s28 + $0x1e78] sm:$0xff]  ;;  %v2168_v62 = vmul.f32 %v3618_v1, %v1143_v57 }
 0x3e2   : > { %3160 = vst [vmem:[%s3630_s21 + $0x1d70] sm:$0xff] %v2136_v61  ;;  %v1145_v61 = vld [vmem:[%s3611_s28 + $0x1e80] sm:$0xff]  ;;  %v2169_v0 = vmul.f32 %v3618_v1, %v1144_v59 }
 0x3e3   : > { %3161 = vst [vmem:[%s3630_s21 + $0x1d78] sm:$0xff] %v2137_v63  ;;  %v1146_v63 = vld [vmem:[%s3611_s28 + $0x1e88] sm:$0xff]  ;;  %v2170_v3 = vmul.f32 %v3618_v1, %v1145_v61 }
 0x3e4   : > { %3162 = vst [vmem:[%s3630_s21 + $0x1d80] sm:$0xff] %v2138_v2  ;;  %v1147_v2 = vld [vmem:[%s3611_s28 + $0x1e90] sm:$0xff]  ;;  %v2171_v5 = vmul.f32 %v3618_v1, %v1146_v63 }
 0x3e5   : > { %3163 = vst [vmem:[%s3630_s21 + $0x1d88] sm:$0xff] %v2139_v4  ;;  %v1148_v4 = vld [vmem:[%s3611_s28 + $0x1e98] sm:$0xff]  ;;  %v2172_v7 = vmul.f32 %v3618_v1, %v1147_v2 }
 0x3e6   : > { %3164 = vst [vmem:[%s3630_s21 + $0x1d90] sm:$0xff] %v2140_v6  ;;  %v1149_v6 = vld [vmem:[%s3611_s28 + $0x1ea0] sm:$0xff]  ;;  %v2173_v9 = vmul.f32 %v3618_v1, %v1148_v4 }
 0x3e7   : > { %3165 = vst [vmem:[%s3630_s21 + $0x1d98] sm:$0xff] %v2141_v8  ;;  %v1150_v8 = vld [vmem:[%s3611_s28 + $0x1ea8] sm:$0xff]  ;;  %v2174_v11 = vmul.f32 %v3618_v1, %v1149_v6 }
 0x3e8   : > { %3166 = vst [vmem:[%s3630_s21 + $0x1da0] sm:$0xff] %v2142_v10  ;;  %v1151_v10 = vld [vmem:[%s3611_s28 + $0x1eb0] sm:$0xff]  ;;  %v2175_v13 = vmul.f32 %v3618_v1, %v1150_v8 }
 0x3e9   : > { %3167 = vst [vmem:[%s3630_s21 + $0x1da8] sm:$0xff] %v2143_v12  ;;  %v1152_v12 = vld [vmem:[%s3611_s28 + $0x1eb8] sm:$0xff]  ;;  %v2176_v15 = vmul.f32 %v3618_v1, %v1151_v10 }
 0x3ea   : > { %3168 = vst [vmem:[%s3630_s21 + $0x1db0] sm:$0xff] %v2144_v14  ;;  %v1153_v14 = vld [vmem:[%s3611_s28 + $0x1ec0] sm:$0xff]  ;;  %v2177_v17 = vmul.f32 %v3618_v1, %v1152_v12 }
 0x3eb   : > { %3169 = vst [vmem:[%s3630_s21 + $0x1db8] sm:$0xff] %v2145_v16  ;;  %v1154_v16 = vld [vmem:[%s3611_s28 + $0x1ec8] sm:$0xff]  ;;  %v2178_v19 = vmul.f32 %v3618_v1, %v1153_v14 }
 0x3ec   : > { %3170 = vst [vmem:[%s3630_s21 + $0x1dc0] sm:$0xff] %v2146_v18  ;;  %v1155_v18 = vld [vmem:[%s3611_s28 + $0x1ed0] sm:$0xff]  ;;  %v2179_v21 = vmul.f32 %v3618_v1, %v1154_v16 }
 0x3ed   : > { %3171 = vst [vmem:[%s3630_s21 + $0x1dc8] sm:$0xff] %v2147_v20  ;;  %v1156_v20 = vld [vmem:[%s3611_s28 + $0x1ed8] sm:$0xff]  ;;  %v2180_v23 = vmul.f32 %v3618_v1, %v1155_v18 }
 0x3ee   : > { %3172 = vst [vmem:[%s3630_s21 + $0x1dd0] sm:$0xff] %v2148_v22  ;;  %v1157_v22 = vld [vmem:[%s3611_s28 + $0x1ee0] sm:$0xff]  ;;  %v2181_v25 = vmul.f32 %v3618_v1, %v1156_v20 }
 0x3ef   : > { %3173 = vst [vmem:[%s3630_s21 + $0x1dd8] sm:$0xff] %v2149_v24  ;;  %v1158_v24 = vld [vmem:[%s3611_s28 + $0x1ee8] sm:$0xff]  ;;  %v2182_v27 = vmul.f32 %v3618_v1, %v1157_v22 }
 0x3f0   : > { %3174 = vst [vmem:[%s3630_s21 + $0x1de0] sm:$0xff] %v2150_v26  ;;  %v1159_v26 = vld [vmem:[%s3611_s28 + $0x1ef0] sm:$0xff]  ;;  %v2183_v29 = vmul.f32 %v3618_v1, %v1158_v24 }
 0x3f1   : > { %3175 = vst [vmem:[%s3630_s21 + $0x1de8] sm:$0xff] %v2151_v28  ;;  %v1160_v28 = vld [vmem:[%s3611_s28 + $0x1ef8] sm:$0xff]  ;;  %v2184_v31 = vmul.f32 %v3618_v1, %v1159_v26 }
 0x3f2   : > { %3176 = vst [vmem:[%s3630_s21 + $0x1df0] sm:$0xff] %v2152_v30  ;;  %v1161_v30 = vld [vmem:[%s3611_s28 + $0x1f00] sm:$0xff]  ;;  %v2185_v33 = vmul.f32 %v3618_v1, %v1160_v28 }
 0x3f3   : > { %3177 = vst [vmem:[%s3630_s21 + $0x1df8] sm:$0xff] %v2153_v32  ;;  %v1162_v32 = vld [vmem:[%s3611_s28 + $0x1f08] sm:$0xff]  ;;  %v2186_v35 = vmul.f32 %v3618_v1, %v1161_v30 }
 0x3f4   : > { %3178 = vst [vmem:[%s3630_s21 + $0x1e00] sm:$0xff] %v2154_v34  ;;  %v1163_v34 = vld [vmem:[%s3611_s28 + $0x1f10] sm:$0xff]  ;;  %v2187_v37 = vmul.f32 %v3618_v1, %v1162_v32 }
 0x3f5   : > { %3179 = vst [vmem:[%s3630_s21 + $0x1e08] sm:$0xff] %v2155_v36  ;;  %v1164_v36 = vld [vmem:[%s3611_s28 + $0x1f18] sm:$0xff]  ;;  %v2188_v39 = vmul.f32 %v3618_v1, %v1163_v34 }
 0x3f6   : > { %3180 = vst [vmem:[%s3630_s21 + $0x1e10] sm:$0xff] %v2156_v38  ;;  %v1165_v38 = vld [vmem:[%s3611_s28 + $0x1f20] sm:$0xff]  ;;  %v2189_v41 = vmul.f32 %v3618_v1, %v1164_v36 }
 0x3f7   : > { %3181 = vst [vmem:[%s3630_s21 + $0x1e18] sm:$0xff] %v2157_v40  ;;  %v1166_v40 = vld [vmem:[%s3611_s28 + $0x1f28] sm:$0xff]  ;;  %v2190_v43 = vmul.f32 %v3618_v1, %v1165_v38 }
 0x3f8   : > { %3182 = vst [vmem:[%s3630_s21 + $0x1e20] sm:$0xff] %v2158_v42  ;;  %v1167_v42 = vld [vmem:[%s3611_s28 + $0x1f30] sm:$0xff]  ;;  %v2191_v45 = vmul.f32 %v3618_v1, %v1166_v40 }
 0x3f9   : > { %3183 = vst [vmem:[%s3630_s21 + $0x1e28] sm:$0xff] %v2159_v44  ;;  %v1168_v44 = vld [vmem:[%s3611_s28 + $0x1f38] sm:$0xff]  ;;  %v2192_v47 = vmul.f32 %v3618_v1, %v1167_v42 }
 0x3fa   : > { %3184 = vst [vmem:[%s3630_s21 + $0x1e30] sm:$0xff] %v2160_v46  ;;  %v1169_v46 = vld [vmem:[%s3611_s28 + $0x1f40] sm:$0xff]  ;;  %v2193_v49 = vmul.f32 %v3618_v1, %v1168_v44 }
 0x3fb   : > { %3185 = vst [vmem:[%s3630_s21 + $0x1e38] sm:$0xff] %v2161_v48  ;;  %v1170_v48 = vld [vmem:[%s3611_s28 + $0x1f48] sm:$0xff]  ;;  %v2194_v51 = vmul.f32 %v3618_v1, %v1169_v46 }
 0x3fc   : > { %3186 = vst [vmem:[%s3630_s21 + $0x1e40] sm:$0xff] %v2162_v50  ;;  %v1171_v50 = vld [vmem:[%s3611_s28 + $0x1f50] sm:$0xff]  ;;  %v2195_v53 = vmul.f32 %v3618_v1, %v1170_v48 }
 0x3fd   : > { %3187 = vst [vmem:[%s3630_s21 + $0x1e48] sm:$0xff] %v2163_v52  ;;  %v1172_v52 = vld [vmem:[%s3611_s28 + $0x1f58] sm:$0xff]  ;;  %v2196_v55 = vmul.f32 %v3618_v1, %v1171_v50 }
 0x3fe   : > { %3188 = vst [vmem:[%s3630_s21 + $0x1e50] sm:$0xff] %v2164_v54  ;;  %v1173_v54 = vld [vmem:[%s3611_s28 + $0x1f60] sm:$0xff]  ;;  %v2197_v57 = vmul.f32 %v3618_v1, %v1172_v52 }
 0x3ff   : > { %3189 = vst [vmem:[%s3630_s21 + $0x1e58] sm:$0xff] %v2165_v56  ;;  %v1174_v56 = vld [vmem:[%s3611_s28 + $0x1f68] sm:$0xff]  ;;  %v2198_v59 = vmul.f32 %v3618_v1, %v1173_v54 }
 0x400   : > { %3190 = vst [vmem:[%s3630_s21 + $0x1e60] sm:$0xff] %v2166_v58  ;;  %v1175_v58 = vld [vmem:[%s3611_s28 + $0x1f70] sm:$0xff]  ;;  %v2199_v61 = vmul.f32 %v3618_v1, %v1174_v56 }
 0x401   : > { %3191 = vst [vmem:[%s3630_s21 + $0x1e68] sm:$0xff] %v2167_v60  ;;  %v1176_v60 = vld [vmem:[%s3611_s28 + $0x1f78] sm:$0xff]  ;;  %v2200_v63 = vmul.f32 %v3618_v1, %v1175_v58 }
 0x402   : > { %3192 = vst [vmem:[%s3630_s21 + $0x1e70] sm:$0xff] %v2168_v62  ;;  %v1177_v62 = vld [vmem:[%s3611_s28 + $0x1f80] sm:$0xff]  ;;  %v2201_v2 = vmul.f32 %v3618_v1, %v1176_v60 }
 0x403   : > { %3193 = vst [vmem:[%s3630_s21 + $0x1e78] sm:$0xff] %v2169_v0  ;;  %v1178_v0 = vld [vmem:[%s3611_s28 + $0x1f88] sm:$0xff]  ;;  %v2202_v4 = vmul.f32 %v3618_v1, %v1177_v62 }
 0x404   : > { %3194 = vst [vmem:[%s3630_s21 + $0x1e80] sm:$0xff] %v2170_v3  ;;  %v1179_v3 = vld [vmem:[%s3611_s28 + $0x1f90] sm:$0xff]  ;;  %v2203_v6 = vmul.f32 %v3618_v1, %v1178_v0 }
 0x405   : > { %3195 = vst [vmem:[%s3630_s21 + $0x1e88] sm:$0xff] %v2171_v5  ;;  %v1180_v5 = vld [vmem:[%s3611_s28 + $0x1f98] sm:$0xff]  ;;  %v2204_v8 = vmul.f32 %v3618_v1, %v1179_v3 }
 0x406   : > { %3196 = vst [vmem:[%s3630_s21 + $0x1e90] sm:$0xff] %v2172_v7  ;;  %v1181_v7 = vld [vmem:[%s3611_s28 + $0x1fa0] sm:$0xff]  ;;  %v2205_v10 = vmul.f32 %v3618_v1, %v1180_v5 }
 0x407   : > { %3197 = vst [vmem:[%s3630_s21 + $0x1e98] sm:$0xff] %v2173_v9  ;;  %v1182_v9 = vld [vmem:[%s3611_s28 + $0x1fa8] sm:$0xff]  ;;  %v2206_v12 = vmul.f32 %v3618_v1, %v1181_v7 }
 0x408   : > { %3198 = vst [vmem:[%s3630_s21 + $0x1ea0] sm:$0xff] %v2174_v11  ;;  %v1183_v11 = vld [vmem:[%s3611_s28 + $0x1fb0] sm:$0xff]  ;;  %v2207_v14 = vmul.f32 %v3618_v1, %v1182_v9 }
 0x409   : > { %3199 = vst [vmem:[%s3630_s21 + $0x1ea8] sm:$0xff] %v2175_v13  ;;  %v1184_v13 = vld [vmem:[%s3611_s28 + $0x1fb8] sm:$0xff]  ;;  %v2208_v16 = vmul.f32 %v3618_v1, %v1183_v11 }
 0x40a   : > { %3200 = vst [vmem:[%s3630_s21 + $0x1eb0] sm:$0xff] %v2176_v15  ;;  %v1185_v15 = vld [vmem:[%s3611_s28 + $0x1fc0] sm:$0xff]  ;;  %v2209_v18 = vmul.f32 %v3618_v1, %v1184_v13 }
 0x40b   : > { %3201 = vst [vmem:[%s3630_s21 + $0x1eb8] sm:$0xff] %v2177_v17  ;;  %v1186_v17 = vld [vmem:[%s3611_s28 + $0x1fc8] sm:$0xff]  ;;  %v2210_v20 = vmul.f32 %v3618_v1, %v1185_v15 }
 0x40c   : > { %3202 = vst [vmem:[%s3630_s21 + $0x1ec0] sm:$0xff] %v2178_v19  ;;  %v1187_v19 = vld [vmem:[%s3611_s28 + $0x1fd0] sm:$0xff]  ;;  %v2211_v22 = vmul.f32 %v3618_v1, %v1186_v17 }
 0x40d   : > { %3203 = vst [vmem:[%s3630_s21 + $0x1ec8] sm:$0xff] %v2179_v21  ;;  %v1188_v21 = vld [vmem:[%s3611_s28 + $0x1fd8] sm:$0xff]  ;;  %v2212_v24 = vmul.f32 %v3618_v1, %v1187_v19 }
 0x40e   : > { %3204 = vst [vmem:[%s3630_s21 + $0x1ed0] sm:$0xff] %v2180_v23  ;;  %v1189_v23 = vld [vmem:[%s3611_s28 + $0x1fe0] sm:$0xff]  ;;  %v2213_v26 = vmul.f32 %v3618_v1, %v1188_v21 }
 0x40f   : > { %3205 = vst [vmem:[%s3630_s21 + $0x1ed8] sm:$0xff] %v2181_v25  ;;  %v1190_v25 = vld [vmem:[%s3611_s28 + $0x1fe8] sm:$0xff]  ;;  %v2214_v28 = vmul.f32 %v3618_v1, %v1189_v23 }
 0x410   : > { %3206 = vst [vmem:[%s3630_s21 + $0x1ee0] sm:$0xff] %v2182_v27  ;;  %v1191_v27 = vld [vmem:[%s3611_s28 + $0x1ff0] sm:$0xff]  ;;  %v2215_v30 = vmul.f32 %v3618_v1, %v1190_v25 }
 0x411   : > { %3207 = vst [vmem:[%s3630_s21 + $0x1ee8] sm:$0xff] %v2183_v29  ;;  %v1192_v29 = vld [vmem:[%s3611_s28 + $0x1ff8] sm:$0xff] }
 0x412   : > { %3208 = vst [vmem:[%s3630_s21 + $0x1ef0] sm:$0xff] %v2184_v31  ;;  %v2216_v31 = vmul.f32 %v3618_v1, %v1191_v27  ;;  %v2217_v32 = vmul.f32 %v3618_v1, %v1192_v29 }
 0x413   : > { %3209 = vst [vmem:[%s3630_s21 + $0x1ef8] sm:$0xff] %v2185_v33 }
 0x414   : > { %3210 = vst [vmem:[%s3630_s21 + $0x1f00] sm:$0xff] %v2186_v35 }
 0x415   : > { %3211 = vst [vmem:[%s3630_s21 + $0x1f08] sm:$0xff] %v2187_v37 }
 0x416   : > { %3212 = vst [vmem:[%s3630_s21 + $0x1f10] sm:$0xff] %v2188_v39 }
 0x417   : > { %3213 = vst [vmem:[%s3630_s21 + $0x1f18] sm:$0xff] %v2189_v41 }
 0x418   : > { %3214 = vst [vmem:[%s3630_s21 + $0x1f20] sm:$0xff] %v2190_v43 }
 0x419   : > { %3215 = vst [vmem:[%s3630_s21 + $0x1f28] sm:$0xff] %v2191_v45 }
 0x41a   : > { %3216 = vst [vmem:[%s3630_s21 + $0x1f30] sm:$0xff] %v2192_v47 }
 0x41b   : > { %3217 = vst [vmem:[%s3630_s21 + $0x1f38] sm:$0xff] %v2193_v49 }
 0x41c   : > { %3218 = vst [vmem:[%s3630_s21 + $0x1f40] sm:$0xff] %v2194_v51 }
 0x41d   : > { %3219 = vst [vmem:[%s3630_s21 + $0x1f48] sm:$0xff] %v2195_v53 }
 0x41e   : > { %3220 = vst [vmem:[%s3630_s21 + $0x1f50] sm:$0xff] %v2196_v55 }
 0x41f   : > { %3221 = vst [vmem:[%s3630_s21 + $0x1f58] sm:$0xff] %v2197_v57 }
 0x420   : > { %3222 = vst [vmem:[%s3630_s21 + $0x1f60] sm:$0xff] %v2198_v59 }
 0x421   : > { %3223 = vst [vmem:[%s3630_s21 + $0x1f68] sm:$0xff] %v2199_v61 }
 0x422   : > { %3224 = vst [vmem:[%s3630_s21 + $0x1f70] sm:$0xff] %v2200_v63 }
 0x423   : > { %3225 = vst [vmem:[%s3630_s21 + $0x1f78] sm:$0xff] %v2201_v2 }
 0x424   : > { %3226 = vst [vmem:[%s3630_s21 + $0x1f80] sm:$0xff] %v2202_v4 }
 0x425   : > { %3227 = vst [vmem:[%s3630_s21 + $0x1f88] sm:$0xff] %v2203_v6 }
 0x426   : > { %3228 = vst [vmem:[%s3630_s21 + $0x1f90] sm:$0xff] %v2204_v8 }
 0x427   : > { %3229 = vst [vmem:[%s3630_s21 + $0x1f98] sm:$0xff] %v2205_v10 }
 0x428   : > { %3230 = vst [vmem:[%s3630_s21 + $0x1fa0] sm:$0xff] %v2206_v12 }
 0x429   : > { %3231 = vst [vmem:[%s3630_s21 + $0x1fa8] sm:$0xff] %v2207_v14 }
 0x42a   : > { %3232 = vst [vmem:[%s3630_s21 + $0x1fb0] sm:$0xff] %v2208_v16 }
 0x42b   : > { %3233 = vst [vmem:[%s3630_s21 + $0x1fb8] sm:$0xff] %v2209_v18 }
 0x42c   : > { %3234 = vst [vmem:[%s3630_s21 + $0x1fc0] sm:$0xff] %v2210_v20 }
 0x42d   : > { %3235 = vst [vmem:[%s3630_s21 + $0x1fc8] sm:$0xff] %v2211_v22 }
 0x42e   : > { %3236 = vst [vmem:[%s3630_s21 + $0x1fd0] sm:$0xff] %v2212_v24 }
 0x42f   : > { %3237 = vst [vmem:[%s3630_s21 + $0x1fd8] sm:$0xff] %v2213_v26 }
 0x430   : > { %3238 = vst [vmem:[%s3630_s21 + $0x1fe0] sm:$0xff] %v2214_v28 }
 0x431   : > { %3239 = vst [vmem:[%s3630_s21 + $0x1fe8] sm:$0xff] %v2215_v30 }
 0x432   : > { %3240 = vst [vmem:[%s3630_s21 + $0x1ff0] sm:$0xff] %v2216_v31 }
 0x433   : > { %3241 = vst [vmem:[%s3630_s21 + $0x1ff8] sm:$0xff] %v2217_v32 }
 0x434   : > { %3459 = shalt.err (!%p3456_p4)
}
 0x435   : > { %s3502_s24 = smov 1024   ;;  %s3503_s25 = smov 64  }
 0x436   : > { %3354 = dma.vmem_to_hbm [thread:$0]  (%p3571_p10), %s3257_s5, 131072, %s3259_s6, %s3243_s7, %s3502_s24, %s3502_s24, %s3503_s25  }
 0x437 PF: > { %p3365_p5 = scmp.ge.s32.totalorder %s3498_s14, 2  ;;  %s3273_s26 = sand.u32 1, %s3486_s11  }
 0x438   : > { %s3274_s27 = scalar_lea.sflag [#allocation5], %s3273_s26 }
 0x439   : > { %p3361_p7 = pnand %p3365_p5, %p3575_p11 }
 0x43b   : > { %p3362_p8 = pneg %p3361_p7 }
 0x43d   : > { %3481 = dma.done.wait (%p3362_p8), %s3274_s27, 131072  }
 0x43e   : > { %3483 = vsyncadd (%p3362_p8), %s3274_s27, 4294836224  ;;  %p16_p9 = scmp.ge.s32.totalorder %s3547_s16, 6   ;;  %s6734_s11 = smov %s3490_s12 }
 0x43f   : > { %s6735_s12 = smov %s3494_s13  ;;  %s6736_s13 = smov %s3559_s19 }
 0x440   : > { %s6737_s14 = smov %s3547_s16  ;;  %18 = sbr.rel (!%p16_p9) target bundleno = 7 (0x7), region = 73 }
 0x445   :  { %3280 = vsyncpa [#allocation4], 1 }
 0x446   :  { %3282 = vsyncpa [#allocation4 + $0x1], 1 }
 0x447   :  { %3283 = vsyncpa [#allocation5], 1 }
 0x448   :  { %3285 = vsyncpa [#allocation5 + $0x1], 1 }

</bundles_post_ra>
